<compile_context>
chip_gen: v7x
topology: tpu7x:2x2x1
jax: 0.10.0
libtpu: 0.0.40
codegen_flags: <defaults>
</compile_context>

<pallas_src>
import functools

import jax
import jax.numpy as jnp
from jax import lax
from jax.experimental import pallas as pl
from jax.experimental.pallas import tpu as pltpu

BERT_HIDDEN = 768
HIDDEN_DIMS = [768, 512, 256]
ENCODING_SIZE = 64


def _round_up(x, m):
    return ((x + m - 1) // m) * m


def _vmem_budget_bytes():
    # Generation-aware budget: ~3/4 of physical VMEM (~48 MiB on v7x's 64 MiB,
    # ~96 MiB on v5e/v6e's 128 MiB).  Conservative fallback if the query fails.
    try:
        cap = int(pltpu.get_tpu_info().vmem_capacity_bytes)
    except Exception:
        cap = 64 << 20
    return (cap * 3) // 4


def encoder_kernel(hs_ref, w1_ref, b1_ref, w2_ref, b2_ref, w3_ref, b3_ref,
                   wmv_ref, bmv_ref, eps_ref,
                   head1_ref, head2_ref, mlvc_ref,
                   acc_ref, *, inv_seq_len, pool_chunk):
    E = ENCODING_SIZE
    j = pl.program_id(1)

    @pl.when(j == 0)
    def _():
        acc_ref[...] = jnp.zeros_like(acc_ref)

    # Streaming mean-pool partial sum over this sequence tile (f32 accumulate),
    # chunked so the bf16->f32 cast never materialises the whole 3-D tile.
    n_chunks = hs_ref.shape[1] // pool_chunk

    def pool_body(c, carry):
        off = pl.multiple_of(c * pool_chunk, pool_chunk)
        acc_ref[...] += jnp.sum(
            hs_ref[:, pl.ds(off, pool_chunk), :].astype(jnp.float32), axis=1)
        return carry

    lax.fori_loop(0, n_chunks, pool_body, 0, unroll=True)

    @pl.when(j == pl.num_programs(1) - 1)
    def _():
        # Mean over the true (unpadded) sequence length; padded rows contributed 0.
        x = acc_ref[...] * inv_seq_len
        head1_ref[...] = x                                            # head_1

        # MLP: Linear -> ReLU (-> Dropout as identity), three layers.
        # bf16 into the MXU, f32 accumulate / bias / ReLU.
        h = jnp.dot(x.astype(jnp.bfloat16), w1_ref[...],
                    preferred_element_type=jnp.float32) + b1_ref[...]
        h = jnp.maximum(h, 0.0)
        h = jnp.dot(h.astype(jnp.bfloat16), w2_ref[...],
                    preferred_element_type=jnp.float32) + b2_ref[...]
        h = jnp.maximum(h, 0.0)
        h = jnp.dot(h.astype(jnp.bfloat16), w3_ref[...],
                    preferred_element_type=jnp.float32) + b3_ref[...]
        h = jnp.maximum(h, 0.0)
        head2_ref[...] = h                                            # head_2

        # Fused codings_mean | codings_log_var: one lane-dense N=128 matmul.
        mlv = jnp.dot(h.astype(jnp.bfloat16), wmv_ref[...],
                      preferred_element_type=jnp.float32) + bmv_ref[...]
        mu = mlv[:, :E]
        log_var = mlv[:, E:]

        # SamplingLayer: codings = normal(mu, exp(0.5 * log_var)) = mu + std * eps.
        codings = mu + jnp.exp(0.5 * log_var) * eps_ref[...]

        # Lane-dense fused output slab: mu | log_var | codings | pad  (4*E = 256 lanes).
        mlvc_ref[...] = jnp.concatenate(
            [mlv, codings, jnp.zeros_like(codings)], axis=-1)


def prepare_params(params):
    """One-time weight prep (hoisted out of the per-call path): bf16 casts and
    fusion of the two 64-wide heads into a single lane-dense 128-wide matmul."""
    return {
        "w1": params["w1"].astype(jnp.bfloat16),
        "b1": params["b1"].astype(jnp.float32),
        "w2": params["w2"].astype(jnp.bfloat16),
        "b2": params["b2"].astype(jnp.float32),
        "w3": params["w3"].astype(jnp.bfloat16),
        "b3": params["b3"].astype(jnp.float32),
        "wmv": jnp.concatenate([params["wm"], params["wv"]],
                               axis=1).astype(jnp.bfloat16),
        "bmv": jnp.concatenate([params["bm"], params["bv"]],
                               axis=1).astype(jnp.float32),
    }


def encoder_forward(last_hidden_state, prep, eps):
    B, S, H = last_hidden_state.shape
    assert H == BERT_HIDDEN
    E = ENCODING_SIZE
    D1, D2, D3 = HIDDEN_DIMS

    budget = _vmem_budget_bytes()
    weight_bytes = ((prep["w1"].size + prep["w2"].size + prep["w3"].size +
                     prep["wmv"].size) * 2 +
                    (prep["b1"].size + prep["b2"].size + prep["b3"].size +
                     prep["bmv"].size) * 4)

    def tile_s_for(tile_b):
        out_tile = tile_b * (H + D3 + 4 * E) * 4
        eps_tile = tile_b * E * 4
        scratch = tile_b * H * 4
        fixed = 2 * weight_bytes + 2 * out_tile + 2 * eps_tile + scratch + (4 << 20)
        avail = budget - fixed
        if avail <= 0:
            return 0
        per_row = 2 * tile_b * H * 2          # double-buffered bf16 seq rows
        return int(avail // per_row) // 16 * 16

    # Batch tile: MXU-friendly M; keep >=2 grid tiles when B allows so the
    # "parallel" axis can feed both v7x TensorCores.
    TILE_B = min(256, _round_up(B, 8))
    if B > 8:
        TILE_B = min(TILE_B, _round_up(pl.cdiv(B, 2), 8))
    S16 = _round_up(S, 16)
    TILE_S = min(S16, 512, tile_s_for(TILE_B))
    while TILE_S < 16 and TILE_B > 8:
        TILE_B = max(8, (TILE_B // 2) // 8 * 8)
        TILE_S = min(S16, 512, tile_s_for(TILE_B))
    TILE_S = max(16, TILE_S)

    Bp = _round_up(B, TILE_B)
    Sp = _round_up(S, TILE_S)

    # bf16 hidden state (halves the HBM read this kernel is bound on).  Zero padding
    # on batch/seq: padded seq rows add 0 to the pooling sum; padded batch rows are
    # sliced off below.
    hs = last_hidden_state.astype(jnp.bfloat16)
    if (Bp, Sp) != (B, S):
        hs = jnp.pad(hs, ((0, Bp - B), (0, Sp - S), (0, 0)))
    eps_p = eps if Bp == B else jnp.pad(eps, ((0, Bp - B), (0, 0)))

    grid = (Bp // TILE_B, Sp // TILE_S)

    kernel = functools.partial(encoder_kernel,
                               inv_seq_len=1.0 / float(S),
                               pool_chunk=16)

    in_specs = [
        pl.BlockSpec((TILE_B, TILE_S, H), lambda i, j: (i, j, 0)),   # hidden-state tile
        pl.BlockSpec((H, D1), lambda i, j: (0, 0)),                  # weights: resident
        pl.BlockSpec((1, D1), lambda i, j: (0, 0)),
        pl.BlockSpec((D1, D2), lambda i, j: (0, 0)),
        pl.BlockSpec((1, D2), lambda i, j: (0, 0)),
        pl.BlockSpec((D2, D3), lambda i, j: (0, 0)),
        pl.BlockSpec((1, D3), lambda i, j: (0, 0)),
        pl.BlockSpec((D3, 2 * E), lambda i, j: (0, 0)),
        pl.BlockSpec((1, 2 * E), lambda i, j: (0, 0)),
        pl.BlockSpec((TILE_B, E), lambda i, j: (i, 0)),              # eps tile
    ]
    out_specs = [
        pl.BlockSpec((TILE_B, H), lambda i, j: (i, 0)),              # head_1
        pl.BlockSpec((TILE_B, D3), lambda i, j: (i, 0)),             # head_2
        pl.BlockSpec((TILE_B, 4 * E), lambda i, j: (i, 0)),          # mu|log_var|codings|pad
    ]
    out_shape = (
        jax.ShapeDtypeStruct((Bp, H), jnp.float32),
        jax.ShapeDtypeStruct((Bp, D3), jnp.float32),
        jax.ShapeDtypeStruct((Bp, 4 * E), jnp.float32),
    )

    flops = 2 * Bp * (H * D1 + D1 * D2 + D2 * D3 + D3 * 2 * E) + Bp * Sp * H
    bytes_accessed = (Bp * Sp * H * 2 + weight_bytes + Bp * E * 4
                      + Bp * (H + D3 + 4 * E) * 4)
    cost = pl.CostEstimate(flops=flops, transcendentals=Bp * E,
                           bytes_accessed=bytes_accessed)

    head1_p, head2_p, mlvc_p = pl.pallas_call(
        kernel,
        out_shape=out_shape,
        grid_spec=pltpu.PrefetchScalarGridSpec(
            num_scalar_prefetch=0,
            grid=grid,
            in_specs=in_specs,
            out_specs=out_specs,
            scratch_shapes=[pltpu.VMEM((TILE_B, H), jnp.float32)],   # pooling accumulator
        ),
        compiler_params=pltpu.CompilerParams(
            dimension_semantics=("parallel", "arbitrary"),
            vmem_limit_bytes=int(budget),
        ),
        cost_estimate=cost,
    )(hs, prep["w1"], prep["b1"], prep["w2"], prep["b2"],
      prep["w3"], prep["b3"], prep["wmv"], prep["bmv"], eps_p)

    # Split the fused / padded outputs back into the module's return signature.
    mu = mlvc_p[:B, :E]
    log_var = mlvc_p[:B, E:2 * E]
    codings = mlvc_p[:B, 2 * E:3 * E]
    head_1 = head1_p[:B]
    head_2 = head2_p[:B]
    return mu, log_var, codings, head_1, head_2


def init_params(key):
    """Deterministic parameter init (shapes follow Encoder.__init__), f32 master copies."""
    dims = [BERT_HIDDEN] + HIDDEN_DIMS  # 768 -> 768 -> 512 -> 256
    keys = jax.random.split(key, 16)
    params = {}
    names = ["1", "2", "3"]
    k_idx = 0
    for n, (din, dout) in zip(names, zip(dims[:-1], dims[1:])):
        scale = 1.0 / jnp.sqrt(din)
        params[f"w{n}"] = jax.random.uniform(
            keys[k_idx], (din, dout), jnp.float32, -scale, scale); k_idx += 1
        params[f"b{n}"] = jax.random.uniform(
            keys[k_idx], (1, dout), jnp.float32, -scale, scale); k_idx += 1
    din = HIDDEN_DIMS[-1]
    scale = 1.0 / jnp.sqrt(din)
    for n in ["m", "v"]:
        params[f"w{n}"] = jax.random.uniform(
            keys[k_idx], (din, ENCODING_SIZE), jnp.float32, -scale, scale); k_idx += 1
        params[f"b{n}"] = jax.random.uniform(
            keys[k_idx], (1, ENCODING_SIZE), jnp.float32, -scale, scale); k_idx += 1
    return params


if __name__ == "__main__":
    key = jax.random.PRNGKey(0)
    k_params, k_hs, k_eps = jax.random.split(key, 3)

    B, S = 2, 8  # small batch / seq; hidden size 768 is fixed by the module
    params = init_params(k_params)
    prep = prepare_params(params)   # hoisted weight prep (bf16 cast + head fusion)

    # Synthetic stand-in for bert(...).last_hidden_state
    last_hidden_state = jax.random.normal(k_hs, (B, S, BERT_HIDDEN), jnp.float32)
    eps = jax.random.normal(k_eps, (B, ENCODING_SIZE), jnp.float32)

    mu, log_var, codings, head_1, head_2 = encoder_forward(last_hidden_state, prep, eps)
    jax.block_until_ready((mu, log_var, codings, head_1, head_2))

    # sanity checks on shapes
    assert mu.shape == (B, ENCODING_SIZE)
    assert log_var.shape == (B, ENCODING_SIZE)
    assert codings.shape == (B, ENCODING_SIZE)
    assert head_1.shape == (B, BERT_HIDDEN)
    assert head_2.shape == (B, HIDDEN_DIMS[-1])

    print("KERNEL_OK")
</pallas_src>

<mosaic_0001>
module attributes {stable_mosaic.version = 11 : i64} {
  func.func @encoder_kernel(%arg0: i32, %arg1: i32, %arg2: memref<8x16x768xbf16, #tpu.memory_space<vmem>>, %arg3: memref<768x768xbf16, #tpu.memory_space<vmem>>, %arg4: memref<1x768xf32, #tpu.memory_space<vmem>>, %arg5: memref<768x512xbf16, #tpu.memory_space<vmem>>, %arg6: memref<1x512xf32, #tpu.memory_space<vmem>>, %arg7: memref<512x256xbf16, #tpu.memory_space<vmem>>, %arg8: memref<1x256xf32, #tpu.memory_space<vmem>>, %arg9: memref<256x128xbf16, #tpu.memory_space<vmem>>, %arg10: memref<1x128xf32, #tpu.memory_space<vmem>>, %arg11: memref<8x64xf32, #tpu.memory_space<vmem>>, %arg12: memref<8x768xf32, #tpu.memory_space<vmem>>, %arg13: memref<8x256xf32, #tpu.memory_space<vmem>>, %arg14: memref<8x256xf32, #tpu.memory_space<vmem>>, %arg15: memref<8x768xf32, #tpu.memory_space<vmem>>) attributes {dimension_semantics = [#tpu.dimension_semantics<parallel>, #tpu.dimension_semantics<arbitrary>], iteration_bounds = array<i64: 1, 1>, scalar_prefetch = 0 : i64, scratch_operands = 1 : i64, tpu.core_type = #tpu.core_type<tc>, window_params = [{transform_indices = @transform_0, window_bounds = array<i64: 8, 16, 768>}, {pipeline_mode = #tpu.pipeline_mode<synchronous>, transform_indices = @transform_1, window_bounds = array<i64: 768, 768>}, {pipeline_mode = #tpu.pipeline_mode<synchronous>, transform_indices = @transform_2, window_bounds = array<i64: 1, 768>}, {pipeline_mode = #tpu.pipeline_mode<synchronous>, transform_indices = @transform_3, window_bounds = array<i64: 768, 512>}, {pipeline_mode = #tpu.pipeline_mode<synchronous>, transform_indices = @transform_4, window_bounds = array<i64: 1, 512>}, {pipeline_mode = #tpu.pipeline_mode<synchronous>, transform_indices = @transform_5, window_bounds = array<i64: 512, 256>}, {pipeline_mode = #tpu.pipeline_mode<synchronous>, transform_indices = @transform_6, window_bounds = array<i64: 1, 256>}, {pipeline_mode = #tpu.pipeline_mode<synchronous>, transform_indices = @transform_7, window_bounds = array<i64: 256, 128>}, {pipeline_mode = #tpu.pipeline_mode<synchronous>, transform_indices = @transform_8, window_bounds = array<i64: 1, 128>}, {transform_indices = @transform_9, window_bounds = array<i64: 8, 64>}, {transform_indices = @transform_10, window_bounds = array<i64: 8, 768>}, {transform_indices = @transform_11, window_bounds = array<i64: 8, 256>}, {transform_indices = @transform_12, window_bounds = array<i64: 8, 256>}]} {
    %c0_i32 = arith.constant 0 : i32
    %0 = arith.cmpi eq, %arg1, %c0_i32 : i32
    %1 = arith.extui %0 : i1 to i32
    %c0_i32_0 = arith.constant 0 : i32
    %2 = arith.cmpi ne, %1, %c0_i32_0 : i32
    scf.if %2 {
      %cst_9 = arith.constant 0.000000e+00 : f32
      %15 = vector.broadcast %cst_9 : f32 to vector<8x768xf32>
      %c0_10 = arith.constant 0 : index
      %c0_11 = arith.constant 0 : index
      %16 = vector.load %arg15[%c0_10, %c0_11] : memref<8x768xf32, #tpu.memory_space<vmem>>, vector<8x768xf32>
      tpu.vector_store %arg15[%c0_10, %c0_11], %15 {strides = array<i32>} : memref<8x768xf32, #tpu.memory_space<vmem>>, vector<8x768xf32>,
    } else {
    }
    %c0_i32_1 = arith.constant 0 : i32
    %c16_i32 = arith.constant 16 : i32
    %3 = arith.muli %c0_i32_1, %c16_i32 : i32
    %4 = tpu.assume_multiple %3, 16 : i32
    %c0 = arith.constant 0 : index
    %c0_2 = arith.constant 0 : index
    %5 = vector.load %arg15[%c0, %c0_2] : memref<8x768xf32, #tpu.memory_space<vmem>>, vector<8x768xf32>
    %c0_3 = arith.constant 0 : index
    %6 = arith.index_cast %4 : i32 to index
    %c0_4 = arith.constant 0 : index
    %7 = vector.load %arg2[%c0_3, %6, %c0_4] : memref<8x16x768xbf16, #tpu.memory_space<vmem>>, vector<8x16x768xbf16>
    %8 = arith.extf %7 : vector<8x16x768xbf16> to vector<8x16x768xf32>
    %cst = arith.constant dense<0.000000e+00> : vector<8x768xf32>
    %9 = vector.multi_reduction <add>, %8, %cst [1] : vector<8x16x768xf32> to vector<8x768xf32>
    %10 = arith.addf %5, %9 : vector<8x768xf32>
    %c0_5 = arith.constant 0 : index
    %c0_6 = arith.constant 0 : index
    %11 = vector.load %arg15[%c0_5, %c0_6] : memref<8x768xf32, #tpu.memory_space<vmem>>, vector<8x768xf32>
    tpu.vector_store %arg15[%c0_5, %c0_6], %10 {strides = array<i32>} : memref<8x768xf32, #tpu.memory_space<vmem>>, vector<8x768xf32>,
    %c1_i32 = arith.constant 1 : i32
    %c0_i32_7 = arith.constant 0 : i32
    %12 = arith.cmpi eq, %arg1, %c0_i32_7 : i32
    %13 = arith.extui %12 : i1 to i32
    %c0_i32_8 = arith.constant 0 : i32
    %14 = arith.cmpi ne, %13, %c0_i32_8 : i32
    scf.if %14 {
      %c0_9 = arith.constant 0 : index
      %c0_10 = arith.constant 0 : index
      %15 = vector.load %arg15[%c0_9, %c0_10] : memref<8x768xf32, #tpu.memory_space<vmem>>, vector<8x768xf32>
      %cst_11 = arith.constant 1.250000e-01 : f32
      %16 = vector.broadcast %cst_11 : f32 to vector<8x768xf32>
      %17 = arith.mulf %15, %16 : vector<8x768xf32>
      %c0_12 = arith.constant 0 : index
      %c0_13 = arith.constant 0 : index
      %18 = vector.load %arg12[%c0_12, %c0_13] : memref<8x768xf32, #tpu.memory_space<vmem>>, vector<8x768xf32>
      tpu.vector_store %arg12[%c0_12, %c0_13], %17 {strides = array<i32>} : memref<8x768xf32, #tpu.memory_space<vmem>>, vector<8x768xf32>,
      %19 = arith.truncf %17 : vector<8x768xf32> to vector<8x768xbf16>
      %c0_14 = arith.constant 0 : index
      %c0_15 = arith.constant 0 : index
      %20 = vector.load %arg3[%c0_14, %c0_15] : memref<768x768xbf16, #tpu.memory_space<vmem>>, vector<768x768xbf16>
      %cst_16 = arith.constant dense<0.000000e+00> : vector<8x768xf32>
      %21 = tpu.matmul %19, %20, %cst_16 {dimension_numbers = #tpu.dot_dimension_numbers<[1], [0], [0], [1], [0, 0, 1, 1], [], []>} : vector<8x768xbf16>, vector<768x768xbf16>, vector<8x768xf32> -> vector<8x768xf32>
      %c0_17 = arith.constant 0 : index
      %c0_18 = arith.constant 0 : index
      %22 = vector.load %arg4[%c0_17, %c0_18] : memref<1x768xf32, #tpu.memory_space<vmem>>, vector<1x768xf32>
      %23 = vector.broadcast %22 : vector<1x768xf32> to vector<8x768xf32>
      %24 = arith.addf %21, %23 : vector<8x768xf32>
      %cst_19 = arith.constant 0.000000e+00 : f32
      %25 = vector.broadcast %cst_19 : f32 to vector<8x768xf32>
      %26 = arith.maximumf %24, %25 : vector<8x768xf32>
      %27 = arith.truncf %26 : vector<8x768xf32> to vector<8x768xbf16>
      %c0_20 = arith.constant 0 : index
      %c0_21 = arith.constant 0 : index
      %28 = vector.load %arg5[%c0_20, %c0_21] : memref<768x512xbf16, #tpu.memory_space<vmem>>, vector<768x512xbf16>
      %cst_22 = arith.constant dense<0.000000e+00> : vector<8x512xf32>
      %29 = tpu.matmul %27, %28, %cst_22 {dimension_numbers = #tpu.dot_dimension_numbers<[1], [0], [0], [1], [0, 0, 1, 1], [], []>} : vector<8x768xbf16>, vector<768x512xbf16>, vector<8x512xf32> -> vector<8x512xf32>
      %c0_23 = arith.constant 0 : index
      %c0_24 = arith.constant 0 : index
      %30 = vector.load %arg6[%c0_23, %c0_24] : memref<1x512xf32, #tpu.memory_space<vmem>>, vector<1x512xf32>
      %31 = vector.broadcast %30 : vector<1x512xf32> to vector<8x512xf32>
      %32 = arith.addf %29, %31 : vector<8x512xf32>
      %cst_25 = arith.constant 0.000000e+00 : f32
      %33 = vector.broadcast %cst_25 : f32 to vector<8x512xf32>
      %34 = arith.maximumf %32, %33 : vector<8x512xf32>
      %35 = arith.truncf %34 : vector<8x512xf32> to vector<8x512xbf16>
      %c0_26 = arith.constant 0 : index
      %c0_27 = arith.constant 0 : index
      %36 = vector.load %arg7[%c0_26, %c0_27] : memref<512x256xbf16, #tpu.memory_space<vmem>>, vector<512x256xbf16>
      %cst_28 = arith.constant dense<0.000000e+00> : vector<8x256xf32>
      %37 = tpu.matmul %35, %36, %cst_28 {dimension_numbers = #tpu.dot_dimension_numbers<[1], [0], [0], [1], [0, 0, 1, 1], [], []>} : vector<8x512xbf16>, vector<512x256xbf16>, vector<8x256xf32> -> vector<8x256xf32>
      %c0_29 = arith.constant 0 : index
      %c0_30 = arith.constant 0 : index
      %38 = vector.load %arg8[%c0_29, %c0_30] : memref<1x256xf32, #tpu.memory_space<vmem>>, vector<1x256xf32>
      %39 = vector.broadcast %38 : vector<1x256xf32> to vector<8x256xf32>
      %40 = arith.addf %37, %39 : vector<8x256xf32>
      %cst_31 = arith.constant 0.000000e+00 : f32
      %41 = vector.broadcast %cst_31 : f32 to vector<8x256xf32>
      %42 = arith.maximumf %40, %41 : vector<8x256xf32>
      %c0_32 = arith.constant 0 : index
      %c0_33 = arith.constant 0 : index
      %43 = vector.load %arg13[%c0_32, %c0_33] : memref<8x256xf32, #tpu.memory_space<vmem>>, vector<8x256xf32>
      tpu.vector_store %arg13[%c0_32, %c0_33], %42 {strides = array<i32>} : memref<8x256xf32, #tpu.memory_space<vmem>>, vector<8x256xf32>,
      %44 = arith.truncf %42 : vector<8x256xf32> to vector<8x256xbf16>
      %c0_34 = arith.constant 0 : index
      %c0_35 = arith.constant 0 : index
      %45 = vector.load %arg9[%c0_34, %c0_35] : memref<256x128xbf16, #tpu.memory_space<vmem>>, vector<256x128xbf16>
      %cst_36 = arith.constant dense<0.000000e+00> : vector<8x128xf32>
      %46 = tpu.matmul %44, %45, %cst_36 {dimension_numbers = #tpu.dot_dimension_numbers<[1], [0], [0], [1], [0, 0, 1, 1], [], []>} : vector<8x256xbf16>, vector<256x128xbf16>, vector<8x128xf32> -> vector<8x128xf32>
      %c0_37 = arith.constant 0 : index
      %c0_38 = arith.constant 0 : index
      %47 = vector.load %arg10[%c0_37, %c0_38] : memref<1x128xf32, #tpu.memory_space<vmem>>, vector<1x128xf32>
      %48 = vector.broadcast %47 : vector<1x128xf32> to vector<8x128xf32>
      %49 = arith.addf %46, %48 : vector<8x128xf32>
      %50 = vector.extract_strided_slice %49 {offsets = [0, 0], sizes = [8, 64], strides = [1, 1]} : vector<8x128xf32> to vector<8x64xf32>
      %51 = vector.extract_strided_slice %49 {offsets = [0, 64], sizes = [8, 64], strides = [1, 1]} : vector<8x128xf32> to vector<8x64xf32>
      %cst_39 = arith.constant 5.000000e-01 : f32
      %52 = vector.broadcast %cst_39 : f32 to vector<8x64xf32>
      %53 = arith.mulf %52, %51 : vector<8x64xf32>
      %54 = math.exp %53 : vector<8x64xf32>
      %c0_40 = arith.constant 0 : index
      %c0_41 = arith.constant 0 : index
      %55 = vector.load %arg11[%c0_40, %c0_41] : memref<8x64xf32, #tpu.memory_space<vmem>>, vector<8x64xf32>
      %56 = arith.mulf %54, %55 : vector<8x64xf32>
      %57 = arith.addf %50, %56 : vector<8x64xf32>
      %cst_42 = arith.constant 0.000000e+00 : f32
      %58 = vector.broadcast %cst_42 : f32 to vector<8x64xf32>
      %59 = tpu.concatenate %49, %57, %58 in 1 : vector<8x128xf32>, vector<8x64xf32>, vector<8x64xf32> -> vector<8x256xf32>
      %c0_43 = arith.constant 0 : index
      %c0_44 = arith.constant 0 : index
      %60 = vector.load %arg14[%c0_43, %c0_44] : memref<8x256xf32, #tpu.memory_space<vmem>>, vector<8x256xf32>
      tpu.vector_store %arg14[%c0_43, %c0_44], %59 {strides = array<i32>} : memref<8x256xf32, #tpu.memory_space<vmem>>, vector<8x256xf32>,
    } else {
    }
    return
  }
  func.func @transform_0(%arg0: i32, %arg1: i32) -> (i32, i32, i32) {
    %c0_i32 = arith.constant 0 : i32
    %c0_i32_0 = arith.constant 0 : i32
    return %arg0, %arg1, %c0_i32 : i32, i32, i32
  }
  func.func @transform_1(%arg0: i32, %arg1: i32) -> (i32, i32) {
    %c0_i32 = arith.constant 0 : i32
    %c0_i32_0 = arith.constant 0 : i32
    %c0_i32_1 = arith.constant 0 : i32
    return %c0_i32, %c0_i32_0 : i32, i32
  }
  func.func @transform_2(%arg0: i32, %arg1: i32) -> (i32, i32) {
    %c0_i32 = arith.constant 0 : i32
    %c0_i32_0 = arith.constant 0 : i32
    %c0_i32_1 = arith.constant 0 : i32
    return %c0_i32, %c0_i32_0 : i32, i32
  }
  func.func @transform_3(%arg0: i32, %arg1: i32) -> (i32, i32) {
    %c0_i32 = arith.constant 0 : i32
    %c0_i32_0 = arith.constant 0 : i32
    %c0_i32_1 = arith.constant 0 : i32
    return %c0_i32, %c0_i32_0 : i32, i32
  }
  func.func @transform_4(%arg0: i32, %arg1: i32) -> (i32, i32) {
    %c0_i32 = arith.constant 0 : i32
    %c0_i32_0 = arith.constant 0 : i32
    %c0_i32_1 = arith.constant 0 : i32
    return %c0_i32, %c0_i32_0 : i32, i32
  }
  func.func @transform_5(%arg0: i32, %arg1: i32) -> (i32, i32) {
    %c0_i32 = arith.constant 0 : i32
    %c0_i32_0 = arith.constant 0 : i32
    %c0_i32_1 = arith.constant 0 : i32
    return %c0_i32, %c0_i32_0 : i32, i32
  }
  func.func @transform_6(%arg0: i32, %arg1: i32) -> (i32, i32) {
    %c0_i32 = arith.constant 0 : i32
    %c0_i32_0 = arith.constant 0 : i32
    %c0_i32_1 = arith.constant 0 : i32
    return %c0_i32, %c0_i32_0 : i32, i32
  }
  func.func @transform_7(%arg0: i32, %arg1: i32) -> (i32, i32) {
    %c0_i32 = arith.constant 0 : i32
    %c0_i32_0 = arith.constant 0 : i32
    %c0_i32_1 = arith.constant 0 : i32
    return %c0_i32, %c0_i32_0 : i32, i32
  }
  func.func @transform_8(%arg0: i32, %arg1: i32) -> (i32, i32) {
    %c0_i32 = arith.constant 0 : i32
    %c0_i32_0 = arith.constant 0 : i32
    %c0_i32_1 = arith.constant 0 : i32
    return %c0_i32, %c0_i32_0 : i32, i32
  }
  func.func @transform_9(%arg0: i32, %arg1: i32) -> (i32, i32) {
    %c0_i32 = arith.constant 0 : i32
    %c0_i32_0 = arith.constant 0 : i32
    return %arg0, %c0_i32 : i32, i32
  }
  func.func @transform_10(%arg0: i32, %arg1: i32) -> (i32, i32) {
    %c0_i32 = arith.constant 0 : i32
    %c0_i32_0 = arith.constant 0 : i32
    return %arg0, %c0_i32 : i32, i32
  }
  func.func @transform_11(%arg0: i32, %arg1: i32) -> (i32, i32) {
    %c0_i32 = arith.constant 0 : i32
    %c0_i32_0 = arith.constant 0 : i32
    return %arg0, %c0_i32 : i32, i32
  }
  func.func @transform_12(%arg0: i32, %arg1: i32) -> (i32, i32) {
    %c0_i32 = arith.constant 0 : i32
    %c0_i32_0 = arith.constant 0 : i32
    return %arg0, %c0_i32 : i32, i32
  }
}

</mosaic_0001>

<bundles_post_ra>
// kernel: tpu_custom_call.1
= control target key start
LH: loop header
LB: loop body
LE: loop exit
PB: predicated region body
PF: predicated region fallthrough
CT: control target
= control target key end

     0   :  { %18 = vsyncpa [#allocation4], 0  ;;  %s7548_s0 = inlined_call_operand.hbm [shape: bf16[8,16,768], index: 0, kind: input, shape index: {}]   ;;  %s7549_s1 = inlined_call_operand.hbm [shape: bf16[768,768], index: 1, kind: input, shape index: {}]   ;;  %s7550_s2 = inlined_call_operand.hbm [shape: f32[1,768], index: 2, kind: input, shape index: {}]   ;;  %s7551_s3 = inlined_call_operand.hbm [shape: bf16[768,512], index: 3, kind: input, shape index: {}]   ;;  %s7552_s4 = inlined_call_operand.hbm [shape: f32[1,512], index: 4, kind: input, shape index: {}]   ;;  %s7553_s5 = inlined_call_operand.hbm [shape: bf16[512,256], index: 5, kind: input, shape index: {}]   ;;  %s7554_s6 = inlined_call_operand.hbm [shape: f32[1,256], index: 6, kind: input, shape index: {}]   ;;  %s7555_s7 = inlined_call_operand.hbm [shape: bf16[256,128], index: 7, kind: input, shape index: {}]   ;;  %s7556_s8 = inlined_call_operand.hbm [shape: f32[1,128], index: 8, kind: input, shape index: {}]   ;;  %s7557_s9 = inlined_call_operand.hbm [shape: f32[8,64], index: 9, kind: input, shape index: {}]   ;;  %s7558_s10 = inlined_call_operand.hbm [shape: f32[8,768], index: 10, kind: output, shape index: {0}]   ;;  %s7559_s11 = inlined_call_operand.hbm [shape: f32[8,256], index: 11, kind: output, shape index: {1}]   ;;  %s7560_s12 = inlined_call_operand.hbm [shape: f32[8,256], index: 12, kind: output, shape index: {2}]  }
   0x1   :  { %19 = vsyncpa [#allocation7], 0 }
   0x2   :  { %20 = vsyncpa [#allocation10], 0 }
   0x3   :  { %21 = vsyncpa [#allocation13], 0 }
   0x4   :  { %22 = vsyncpa [#allocation16], 0 }
   0x5   :  { %23 = vsyncpa [#allocation19], 0 }
   0x6   :  { %24 = vsyncpa [#allocation5], 0 }
   0x7   :  { %25 = vsyncpa [#allocation22], 0  ;;  %s6897_s21 = smov [#allocation6]   ;;  %s6898_s23 = smov [#allocation9]  }
   0x8   :  { %s43_s22 = sshll.u32 %s6897_s21, 4  ;;  %s65_s24 = sshll.u32 %s6898_s23, 4  ;;  %s44_s22 = int_to_ptr.vmem [resolvable:$true] %s43_s22  ;;  %s6983_s24 = int_to_ptr.vmem [resolvable:$true] %s65_s24 }
   0x9   :  { %s6595_s27 = scalar_lea.hbm %s7549_s1, 36864 }
   0xa   :  { %p6596_p0 = scmp.ne.s32.totalorder %s7549_s1, %s6595_s27  ;;  %p6599_p1 = scmp.lt.u32.totalorder %s6595_s27, %s7549_s1 }
   0xc   :  { %p6601_p2 = pnand %p6599_p1, %p6596_p0 }
   0xe   :  { %6604 = shalt.err (!%p6601_p2)
}
   0xf   :  { %s6605_s14 = scalar_lea.vmem %s44_s22, 36864  ;;  %p6610_p4 = scmp.lt.s32.totalorder %s44_s22, %s44_s22 }
  0x10   :  { %p6606_p3 = scmp.ne.s32.totalorder %s44_s22, %s6605_s14  ;;  %p6611_p5 = scmp.lt.s32.totalorder %s6605_s14, %s6605_s14 }
  0x12   :  { %p6612_p6 = por %p6611_p5, %p6610_p4 }
  0x14   :  { %p6613_p7 = pnand %p6612_p6, %p6606_p3 }
  0x16   :  { %6616 = shalt.err (!%p6613_p7)
}
  0x17   :  { %s6899_s15 = smov 384   ;;  %s6900_s16 = smov 24  }
  0x18   :  { %49 = dma.hbm_to_vmem [thread:$0]  %s7549_s1, 36864, %s44_s22, [#allocation7], %s6899_s15, %s6899_s15, %s6900_s16  }
  0x19   :  { %s6617_s21 = scalar_lea.hbm %s7551_s3, 24576 }
  0x1a   :  { %p6618_p8 = scmp.ne.s32.totalorder %s7551_s3, %s6617_s21  ;;  %p6621_p9 = scmp.lt.u32.totalorder %s6617_s21, %s7551_s3 }
  0x1c   :  { %p6623_p10 = pnand %p6621_p9, %p6618_p8 }
  0x1e   :  { %6626 = shalt.err (!%p6623_p10)
}
  0x1f   :  { %s6627_s28 = scalar_lea.vmem %s6983_s24, 24576  ;;  %p6632_p12 = scmp.lt.s32.totalorder %s6983_s24, %s6983_s24 }
  0x20   :  { %p6628_p11 = scmp.ne.s32.totalorder %s6983_s24, %s6627_s28  ;;  %p6633_p13 = scmp.lt.s32.totalorder %s6627_s28, %s6627_s28 }
  0x22   :  { %p6634_p0 = por %p6633_p13, %p6632_p12 }
  0x24   :  { %p6635_p1 = pnand %p6634_p0, %p6628_p11 }
  0x26   :  { %6638 = shalt.err (!%p6635_p1)
}
  0x27   :  { %s6901_s1 = smov 256   ;;  %s6902_s22 = smov 16  }
  0x28   :  { %71 = dma.hbm_to_vmem [thread:$0]  %s7551_s3, 24576, %s6983_s24, [#allocation10], %s6901_s1, %s6901_s1, %s6902_s22  }
  0x29   :  { %s6903_s13 = smov [#allocation12]   ;;  %s6639_s19 = scalar_lea.hbm %s7553_s5, 8192 }
  0x2a   :  { %s87_s14 = sshll.u32 %s6903_s13, 4  ;;  %p6640_p2 = scmp.ne.s32.totalorder %s7553_s5, %s6639_s19  ;;  %s88_s14 = int_to_ptr.vmem [resolvable:$true] %s87_s14 }
  0x2b   :  { %p6643_p3 = scmp.lt.u32.totalorder %s6639_s19, %s7553_s5 }
  0x2d   :  { %p6645_p4 = pnand %p6643_p3, %p6640_p2 }
  0x2f   :  { %6648 = shalt.err (!%p6645_p4)
}
  0x30   :  { %s6649_s26 = scalar_lea.vmem %s88_s14, 8192  ;;  %p6654_p6 = scmp.lt.s32.totalorder %s88_s14, %s88_s14 }
  0x31   :  { %p6650_p5 = scmp.ne.s32.totalorder %s88_s14, %s6649_s26  ;;  %p6655_p7 = scmp.lt.s32.totalorder %s6649_s26, %s6649_s26 }
  0x33   :  { %p6656_p8 = por %p6655_p7, %p6654_p6 }
  0x35   :  { %p6657_p9 = pnand %p6656_p8, %p6650_p5 }
  0x37   :  { %6660 = shalt.err (!%p6657_p9)
}
  0x38   :  { %s6904_s3 = smov 128   ;;  %s6905_s24 = smov 8  }
  0x39   :  { %93 = dma.hbm_to_vmem [thread:$0]  %s7553_s5, 8192, %s88_s14, [#allocation13], %s6904_s3, %s6904_s3, %s6905_s24  }
  0x3a   :  { %s6906_s1 = smov [#allocation15]   ;;  %s6661_s13 = scalar_lea.hbm %s7555_s7, 2048 }
  0x3b   :  { %s109_s22 = sshll.u32 %s6906_s1, 4  ;;  %p6662_p10 = scmp.ne.s32.totalorder %s7555_s7, %s6661_s13  ;;  %s110_s22 = int_to_ptr.vmem [resolvable:$true] %s109_s22 }
  0x3c   :  { %p6665_p11 = scmp.lt.u32.totalorder %s6661_s13, %s7555_s7 }
  0x3e   :  { %p6667_p12 = pnand %p6665_p11, %p6662_p10 }
  0x40   :  { %6670 = shalt.err (!%p6667_p12)
}
  0x41   :  { %s6671_s21 = scalar_lea.vmem %s110_s22, 2048  ;;  %p6676_p0 = scmp.lt.s32.totalorder %s110_s22, %s110_s22 }
  0x42   :  { %p6672_p13 = scmp.ne.s32.totalorder %s110_s22, %s6671_s21  ;;  %p6677_p1 = scmp.lt.s32.totalorder %s6671_s21, %s6671_s21 }
  0x44   :  { %p6678_p2 = por %p6677_p1, %p6676_p0 }
  0x46   :  { %p6679_p3 = pnand %p6678_p2, %p6672_p13 }
  0x48   :  { %6682 = shalt.err (!%p6679_p3)
}
  0x49   :  { %s6907_s5 = smov 64   ;;  %s6908_s14 = smov 4  }
  0x4a   :  { %115 = dma.hbm_to_vmem [thread:$0]  %s7555_s7, 2048, %s110_s22, [#allocation16], %s6907_s5, %s6907_s5, %s6908_s14  }
  0x4b   :  { %s6909_s26 = smov [#allocation3]   ;;  %s6910_s24 = smov [#allocation8]  }
  0x4c   :  { %s31_s3 = sshll.u32 %s6909_s26, 4  ;;  %s56_s27 = sshll.u32 %s6910_s24, 4  ;;  %s32_s3 = int_to_ptr.vmem [resolvable:$true] %s31_s3  ;;  %s57_s27 = int_to_ptr.vmem [resolvable:$true] %s56_s27 }
  0x4d   :  { %s6683_s29 = scalar_lea.hbm %s7548_s0, 6144 }
  0x4e   :  { %p6684_p4 = scmp.ne.s32.totalorder %s7548_s0, %s6683_s29  ;;  %p6687_p5 = scmp.lt.u32.totalorder %s6683_s29, %s7548_s0 }
  0x50   :  { %p6689_p6 = pnand %p6687_p5, %p6684_p4 }
  0x52   :  { %6692 = shalt.err (!%p6689_p6)
}
  0x53   :  { %s6693_s7 = scalar_lea.vmem %s32_s3, 6144  ;;  %p6698_p8 = scmp.lt.s32.totalorder %s32_s3, %s32_s3 }
  0x54   :  { %p6694_p7 = scmp.ne.s32.totalorder %s32_s3, %s6693_s7  ;;  %p6699_p9 = scmp.lt.s32.totalorder %s6693_s7, %s6693_s7 }
  0x56   :  { %p6700_p10 = por %p6699_p9, %p6698_p8 }
  0x58   :  { %p6701_p11 = pnand %p6700_p10, %p6694_p7 }
  0x5a   :  { %6704 = shalt.err (!%p6701_p11)
}
  0x5b   :  { %37 = dma.hbm_to_vmem [thread:$0]  %s7548_s0, 6144, %s32_s3, [#allocation4], %s6899_s15, %s6899_s15, %s6900_s16  }
  0x5c   :  { %s6705_s14 = scalar_lea.hbm %s7550_s2, 96 }
  0x5d   :  { %p6706_p12 = scmp.ne.s32.totalorder %s7550_s2, %s6705_s14  ;;  %p6709_p13 = scmp.lt.u32.totalorder %s6705_s14, %s7550_s2 }
  0x5f   :  { %p6711_p0 = pnand %p6709_p13, %p6706_p12 }
  0x61   :  { %6714 = shalt.err (!%p6711_p0)
}
  0x62   :  { %s6715_s28 = scalar_lea.vmem %s57_s27, 96  ;;  %p6720_p2 = scmp.lt.s32.totalorder %s57_s27, %s57_s27 }
  0x63   :  { %p6716_p1 = scmp.ne.s32.totalorder %s57_s27, %s6715_s28  ;;  %p6721_p3 = scmp.lt.s32.totalorder %s6715_s28, %s6715_s28 }
  0x65   :  { %p6722_p4 = por %p6721_p3, %p6720_p2 }
  0x67   :  { %p6723_p5 = pnand %p6722_p4, %p6716_p1 }
  0x69   :  { %6726 = shalt.err (!%p6723_p5)
}
  0x6a   :  { %59 = dma.hbm_to_vmem [thread:$0]  %s7550_s2, 96, %s57_s27, [#allocation7]  }
  0x6b   :  { %s6911_s16 = smov [#allocation11]   ;;  %s6912_s1 = smov [#allocation14]  }
  0x6c   :  { %s78_s3 = sshll.u32 %s6911_s16, 4  ;;  %s100_s29 = sshll.u32 %s6912_s1, 4  ;;  %s79_s3 = int_to_ptr.vmem [resolvable:$true] %s78_s3  ;;  %s101_s29 = int_to_ptr.vmem [resolvable:$true] %s100_s29 }
  0x6d   :  { %s6727_s17 = scalar_lea.hbm %s7552_s4, 64 }
  0x6e   :  { %p6728_p6 = scmp.ne.s32.totalorder %s7552_s4, %s6727_s17  ;;  %p6731_p7 = scmp.lt.u32.totalorder %s6727_s17, %s7552_s4 }
  0x70   :  { %p6733_p8 = pnand %p6731_p7, %p6728_p6 }
  0x72   :  { %6736 = shalt.err (!%p6733_p8)
}
  0x73   :  { %s6737_s2 = scalar_lea.vmem %s79_s3, 64  ;;  %p6742_p10 = scmp.lt.s32.totalorder %s79_s3, %s79_s3 }
  0x74   :  { %p6738_p9 = scmp.ne.s32.totalorder %s79_s3, %s6737_s2  ;;  %p6743_p11 = scmp.lt.s32.totalorder %s6737_s2, %s6737_s2 }
  0x76   :  { %p6744_p12 = por %p6743_p11, %p6742_p10 }
  0x78   :  { %p6745_p13 = pnand %p6744_p12, %p6738_p9 }
  0x7a   :  { %6748 = shalt.err (!%p6745_p13)
}
  0x7b   :  { %81 = dma.hbm_to_vmem [thread:$0]  %s7552_s4, 64, %s79_s3, [#allocation10]  }
  0x7c   :  { %s6749_s23 = scalar_lea.hbm %s7554_s6, 32 }
  0x7d   :  { %p6750_p0 = scmp.ne.s32.totalorder %s7554_s6, %s6749_s23  ;;  %p6753_p1 = scmp.lt.u32.totalorder %s6749_s23, %s7554_s6 }
  0x7f   :  { %p6755_p2 = pnand %p6753_p1, %p6750_p0 }
  0x81   :  { %6758 = shalt.err (!%p6755_p2)
}
  0x82   :  { %s6759_s0 = scalar_lea.vmem %s101_s29, 32  ;;  %p6764_p4 = scmp.lt.s32.totalorder %s101_s29, %s101_s29 }
  0x83   :  { %p6760_p3 = scmp.ne.s32.totalorder %s101_s29, %s6759_s0  ;;  %p6765_p5 = scmp.lt.s32.totalorder %s6759_s0, %s6759_s0 }
  0x85   :  { %p6766_p6 = por %p6765_p5, %p6764_p4 }
  0x87   :  { %p6767_p7 = pnand %p6766_p6, %p6760_p3 }
  0x89   :  { %6770 = shalt.err (!%p6767_p7)
}
  0x8a   :  { %103 = dma.hbm_to_vmem [thread:$0]  %s7554_s6, 32, %s101_s29, [#allocation13]  }
  0x8b   :  { %s6913_s16 = smov [#allocation17]   ;;  %s6914_s1 = smov [#allocation18]  }
  0x8c   :  { %s122_s3 = sshll.u32 %s6913_s16, 4  ;;  %s132_s30 = sshll.u32 %s6914_s1, 4  ;;  %s123_s3 = int_to_ptr.vmem [resolvable:$true] %s122_s3  ;;  %s133_s30 = int_to_ptr.vmem [resolvable:$true] %s132_s30 }
  0x8d   :  { %s6771_s18 = scalar_lea.hbm %s7556_s8, 16 }
  0x8e   :  { %p6772_p8 = scmp.ne.s32.totalorder %s7556_s8, %s6771_s18  ;;  %p6775_p9 = scmp.lt.u32.totalorder %s6771_s18, %s7556_s8 }
  0x90   :  { %p6777_p10 = pnand %p6775_p9, %p6772_p8 }
  0x92   :  { %6780 = shalt.err (!%p6777_p10)
}
  0x93   :  { %s6781_s6 = scalar_lea.vmem %s123_s3, 16  ;;  %s6785_s29 = scalar_lea.vmem %s123_s3, 32 }
  0x94   :  { %p6782_p11 = scmp.ne.s32.totalorder %s123_s3, %s6781_s6  ;;  %p6786_p12 = scmp.lt.s32.totalorder %s123_s3, %s123_s3 }
  0x95   :  { %p6787_p13 = scmp.lt.s32.totalorder %s6785_s29, %s6781_s6 }
  0x97   :  { %p6788_p0 = por %p6787_p13, %p6786_p12 }
  0x99   :  { %p6789_p1 = pnand %p6788_p0, %p6782_p11 }
  0x9b   :  { %6792 = shalt.err (!%p6789_p1)
}
  0x9c   :  { %125 = dma.hbm_to_vmem [thread:$0]  %s7556_s8, 16, %s123_s3, [#allocation16]  }
  0x9d   :  { %s6793_s23 = scalar_lea.hbm %s7557_s9, 128 }
  0x9e   :  { %p6794_p2 = scmp.ne.s32.totalorder %s7557_s9, %s6793_s23  ;;  %p6797_p3 = scmp.lt.u32.totalorder %s6793_s23, %s7557_s9 }
  0xa0   :  { %p6799_p4 = pnand %p6797_p3, %p6794_p2 }
  0xa2   :  { %6802 = shalt.err (!%p6799_p4)
}
  0xa3   :  { %s6803_s0 = scalar_lea.vmem %s133_s30, 128  ;;  %p6808_p6 = scmp.lt.s32.totalorder %s133_s30, %s133_s30 }
  0xa4   :  { %p6804_p5 = scmp.ne.s32.totalorder %s133_s30, %s6803_s0  ;;  %p6809_p7 = scmp.lt.s32.totalorder %s6803_s0, %s6803_s0 }
  0xa6   :  { %p6810_p8 = por %p6809_p7, %p6808_p6 }
  0xa8   :  { %p6811_p9 = pnand %p6810_p8, %p6804_p5 }
  0xaa   :  { %6814 = shalt.err (!%p6811_p9)
}
  0xab   :  { %135 = dma.hbm_to_vmem [thread:$0]  %s7557_s9, 128, %s133_s30, [#allocation19]  }
  0xac   :  { %6881 = dma.done.wait [#allocation4], 6144  }
  0xad   :  { %6882 = vsyncadd [#allocation4], 4294961152 }
  0xae   :  { %6883 = dma.done.wait [#allocation7], 36960  }
  0xaf   :  { %6884 = vsyncadd [#allocation7], 4294930336 }
  0xb0   :  { %6885 = dma.done.wait [#allocation10], 24640  }
  0xb1   :  { %6886 = vsyncadd [#allocation10], 4294942656 }
  0xb2   :  { %6887 = dma.done.wait [#allocation13], 8224  }
  0xb3   :  { %6888 = vsyncadd [#allocation13], 4294959072 }
  0xb4   :  { %6889 = dma.done.wait [#allocation16], 2064  }
  0xb5   :  { %6890 = vsyncadd [#allocation16], 4294965232 }
  0xb6   :  { %6891 = dma.done.wait [#allocation19], 128  }
  0xb7   :  { %6892 = vsyncadd [#allocation19], 4294967168  ;;  %v5761_v0 = vld [vmem:[#allocation6 + $0x4] ss:$24 sps:$4 sm:$0xff]   ;;  %v5765_v2 = vld [vmem:[#allocation6] ss:$24 sps:$4 sm:$0xff]  }
  0xb8   :  { %v5763_v1 = vld [vmem:[#allocation6 + $0xc] ss:$24 sps:$4 sm:$0xff]   ;;  %2568 = vmatprep.subr.bf16.mxu0 %v5761_v0  ;;  %v5766_v3 = vld [vmem:[#allocation6 + $0x8] ss:$24 sps:$4 sm:$0xff]   ;;  %v5769_v5 = vld [vmem:[#allocation6 + $0x3c] ss:$24 sps:$4 sm:$0xff]  }
  0xb9   :  { %2691 = vmatprep.subr.bf16.mxu1 %v5763_v1  ;;  %v5767_v4 = vld [vmem:[#allocation6 + $0x34] ss:$24 sps:$4 sm:$0xff]   ;;  %2569 = vmatpush1.bf16.msra.mxu0 %v5765_v2  ;;  %v5771_v6 = vld [vmem:[#allocation6 + $0x30] ss:$24 sps:$4 sm:$0xff]   ;;  %v5773_v8 = vld [vmem:[#allocation6 + $0x64] ss:$24 sps:$4 sm:$0xff]  }
  0xba   :  { %2692 = vmatpush1.bf16.msra.mxu1 %v5766_v3  ;;  %2570 = vmatprep.subr.bf16.mxu0 %v5767_v4  ;;  %v5772_v7 = vld [vmem:[#allocation6 + $0x38] ss:$24 sps:$4 sm:$0xff]   ;;  %v5775_v9 = vld [vmem:[#allocation6 + $0x6c] ss:$24 sps:$4 sm:$0xff]   ;;  %v5778_v11 = vld [vmem:[#allocation6 + $0x68] ss:$24 sps:$4 sm:$0xff]  }
  0xbb   :  { %2693 = vmatprep.subr.bf16.mxu1 %v5769_v5  ;;  %v5777_v10 = vld [vmem:[#allocation6 + $0x60] ss:$24 sps:$4 sm:$0xff]   ;;  %v5779_v12 = vld [vmem:[#allocation6 + $0x94] ss:$24 sps:$4 sm:$0xff]   ;;  %v5783_v14 = vld [vmem:[#allocation6 + $0x90] ss:$24 sps:$4 sm:$0xff]  }
  0xbc   :  { %v5781_v13 = vld [vmem:[#allocation6 + $0x9c] ss:$24 sps:$4 sm:$0xff]   ;;  %v5784_v15 = vld [vmem:[#allocation6 + $0x98] ss:$24 sps:$4 sm:$0xff]   ;;  %v5787_v17 = vld [vmem:[#allocation6 + $0xcc] ss:$24 sps:$4 sm:$0xff]  }
  0xbd   :  { %2571 = vmatpush1.bf16.msra.mxu0 %v5771_v6  ;;  %v5785_v16 = vld [vmem:[#allocation6 + $0xc4] ss:$24 sps:$4 sm:$0xff]   ;;  %v5789_v18 = vld [vmem:[#allocation6 + $0xc0] ss:$24 sps:$4 sm:$0xff]   ;;  %v5791_v20 = vld [vmem:[#allocation6 + $0xf4] ss:$24 sps:$4 sm:$0xff]  }
  0xbe   :  { %2694 = vmatpush1.bf16.msra.mxu1 %v5772_v7  ;;  %2572 = vmatprep.subr.bf16.mxu0 %v5773_v8  ;;  %v5790_v19 = vld [vmem:[#allocation6 + $0xc8] ss:$24 sps:$4 sm:$0xff]   ;;  %v5793_v21 = vld [vmem:[#allocation6 + $0xfc] ss:$24 sps:$4 sm:$0xff]   ;;  %v5796_v23 = vld [vmem:[#allocation6 + $0xf8] ss:$24 sps:$4 sm:$0xff]  }
  0xbf   :  { %2695 = vmatprep.subr.bf16.mxu1 %v5775_v9  ;;  %v5795_v22 = vld [vmem:[#allocation6 + $0xf0] ss:$24 sps:$4 sm:$0xff]   ;;  %v5797_v24 = vld [vmem:[#allocation6 + $0x124] ss:$24 sps:$4 sm:$0xff]   ;;  %v5801_v26 = vld [vmem:[#allocation6 + $0x120] ss:$24 sps:$4 sm:$0xff]  }
  0xc0   :  { %v5799_v25 = vld [vmem:[#allocation6 + $0x12c] ss:$24 sps:$4 sm:$0xff]   ;;  %v5802_v27 = vld [vmem:[#allocation6 + $0x128] ss:$24 sps:$4 sm:$0xff]   ;;  %v5805_v29 = vld [vmem:[#allocation6 + $0x15c] ss:$24 sps:$4 sm:$0xff]  }
  0xc1   :  { %2573 = vmatpush1.bf16.msra.mxu0 %v5777_v10  ;;  %v5803_v28 = vld [vmem:[#allocation6 + $0x154] ss:$24 sps:$4 sm:$0xff]   ;;  %v5807_v30 = vld [vmem:[#allocation6 + $0x150] ss:$24 sps:$4 sm:$0xff]   ;;  %v5809_v32 = vld [vmem:[#allocation6 + $0x184] ss:$24 sps:$4 sm:$0xff]  }
  0xc2   :  { %2696 = vmatpush1.bf16.msra.mxu1 %v5778_v11  ;;  %2574 = vmatprep.subr.bf16.mxu0 %v5779_v12  ;;  %v5808_v31 = vld [vmem:[#allocation6 + $0x158] ss:$24 sps:$4 sm:$0xff]   ;;  %v5811_v33 = vld [vmem:[#allocation6 + $0x18c] ss:$24 sps:$4 sm:$0xff]   ;;  %v5814_v35 = vld [vmem:[#allocation6 + $0x188] ss:$24 sps:$4 sm:$0xff]  }
  0xc3   :  { %2697 = vmatprep.subr.bf16.mxu1 %v5781_v13  ;;  %v5813_v34 = vld [vmem:[#allocation6 + $0x180] ss:$24 sps:$4 sm:$0xff]   ;;  %v5815_v36 = vld [vmem:[#allocation6 + $0x1b4] ss:$24 sps:$4 sm:$0xff]   ;;  %v5819_v38 = vld [vmem:[#allocation6 + $0x1b0] ss:$24 sps:$4 sm:$0xff]  }
  0xc4   :  { %v5817_v37 = vld [vmem:[#allocation6 + $0x1bc] ss:$24 sps:$4 sm:$0xff]   ;;  %v5820_v39 = vld [vmem:[#allocation6 + $0x1b8] ss:$24 sps:$4 sm:$0xff]   ;;  %v5823_v41 = vld [vmem:[#allocation6 + $0x1ec] ss:$24 sps:$4 sm:$0xff]  }
  0xc5   :  { %2575 = vmatpush1.bf16.msra.mxu0 %v5783_v14  ;;  %v5821_v40 = vld [vmem:[#allocation6 + $0x1e4] ss:$24 sps:$4 sm:$0xff]   ;;  %v5825_v42 = vld [vmem:[#allocation6 + $0x1e0] ss:$24 sps:$4 sm:$0xff]   ;;  %v5827_v44 = vld [vmem:[#allocation6 + $0x214] ss:$24 sps:$4 sm:$0xff]  }
  0xc6   :  { %2698 = vmatpush1.bf16.msra.mxu1 %v5784_v15  ;;  %2576 = vmatprep.subr.bf16.mxu0 %v5785_v16  ;;  %v5826_v43 = vld [vmem:[#allocation6 + $0x1e8] ss:$24 sps:$4 sm:$0xff]   ;;  %v5829_v45 = vld [vmem:[#allocation6 + $0x21c] ss:$24 sps:$4 sm:$0xff]   ;;  %v5832_v47 = vld [vmem:[#allocation6 + $0x218] ss:$24 sps:$4 sm:$0xff]  }
  0xc7   :  { %2699 = vmatprep.subr.bf16.mxu1 %v5787_v17  ;;  %v5831_v46 = vld [vmem:[#allocation6 + $0x210] ss:$24 sps:$4 sm:$0xff]   ;;  %v7118_v48 = vld [vmem:[#allocation3] sm:$0xff]  ;;  %v7120_v51 = vld [vmem:[#allocation3 + $0x18] sm:$0xff]  ;;  %vm714_vm0 = vcmask 1041409   ;;  %vm716_vm1 = vcmask 1042434  }
  0xc8   :  { %v5833_v49 = vld [vmem:[#allocation6 + $0x244] ss:$24 sps:$4 sm:$0xff]   ;;  %v7122_v52 = vld [vmem:[#allocation3 + $0x30] sm:$0xff]  ;;  %v7124_v53 = vld [vmem:[#allocation3 + $0x48] sm:$0xff]  ;;  %v235_v54 = vunpack.c.h.bf16 %v7118_v48  ;;  %v234_v55 = vunpack.c.l.bf16 %v7118_v48  ;;  %v241_v59 = vunpack.c.h.bf16 %v7120_v51  ;;  %v240_v62 = vunpack.c.l.bf16 %v7120_v51  ;;  %s6915_s9 = smov [#allocation21]   ;;  %s6916_s16 = smov [#allocation20]  }
  0xc9   :  { %2577 = vmatpush1.bf16.msra.mxu0 %v5789_v18  ;;  %v5835_v50 = vld [vmem:[#allocation6 + $0x24c] ss:$24 sps:$4 sm:$0xff]   ;;  %v7130_v57 = vld [vmem:[#allocation3 + $0x78] sm:$0xff]  ;;  %v7132_v58 = vld [vmem:[#allocation3 + $0x90] sm:$0xff]  ;;  %v247_v60 = vunpack.c.h.bf16 %v7122_v52  ;;  %v253_v61 = vunpack.c.h.bf16 %v7124_v53  ;;  %v246_v5 = vunpack.c.l.bf16 %v7122_v52  ;;  %vm718_vm2 = vcmask 1043459   ;;  %s5070_s15 = sshll.u32 %s6915_s9, 4  ;;  %s5071_s15 = int_to_ptr.vmem [resolvable:$true] %s5070_s15 }
  0xca   :  { %2700 = vmatpush1.bf16.msra.mxu1 %v5790_v19  ;;  %2578 = vmatprep.subr.bf16.mxu0 %v5791_v20  ;;  %v7128_v56 = vld [vmem:[#allocation3 + $0x60] sm:$0xff]  ;;  %v7138_v63 = vld [vmem:[#allocation3 + $0xa8] sm:$0xff]  ;;  %v7142_v1 = vld [vmem:[#allocation3 + $0xd8] sm:$0xff]  ;;  %v265_v3 = vunpack.c.h.bf16 %v7130_v57  ;;  %v271_v4 = vunpack.c.h.bf16 %v7132_v58  ;;  %v337_v14 = vadd.f32 %v241_v59, %v235_v54  ;;  %vm720_vm3 = vcmask 1044484   ;;  %s5060_s3 = sshll.u32 %s6916_s16, 4  ;;  %s6815_s1 = scalar_lea.vmem %s5071_s15, 256  ;;  %s5061_s3 = int_to_ptr.vmem [resolvable:$true] %s5060_s3 }
  0xcb   :  { %2701 = vmatprep.subr.bf16.mxu1 %v5793_v21  ;;  %v7140_v0 = vld [vmem:[#allocation3 + $0xc0] sm:$0xff]  ;;  %v259_v2 = vunpack.c.h.bf16 %v7128_v56  ;;  %v7148_v8 = vld [vmem:[#allocation3 + $0xf0] sm:$0xff]  ;;  %v7150_v9 = vld [vmem:[#allocation3 + $0x108] sm:$0xff]  ;;  %v277_v11 = vunpack.c.h.bf16 %v7138_v63  ;;  %v289_v13 = vunpack.c.h.bf16 %v7142_v1  ;;  %v379_v21 = vadd.f32 %v253_v61, %v247_v60  ;;  %p6816_p10 = scmp.ne.s32.totalorder %s5071_s15, %s6815_s1  ;;  %p6820_p11 = scmp.lt.s32.totalorder %s5071_s15, %s5071_s15 }
  0xcc   :  { %v5837_v6 = vld [vmem:[#allocation6 + $0x240] ss:$24 sps:$4 sm:$0xff]   ;;  %v283_v12 = vunpack.c.h.bf16 %v7140_v0  ;;  %v7159_v16 = vld [vmem:[#allocation3 + $0x150] sm:$0xff]  ;;  %v7161_v17 = vld [vmem:[#allocation3 + $0x168] sm:$0xff]  ;;  %v295_v18 = vunpack.c.h.bf16 %v7148_v8  ;;  %v301_v19 = vunpack.c.h.bf16 %v7150_v9  ;;  %vm722_vm4 = vcmask 1045509   ;;  %p6821_p12 = scmp.lt.s32.totalorder %s6815_s1, %s6815_s1 }
  0xcd   :  { %2579 = vmatpush1.bf16.msra.mxu0 %v5795_v22  ;;  %v5838_v7 = vld [vmem:[#allocation6 + $0x248] ss:$24 sps:$4 sm:$0xff]   ;;  %v7157_v15 = vld [vmem:[#allocation3 + $0x138] sm:$0xff]  ;;  %v5839_v22 = vld [vmem:[#allocation6 + $0x274] ss:$24 sps:$4 sm:$0xff]   ;;  %vm724_vm5 = vcmask 1046534  }
  0xce   :  { %2702 = vmatpush1.bf16.msra.mxu1 %v5796_v23  ;;  %2580 = vmatprep.subr.bf16.mxu0 %v5797_v24  ;;  %v7152_v10 = vld [vmem:[#allocation3 + $0x120] sm:$0xff]  ;;  %v313_v23 = vunpack.c.h.bf16 %v7157_v15  ;;  %v319_v24 = vunpack.c.h.bf16 %v7159_v16  ;;  %vm726_vm6 = vcmask 1047559   ;;  %p6822_p13 = por %p6821_p12, %p6820_p11 }
  0xcf   :  { %2703 = vmatprep.subr.bf16.mxu1 %v5799_v25  ;;  %v307_v20 = vunpack.c.h.bf16 %v7152_v10  ;;  %v325_v25 = vunpack.c.h.bf16 %v7161_v17 }
  0xd0   :  { %p6823_p0 = pnand %p6822_p13, %p6816_p10 }
  0xd1   :  { %2581 = vmatpush1.bf16.msra.mxu0 %v5801_v26  ;;  %v338_v26 = vrot.slane %v337_v14, 4 }
  0xd2   :  { %2704 = vmatpush1.bf16.msra.mxu1 %v5802_v27  ;;  %2582 = vmatprep.subr.bf16.mxu0 %v5803_v28  ;;  %v5841_v27 = vld [vmem:[#allocation6 + $0x27c] ss:$24 sps:$4 sm:$0xff]   ;;  %v380_v28 = vrot.slane %v379_v21, 4 }
  0xd3   :  { %2705 = vmatprep.subr.bf16.mxu1 %v5805_v29  ;;  %v421_v29 = vadd.f32 %v265_v3, %v259_v2 }
  0xd5   :  { %2583 = vmatpush1.bf16.msra.mxu0 %v5807_v30  ;;  %v463_v30 = vadd.f32 %v277_v11, %v271_v4  ;;  %v5849_v4 = vld [vmem:[#allocation6 + $0x2a0] ss:$24 sps:$4 sm:$0xff]  }
  0xd6   :  { %2706 = vmatpush1.bf16.msra.mxu1 %v5808_v31  ;;  %2584 = vmatprep.subr.bf16.mxu0 %v5809_v32  ;;  %v505_v31 = vadd.f32 %v289_v13, %v283_v12  ;;  %v5843_v32 = vld [vmem:[#allocation6 + $0x270] ss:$24 sps:$4 sm:$0xff]  }
  0xd7   :  { %2707 = vmatprep.subr.bf16.mxu1 %v5811_v33  ;;  %v339_v33 = vadd.f32 %v338_v26, %v337_v14  ;;  %v5850_v13 = vld [vmem:[#allocation6 + $0x2a8] ss:$24 sps:$4 sm:$0xff]  }
  0xd9   :  { %2585 = vmatpush1.bf16.msra.mxu0 %v5813_v34  ;;  %v547_v34 = vadd.f32 %v301_v19, %v295_v18 }
  0xda   :  { %2708 = vmatpush1.bf16.msra.mxu1 %v5814_v35  ;;  %2586 = vmatprep.subr.bf16.mxu0 %v5815_v36  ;;  %v589_v35 = vadd.f32 %v313_v23, %v307_v20  ;;  %v631_v36 = vadd.f32 %v325_v25, %v319_v24 }
  0xdb   :  { %2709 = vmatprep.subr.bf16.mxu1 %v5817_v37  ;;  %v5844_v37 = vld [vmem:[#allocation6 + $0x278] ss:$24 sps:$4 sm:$0xff]  }
  0xdd   :  { %2587 = vmatpush1.bf16.msra.mxu0 %v5819_v38  ;;  %v381_v38 = vadd.f32 %v380_v28, %v379_v21  ;;  %v5851_v21 = vld [vmem:[#allocation6 + $0x2d4] ss:$24 sps:$4 sm:$0xff]  }
  0xde   :  { %2710 = vmatpush1.bf16.msra.mxu1 %v5820_v39  ;;  %2588 = vmatprep.subr.bf16.mxu0 %v5821_v40  ;;  %v422_v39 = vrot.slane %v421_v29, 4  ;;  %v464_v40 = vrot.slane %v463_v30, 4 }
  0xdf   :  { %2711 = vmatprep.subr.bf16.mxu1 %v5823_v41  ;;  %v506_v41 = vrot.slane %v505_v31, 4 }
  0xe0   :  { %v465_v54 = vadd.f32 %v464_v40, %v463_v30  ;;  %v5859_v40 = vld [vmem:[#allocation6 + $0x304] ss:$24 sps:$4 sm:$0xff]  }
  0xe1   :  { %2589 = vmatpush1.bf16.msra.mxu0 %v5825_v42  ;;  %v5845_v42 = vld [vmem:[#allocation6 + $0x2a4] ss:$24 sps:$4 sm:$0xff]   ;;  %v507_v59 = vadd.f32 %v506_v41, %v505_v31  ;;  %v252_v41 = vunpack.c.l.bf16 %v7124_v53  ;;  %v276_v53 = vunpack.c.l.bf16 %v7138_v63  ;;  %v312_v63 = vunpack.c.l.bf16 %v7157_v15 }
  0xe2   :  { %2712 = vmatpush1.bf16.msra.mxu1 %v5826_v43  ;;  %2590 = vmatprep.subr.bf16.mxu0 %v5827_v44  ;;  %v340_v43 = vrot.slane %v339_v33, 2  ;;  %v548_v44 = vrot.slane %v547_v34, 4  ;;  %v466_v11 = vrot.slane %v465_v54, 2 }
  0xe3   :  { %2713 = vmatprep.subr.bf16.mxu1 %v5829_v45  ;;  %v590_v45 = vrot.slane %v589_v35, 4  ;;  %v508_v12 = vrot.slane %v507_v59, 2 }
  0xe4   :  { %v341_v60 = vadd.f32 %v340_v43, %v339_v33  ;;  %v549_v61 = vadd.f32 %v548_v44, %v547_v34  ;;  %v467_v25 = vadd.f32 %v466_v11, %v465_v54  ;;  %v318_v11 = vunpack.c.l.bf16 %v7159_v16 }
  0xe5   :  { %2591 = vmatpush1.bf16.msra.mxu0 %v5831_v46  ;;  %v632_v46 = vrot.slane %v631_v36, 4  ;;  %v591_v2 = vadd.f32 %v590_v45, %v589_v35  ;;  %v509_v26 = vadd.f32 %v508_v12, %v507_v59  ;;  %v5862_v45 = vld [vmem:[#allocation6 + $0x30c] ss:$24 sps:$4 sm:$0xff]  }
  0xe6   :  { %2714 = vmatpush1.bf16.msra.mxu1 %v5832_v47  ;;  %2592 = vmatprep.subr.bf16.mxu0 %v5833_v49  ;;  %v5847_v47 = vld [vmem:[#allocation6 + $0x2ac] ss:$24 sps:$4 sm:$0xff]   ;;  %v382_v49 = vrot.slane %v381_v38, 2  ;;  %v342_v14 = vrot.slane %v341_v60, 1  ;;  %v550_v18 = vrot.slane %v549_v61, 2  ;;  %v468_v35 = vrot.slane %v467_v25, 1 }
  0xe7   :  { %2715 = vmatprep.subr.bf16.mxu1 %v5835_v50  ;;  %v423_v50 = vadd.f32 %v422_v39, %v421_v29  ;;  %v633_v3 = vadd.f32 %v632_v46, %v631_v36  ;;  %v592_v19 = vrot.slane %v591_v2, 2  ;;  %v510_v36 = vrot.slane %v509_v26, 1 }
  0xe8   :  { %v343_v28 = vadd.f32 %v342_v14, %v341_v60  ;;  %v551_v29 = vadd.f32 %v550_v18, %v549_v61  ;;  %v469_v43 = vadd.f32 %v468_v35, %v467_v25  ;;  %v258_v46 = vunpack.c.l.bf16 %v7128_v56 }
  0xe9   :  { %2593 = vmatpush1.bf16.msra.mxu0 %v5837_v6  ;;  %v383_v6 = vadd.f32 %v382_v49, %v381_v38  ;;  %v634_v20 = vrot.slane %v633_v3, 2  ;;  %v593_v30 = vadd.f32 %v592_v19, %v591_v2  ;;  %v511_v44 = vadd.f32 %v510_v36, %v509_v26 }
  0xea   :  { %2716 = vmatpush1.bf16.msra.mxu1 %v5838_v7  ;;  %2594 = vmatprep.subr.bf16.mxu0 %v5839_v22  ;;  %v424_v7 = vrot.slane %v423_v50, 2  ;;  %v5853_v22 = vld [vmem:[#allocation6 + $0x2dc] ss:$24 sps:$4 sm:$0xff]   ;;  %v264_v60 = vunpack.c.l.bf16 %v7130_v57  ;;  %v270_v61 = vunpack.c.l.bf16 %v7132_v58  ;;  %v288_v56 = vunpack.c.l.bf16 %v7142_v1 }
  0xeb   :  { %2717 = vmatprep.subr.bf16.mxu1 %v5841_v27  ;;  %v384_v23 = vrot.slane %v383_v6, 1  ;;  %v5855_v27 = vld [vmem:[#allocation6 + $0x2d0] ss:$24 sps:$4 sm:$0xff]   ;;  %v635_v31 = vadd.f32 %v634_v20, %v633_v3  ;;  %v594_v38 = vrot.slane %v593_v30, 1  ;;  %v282_v3 = vunpack.c.l.bf16 %v7140_v0 }
  0xec   :  { %v425_v24 = vadd.f32 %v424_v7, %v423_v50  ;;  %v300_v57 = vunpack.c.l.bf16 %v7150_v9  ;;  %v306_v58 = vunpack.c.l.bf16 %v7152_v10  ;;  %v324_v0 = vunpack.c.l.bf16 %v7161_v17 }
  0xed   :  { %2595 = vmatpush1.bf16.msra.mxu0 %v5843_v32  ;;  %v5856_v32 = vld [vmem:[#allocation6 + $0x2d8] ss:$24 sps:$4 sm:$0xff]   ;;  %v385_v33 = vadd.f32 %v384_v23, %v383_v6  ;;  %v636_v39 = vrot.slane %v635_v31, 1  ;;  %v595_v49 = vadd.f32 %v594_v38, %v593_v30  ;;  %v330_v1 = vadd.f32 %v240_v62, %v234_v55 }
  0xee   :  { %2718 = vmatpush1.bf16.msra.mxu1 %v5844_v37  ;;  %2596 = vmatprep.subr.bf16.mxu0 %v5845_v42  ;;  %v426_v34 = vrot.slane %v425_v24, 1  ;;  %v552_v37 = vrot.slane %v551_v29, 1  ;;  %v372_v9 = vadd.f32 %v252_v41, %v246_v5  ;;  %v414_v12 = vadd.f32 %v264_v60, %v258_v46 }
  0xef   :  { %2719 = vmatprep.subr.bf16.mxu1 %v5847_v47  ;;  %v637_v50 = vadd.f32 %v636_v39, %v635_v31  ;;  %v728_v54 = vsel %vm714_vm0, %v385_v33, %v343_v28  ;;  %v456_v10 = vadd.f32 %v276_v53, %v270_v61  ;;  %v498_v14 = vadd.f32 %v288_v56, %v282_v3 }
  0xf0   :  { %v427_v42 = vadd.f32 %v426_v34, %v425_v24  ;;  %v553_v47 = vadd.f32 %v552_v37, %v551_v29  ;;  %v373_v19 = vrot.slane %v372_v9, 4  ;;  %v415_v17 = vrot.slane %v414_v12, 4 }
  0xf1   :  { %2597 = vmatpush1.bf16.msra.mxu0 %v5849_v4  ;;  %v294_v4 = vunpack.c.l.bf16 %v7148_v8  ;;  %v457_v20 = vrot.slane %v456_v10, 4  ;;  %v582_v55 = vadd.f32 %v312_v63, %v306_v58  ;;  %v624_v30 = vadd.f32 %v324_v0, %v318_v11 }
  0xf2   :  { %2720 = vmatpush1.bf16.msra.mxu1 %v5850_v13  ;;  %2598 = vmatprep.subr.bf16.mxu0 %v5851_v21  ;;  %v729_v59 = vsel %vm716_vm1, %v427_v42, %v728_v54  ;;  %v331_v13 = vrot.slane %v330_v1, 4  ;;  %v499_v21 = vrot.slane %v498_v14, 4  ;;  %v374_v52 = vadd.f32 %v373_v19, %v372_v9  ;;  %v5866_v19 = vld [vmem:[#allocation6 + $0x338] ss:$24 sps:$4 sm:$0xff]  }
  0xf3   :  { %2721 = vmatprep.subr.bf16.mxu1 %v5853_v22  ;;  %v730_v2 = vsel %vm718_vm2, %v469_v43, %v729_v59  ;;  %v540_v18 = vadd.f32 %v300_v57, %v294_v4  ;;  %v416_v5 = vadd.f32 %v415_v17, %v414_v12  ;;  %v458_v22 = vadd.f32 %v457_v20, %v456_v10  ;;  %v5857_v10 = vld [vmem:[#allocation6 + $0x300] ss:$24 sps:$4 sm:$0xff]   ;;  %v5871_v17 = vld [vmem:[#allocation6 + $0x364] ss:$24 sps:$4 sm:$0xff]  }
  0xf4   :  { %v731_v6 = vsel %vm720_vm3, %v511_v44, %v730_v2  ;;  %v332_v48 = vadd.f32 %v331_v13, %v330_v1  ;;  %v500_v24 = vadd.f32 %v499_v21, %v498_v14  ;;  %v583_v26 = vrot.slane %v582_v55, 4  ;;  %v5865_v14 = vld [vmem:[#allocation6 + $0x334] ss:$24 sps:$4 sm:$0xff]   ;;  %v5872_v21 = vld [vmem:[#allocation6 + $0x368] ss:$24 sps:$4 sm:$0xff]  }
  0xf5   :  { %2599 = vmatpush1.bf16.msra.mxu0 %v5855_v27  ;;  %v732_v7 = vsel %vm722_vm4, %v553_v47, %v731_v6  ;;  %v541_v51 = vrot.slane %v540_v18, 4  ;;  %v375_v27 = vrot.slane %v374_v52, 2  ;;  %v417_v28 = vrot.slane %v416_v5, 2  ;;  %v5874_v20 = vld [vmem:[#allocation6 + $0x36c] ss:$24 sps:$4 sm:$0xff]  }
  0xf6   :  { %2722 = vmatpush1.bf16.msra.mxu1 %v5856_v32  ;;  %2609 = vmatprep.subr.bf16.mxu0 %v5859_v40  ;;  %v733_v8 = vsel %vm724_vm5, %v595_v49, %v732_v7  ;;  %v333_v23 = vrot.slane %v332_v48, 2  ;;  %v459_v29 = vrot.slane %v458_v22, 2  ;;  %v501_v32 = vrot.slane %v500_v24, 2 }
  0xf7   :  { %2732 = vmatprep.subr.bf16.mxu1 %v5862_v45  ;;  %v734_v15 = vsel %vm726_vm6, %v637_v50, %v733_v8  ;;  %v542_v25 = vadd.f32 %v541_v51, %v540_v18  ;;  %v584_v34 = vadd.f32 %v583_v26, %v582_v55  ;;  %v376_v35 = vadd.f32 %v375_v27, %v374_v52  ;;  %v5868_v18 = vld [vmem:[#allocation6 + $0x33c] ss:$24 sps:$4 sm:$0xff]   ;;  %v7210_v51 = vld [vmem:[#allocation3 + $0x8] sm:$0xff]  ;;  %v7212_v55 = vld [vmem:[#allocation3 + $0x20] sm:$0xff] }
  0xf8   :  { %v791_v16 = vmul.f32 0.125, %v734_v15  ;;  %v334_v31 = vadd.f32 %v333_v23, %v332_v48  ;;  %v418_v36 = vadd.f32 %v417_v28, %v416_v5  ;;  %v460_v37 = vadd.f32 %v459_v29, %v458_v22  ;;  %v5860_v15 = vld [vmem:[#allocation6 + $0x308] ss:$24 sps:$4 sm:$0xff]   ;;  %v7214_v52 = vld [vmem:[#allocation3 + $0x38] sm:$0xff]  ;;  %v5877_v5 = vld [vmem:[#allocation6 + $0x394] ss:$24 sps:$4 sm:$0xff]  }
  0xf9   :  { %v543_v33 = vrot.slane %v542_v25, 2  ;;  %v625_v38 = vrot.slane %v624_v30, 4  ;;  %v502_v40 = vadd.f32 %v501_v32, %v500_v24  ;;  %v585_v42 = vrot.slane %v584_v34, 2  ;;  %v5869_v48 = vld [vmem:[#allocation6 + $0x360] ss:$24 sps:$4 sm:$0xff]   ;;  %v7216_v23 = vld [vmem:[#allocation3 + $0x50] sm:$0xff] }
  0xfa   :  { %797 = vst [vmem:[#allocation20 + $0x8] sm:$0xff] %v791_v16  ;;  %v7195_v62 = vpack.c.bf16 %v791_v16, %v791_v16  ;;  %v335_v39 = vrot.slane %v334_v31, 1  ;;  %v377_v43 = vrot.slane %v376_v35, 1  ;;  %v419_v44 = vrot.slane %v418_v36, 1  ;;  %v5863_v16 = vld [vmem:[#allocation6 + $0x330] ss:$24 sps:$4 sm:$0xff]  }
  0xfb   :  { %v544_v41 = vadd.f32 %v543_v33, %v542_v25  ;;  %v461_v45 = vrot.slane %v460_v37, 1  ;;  %v626_v46 = vadd.f32 %v625_v38, %v624_v30  ;;  %v503_v49 = vrot.slane %v502_v40, 1  ;;  %v5880_v22 = vld [vmem:[#allocation6 + $0x39c] ss:$24 sps:$4 sm:$0xff]   ;;  %v7218_v24 = vld [vmem:[#allocation3 + $0x68] sm:$0xff]  ;;  %v7220_v25 = vld [vmem:[#allocation3 + $0x80] sm:$0xff] }
  0xfc   :  { %2600 = vmatprep.mubr.bf16.mxu0 %v7195_v62  ;;  %2723 = vmatprep.mubr.bf16.mxu1 %v7195_v62  ;;  %v336_v47 = vadd.f32 %v335_v39, %v334_v31  ;;  %v586_v54 = vadd.f32 %v585_v42, %v584_v34  ;;  %v378_v59 = vadd.f32 %v377_v43, %v376_v35  ;;  %v236_v26 = vunpack.c.l.bf16 %v7210_v51  ;;  %v7224_v28 = vld [vmem:[#allocation3 + $0x98] sm:$0xff]  ;;  %v7226_v29 = vld [vmem:[#allocation3 + $0xb0] sm:$0xff]  ;;  %v7228_v30 = vld [vmem:[#allocation3 + $0xc8] sm:$0xff] }
  0xfd   :  { %v545_v50 = vrot.slane %v544_v41, 1  ;;  %v420_v60 = vadd.f32 %v419_v44, %v418_v36  ;;  %v462_v61 = vadd.f32 %v461_v45, %v460_v37  ;;  %v627_v53 = vrot.slane %v626_v46, 2  ;;  %v7234_v35 = vld [vmem:[#allocation3 + $0xe0] sm:$0xff]  ;;  %v7236_v36 = vld [vmem:[#allocation3 + $0xf8] sm:$0xff]  ;;  %v7238_v37 = vld [vmem:[#allocation3 + $0x110] sm:$0xff] }
  0xfe   :  { %v504_v2 = vadd.f32 %v503_v49, %v502_v40  ;;  %v587_v3 = vrot.slane %v586_v54, 1  ;;  %v715_v6 = vsel %vm714_vm0, %v378_v59, %v336_v47  ;;  %v237_v27 = vunpack.c.h.bf16 %v7210_v51  ;;  %v7244_v42 = vld [vmem:[#allocation3 + $0x128] sm:$0xff]  ;;  %v7246_v43 = vld [vmem:[#allocation3 + $0x140] sm:$0xff]  ;;  %v7248_v44 = vld [vmem:[#allocation3 + $0x158] sm:$0xff] }
  0xff   :  { %v546_v56 = vadd.f32 %v545_v50, %v544_v41  ;;  %v628_v4 = vadd.f32 %v627_v53, %v626_v46  ;;  %v717_v58 = vsel %vm716_vm1, %v420_v60, %v715_v6  ;;  %v242_v31 = vunpack.c.l.bf16 %v7212_v55  ;;  %v7254_v50 = vld [vmem:[#allocation3 + $0x170] sm:$0xff] }
 0x100   :  { %v588_v57 = vadd.f32 %v587_v3, %v586_v54  ;;  %v719_v7 = vsel %vm718_vm2, %v462_v61, %v717_v58  ;;  %v243_v32 = vunpack.c.h.bf16 %v7212_v55  ;;  %v248_v33 = vunpack.c.l.bf16 %v7214_v52  ;;  %v5875_v53 = vld [vmem:[#allocation6 + $0x390] ss:$24 sps:$4 sm:$0xff]   ;;  %v5886_v58 = vld [vmem:[#allocation6 + $0x3cc] ss:$24 sps:$4 sm:$0xff]   ;;  %v5905_v55 = vld [vmem:[#allocation6 + $0x480] ss:$24 sps:$4 sm:$0xff]  }
 0x101   :  { %v629_v63 = vrot.slane %v628_v4, 1  ;;  %v721_v11 = vsel %vm720_vm3, %v504_v2, %v719_v7  ;;  %v249_v34 = vunpack.c.h.bf16 %v7214_v52  ;;  %v254_v38 = vunpack.c.l.bf16 %v7216_v23  ;;  %v5878_v2 = vld [vmem:[#allocation6 + $0x398] ss:$24 sps:$4 sm:$0xff]  }
 0x102   :  { %v723_v1 = vsel %vm722_vm4, %v546_v56, %v721_v11  ;;  %v255_v39 = vunpack.c.h.bf16 %v7216_v23  ;;  %v260_v40 = vunpack.c.l.bf16 %v7218_v24  ;;  %v261_v41 = vunpack.c.h.bf16 %v7218_v24  ;;  %v5908_v24 = vld [vmem:[#allocation6 + $0x488] ss:$24 sps:$4 sm:$0xff]  }
 0x103   :  { %v630_v0 = vadd.f32 %v629_v63, %v628_v4  ;;  %v725_v8 = vsel %vm724_vm5, %v588_v57, %v723_v1  ;;  %v266_v45 = vunpack.c.l.bf16 %v7220_v25  ;;  %v267_v46 = vunpack.c.h.bf16 %v7220_v25  ;;  %v5883_v57 = vld [vmem:[#allocation6 + $0x3c4] ss:$24 sps:$4 sm:$0xff]   ;;  %v5881_v1 = vld [vmem:[#allocation6 + $0x3c0] ss:$24 sps:$4 sm:$0xff]  }
 0x104   :  { %v272_v47 = vunpack.c.l.bf16 %v7224_v28  ;;  %v273_v49 = vunpack.c.h.bf16 %v7224_v28  ;;  %v278_v54 = vunpack.c.l.bf16 %v7226_v29  ;;  %v279_v59 = vunpack.c.h.bf16 %v7226_v29 }
 0x105   :  { %v727_v9 = vsel %vm726_vm6, %v630_v0, %v725_v8  ;;  %v284_v60 = vunpack.c.l.bf16 %v7228_v30  ;;  %v285_v61 = vunpack.c.h.bf16 %v7228_v30  ;;  %v291_v56 = vunpack.c.h.bf16 %v7234_v35 }
 0x106   :  { %v790_v12 = vmul.f32 0.125, %v727_v9  ;;  %v297_v4 = vunpack.c.h.bf16 %v7236_v36  ;;  %v303_v6 = vunpack.c.h.bf16 %v7238_v37  ;;  %v309_v11 = vunpack.c.h.bf16 %v7244_v42 }
 0x107   :  { %v315_v0 = vunpack.c.h.bf16 %v7246_v43  ;;  %v470_v51 = vadd.f32 %v278_v54, %v272_v47  ;;  %v7561_v23 = vunpack.c.l.bf16 %v7234_v35  ;;  %v7562_v29 = vunpack.c.l.bf16 %v7236_v36  ;;  %v5913_v47 = vld [vmem:[#allocation6 + $0x4b4] ss:$24 sps:$4 sm:$0xff]  }
 0x108   :  { %796 = vst [vmem:[#allocation20] sm:$0xff] %v790_v12  ;;  %v7206_v13 = vpack.c.bf16 %v790_v12, %v790_v12  ;;  %v321_v12 = vunpack.c.h.bf16 %v7248_v44  ;;  %v5916_v54 = vld [vmem:[#allocation6 + $0x4bc] ss:$24 sps:$4 sm:$0xff]  }
 0x109   :  { %v471_v28 = vrot.slane %v470_v51, 4 }
 0x10a   :  { %2601 = vmatmul.mubr.bf16.vlgmr.msra.gmra.mrb[0].mxu0 %v7206_v13  ;;  %2724 = vmatmul.mubr.bf16.vlgmr.msra.gmra.mrb[0].mxu1 %v7206_v13 }
 0x10b   :  { %2610 = vmatpush1.bf16.msra.mxu0 %v5857_v10  ;;  %2733 = vmatpush1.bf16.msra.mxu1 %v5860_v15  ;;  %v327_v10 = vunpack.c.h.bf16 %v7254_v50  ;;  %v5884_v15 = vld [vmem:[#allocation6 + $0x3c8] ss:$24 sps:$4 sm:$0xff]  }
 0x10c   :  { %2611 = vmatprep.subr.bf16.mxu0 %v5865_v14  ;;  %2734 = vmatprep.subr.bf16.mxu1 %v5868_v18  ;;  %v351_v14 = vadd.f32 %v243_v32, %v237_v27  ;;  %v393_v18 = vadd.f32 %v255_v39, %v249_v34  ;;  %v5887_v39 = vld [vmem:[#allocation6 + $0x3f0] ss:$24 sps:$4 sm:$0xff]  }
 0x10d   :  { %v645_v34 = vadd.f32 %v327_v10, %v321_v12 }
 0x10e   :  { %v352_v9 = vrot.slane %v351_v14, 4  ;;  %v394_v8 = vrot.slane %v393_v18, 4 }
 0x10f   :  { %2612 = vmatpush1.bf16.msra.mxu0 %v5863_v16  ;;  %2735 = vmatpush1.bf16.msra.mxu1 %v5866_v19  ;;  %v435_v16 = vadd.f32 %v267_v46, %v261_v41  ;;  %v477_v19 = vadd.f32 %v279_v59, %v273_v49  ;;  %v5890_v41 = vld [vmem:[#allocation6 + $0x3f8] ss:$24 sps:$4 sm:$0xff]  }
 0x110   :  { %2613 = vmatprep.subr.bf16.mxu0 %v5871_v17  ;;  %2736 = vmatprep.subr.bf16.mxu1 %v5874_v20  ;;  %v5889_v17 = vld [vmem:[#allocation6 + $0x3f4] ss:$24 sps:$4 sm:$0xff]   ;;  %v353_v46 = vadd.f32 %v352_v9, %v351_v14  ;;  %v395_v49 = vadd.f32 %v394_v8, %v393_v18 }
 0x111   :  { %v5892_v20 = vld [vmem:[#allocation6 + $0x3fc] ss:$24 sps:$4 sm:$0xff]   ;;  %v436_v7 = vrot.slane %v435_v16, 4  ;;  %v478_v63 = vrot.slane %v477_v19, 4 }
 0x112   :  { %v5901_v18 = vld [vmem:[#allocation6 + $0x454] ss:$24 sps:$4 sm:$0xff]  }
 0x113   :  { %2614 = vmatpush1.bf16.msra.mxu0 %v5869_v48  ;;  %2737 = vmatpush1.bf16.msra.mxu1 %v5872_v21  ;;  %v519_v21 = vadd.f32 %v291_v56, %v285_v61  ;;  %v437_v59 = vadd.f32 %v436_v7, %v435_v16  ;;  %v5895_v61 = vld [vmem:[#allocation6 + $0x424] ss:$24 sps:$4 sm:$0xff]   ;;  %v5893_v7 = vld [vmem:[#allocation6 + $0x420] ss:$24 sps:$4 sm:$0xff]  }
 0x114   :  { %2615 = vmatprep.subr.bf16.mxu0 %v5877_v5  ;;  %2738 = vmatprep.subr.bf16.mxu1 %v5880_v22  ;;  %v561_v5 = vadd.f32 %v303_v6, %v297_v4  ;;  %v603_v22 = vadd.f32 %v315_v0, %v309_v11  ;;  %v646_v6 = vrot.slane %v645_v34, 4  ;;  %v396_v11 = vrot.slane %v395_v49, 2  ;;  %v5904_v16 = vld [vmem:[#allocation6 + $0x45c] ss:$24 sps:$4 sm:$0xff]  }
 0x115   :  { %v520_v3 = vrot.slane %v519_v21, 4  ;;  %v438_v0 = vrot.slane %v437_v59, 2 }
 0x116   :  { %v562_v27 = vrot.slane %v561_v5, 4  ;;  %v604_v32 = vrot.slane %v603_v22, 4  ;;  %v647_v8 = vadd.f32 %v646_v6, %v645_v34 }
 0x117   :  { %2616 = vmatpush1.bf16.msra.mxu0 %v5875_v53  ;;  %2739 = vmatpush1.bf16.msra.mxu1 %v5878_v2  ;;  %v479_v53 = vadd.f32 %v478_v63, %v477_v19  ;;  %v521_v2 = vadd.f32 %v520_v3, %v519_v21  ;;  %v5896_v63 = vld [vmem:[#allocation6 + $0x428] ss:$24 sps:$4 sm:$0xff]   ;;  %v439_v14 = vadd.f32 %v438_v0, %v437_v59  ;;  %v326_v0 = vunpack.c.l.bf16 %v7254_v50 }
 0x118   :  { %2617 = vmatprep.subr.bf16.mxu0 %v5883_v57  ;;  %2740 = vmatprep.subr.bf16.mxu1 %v5886_v58  ;;  %v563_v56 = vadd.f32 %v562_v27, %v561_v5  ;;  %v605_v4 = vadd.f32 %v604_v32, %v603_v22  ;;  %v5898_v57 = vld [vmem:[#allocation6 + $0x42c] ss:$24 sps:$4 sm:$0xff]   ;;  %v354_v58 = vrot.slane %v353_v46, 2  ;;  %v648_v21 = vrot.slane %v647_v8, 2  ;;  %v5899_v59 = vld [vmem:[#allocation6 + $0x450] ss:$24 sps:$4 sm:$0xff]  }
 0x119   :  { %v480_v12 = vrot.slane %v479_v53, 2  ;;  %v522_v10 = vrot.slane %v521_v2, 2  ;;  %v440_v27 = vrot.slane %v439_v14, 1 }
 0x11a   :  { %v564_v48 = vrot.slane %v563_v56, 2  ;;  %v606_v9 = vrot.slane %v605_v4, 2 }
 0x11b   :  { %2618 = vmatpush1.bf16.msra.mxu0 %v5881_v1  ;;  %2741 = vmatpush1.bf16.msra.mxu1 %v5884_v15  ;;  %v355_v1 = vadd.f32 %v354_v58, %v353_v46  ;;  %v397_v15 = vadd.f32 %v396_v11, %v395_v49  ;;  %v481_v3 = vadd.f32 %v480_v12, %v479_v53  ;;  %v5902_v53 = vld [vmem:[#allocation6 + $0x458] ss:$24 sps:$4 sm:$0xff]  }
 0x11c   :  { %2619 = vmatprep.subr.bf16.mxu0 %v5889_v17  ;;  %2742 = vmatprep.subr.bf16.mxu1 %v5892_v20  ;;  %v523_v19 = vadd.f32 %v522_v10, %v521_v2  ;;  %v565_v17 = vadd.f32 %v564_v48, %v563_v56  ;;  %v607_v20 = vadd.f32 %v606_v9, %v605_v4  ;;  %v5907_v48 = vld [vmem:[#allocation6 + $0x484] ss:$24 sps:$4 sm:$0xff]  }
 0x11d   :  { %v356_v5 = vrot.slane %v355_v1, 1  ;;  %v398_v22 = vrot.slane %v397_v15, 1  ;;  %v482_v32 = vrot.slane %v481_v3, 1  ;;  %v649_v49 = vadd.f32 %v648_v21, %v647_v8 }
 0x11e   :  { %v524_v34 = vrot.slane %v523_v19, 1  ;;  %v566_v6 = vrot.slane %v565_v17, 1  ;;  %v608_v46 = vrot.slane %v607_v20, 1  ;;  %v441_v58 = vadd.f32 %v440_v27, %v439_v14 }
 0x11f   :  { %2620 = vmatpush1.bf16.msra.mxu0 %v5887_v39  ;;  %2743 = vmatpush1.bf16.msra.mxu1 %v5890_v41  ;;  %v357_v39 = vadd.f32 %v356_v5, %v355_v1  ;;  %v399_v41 = vadd.f32 %v398_v22, %v397_v15  ;;  %v483_v11 = vadd.f32 %v482_v32, %v481_v3  ;;  %v650_v4 = vrot.slane %v649_v49, 1  ;;  %v5919_v32 = vld [vmem:[#allocation6 + $0x4e4] ss:$24 sps:$4 sm:$0xff]  }
 0x120   :  { %2621 = vmatprep.subr.bf16.mxu0 %v5895_v61  ;;  %2744 = vmatprep.subr.bf16.mxu1 %v5898_v57  ;;  %v525_v2 = vadd.f32 %v524_v34, %v523_v19  ;;  %v567_v61 = vadd.f32 %v566_v6, %v565_v17  ;;  %v609_v56 = vadd.f32 %v608_v46, %v607_v20  ;;  %v5910_v57 = vld [vmem:[#allocation6 + $0x48c] ss:$24 sps:$4 sm:$0xff]   ;;  %v5914_v20 = vld [vmem:[#allocation6 + $0x4b8] ss:$24 sps:$4 sm:$0xff]  }
 0x121   :  { %v742_v12 = vsel %vm714_vm0, %v399_v41, %v357_v39  ;;  %v344_v10 = vadd.f32 %v242_v31, %v236_v26  ;;  %v386_v9 = vadd.f32 %v254_v38, %v248_v33  ;;  %v651_v8 = vadd.f32 %v650_v4, %v649_v49  ;;  %v5922_v34 = vld [vmem:[#allocation6 + $0x4ec] ss:$24 sps:$4 sm:$0xff]  }
 0x122   :  { %v512_v33 = vadd.f32 %v7561_v23, %v284_v60  ;;  %v472_v3 = vadd.f32 %v471_v28, %v470_v51 }
 0x123   :  { %2622 = vmatpush1.bf16.msra.mxu0 %v5893_v7  ;;  %2745 = vmatpush1.bf16.msra.mxu1 %v5896_v63  ;;  %v743_v7 = vsel %vm716_vm1, %v441_v58, %v742_v12  ;;  %v428_v63 = vadd.f32 %v266_v45, %v260_v40  ;;  %v345_v52 = vrot.slane %v344_v10, 4  ;;  %v387_v31 = vrot.slane %v386_v9, 4  ;;  %v5920_v12 = vld [vmem:[#allocation6 + $0x4e8] ss:$24 sps:$4 sm:$0xff]  }
 0x124   :  { %2623 = vmatprep.subr.bf16.mxu0 %v5901_v18  ;;  %2746 = vmatprep.subr.bf16.mxu1 %v5904_v16  ;;  %v744_v26 = vsel %vm718_vm2, %v483_v11, %v743_v7  ;;  %v7563_v40 = vunpack.c.l.bf16 %v7238_v37  ;;  %v513_v1 = vrot.slane %v512_v33, 4  ;;  %v5911_v16 = vld [vmem:[#allocation6 + $0x4b0] ss:$24 sps:$4 sm:$0xff]   ;;  %v473_v22 = vrot.slane %v472_v3, 2  ;;  %v5925_v7 = vld [vmem:[#allocation6 + $0x514] ss:$24 sps:$4 sm:$0xff]  }
 0x125   :  { %v745_v25 = vsel %vm720_vm3, %v525_v2, %v744_v26  ;;  %v429_v38 = vrot.slane %v428_v63, 4  ;;  %v346_v35 = vadd.f32 %v345_v52, %v344_v10  ;;  %v388_v60 = vadd.f32 %v387_v31, %v386_v9 }
 0x126   :  { %v554_v45 = vadd.f32 %v7563_v40, %v7562_v29  ;;  %v746_v30 = vsel %vm722_vm4, %v567_v61, %v745_v25  ;;  %v514_v17 = vadd.f32 %v513_v1, %v512_v33  ;;  %v474_v11 = vadd.f32 %v473_v22, %v472_v3  ;;  %v5943_v22 = vld [vmem:[#allocation6 + $0x5a4] ss:$24 sps:$4 sm:$0xff]  }
 0x127   :  { %2624 = vmatpush1.bf16.msra.mxu0 %v5899_v59  ;;  %2747 = vmatpush1.bf16.msra.mxu1 %v5902_v53  ;;  %v747_v15 = vsel %vm724_vm5, %v609_v56, %v746_v30  ;;  %v430_v14 = vadd.f32 %v429_v38, %v428_v63  ;;  %v347_v19 = vrot.slane %v346_v35, 2  ;;  %v389_v37 = vrot.slane %v388_v60, 2  ;;  %v5928_v63 = vld [vmem:[#allocation6 + $0x51c] ss:$24 sps:$4 sm:$0xff]   ;;  %v5926_v38 = vld [vmem:[#allocation6 + $0x518] ss:$24 sps:$4 sm:$0xff]  }
 0x128   :  { %2625 = vmatprep.subr.bf16.mxu0 %v5907_v48  ;;  %2748 = vmatprep.subr.bf16.mxu1 %v5910_v57  ;;  %v555_v18 = vrot.slane %v554_v45, 4  ;;  %v748_v36 = vsel %vm726_vm6, %v651_v8, %v747_v15  ;;  %v515_v49 = vrot.slane %v514_v17, 2  ;;  %v7564_v59 = vunpack.c.l.bf16 %v7244_v42  ;;  %v5917_v57 = vld [vmem:[#allocation6 + $0x4e0] ss:$24 sps:$4 sm:$0xff]  }
 0x129   :  { %v793_v21 = vmul.f32 0.125, %v748_v36  ;;  %v431_v5 = vrot.slane %v430_v14, 2  ;;  %v348_v6 = vadd.f32 %v347_v19, %v346_v35  ;;  %v390_v46 = vadd.f32 %v389_v37, %v388_v60  ;;  %v5929_v15 = vld [vmem:[#allocation6 + $0x540] ss:$24 sps:$4 sm:$0xff]   ;;  %v5940_v36 = vld [vmem:[#allocation6 + $0x57c] ss:$24 sps:$4 sm:$0xff]  }
 0x12a   :  { %v556_v27 = vadd.f32 %v555_v18, %v554_v45  ;;  %v7565_v53 = vunpack.c.l.bf16 %v7246_v43  ;;  %v516_v56 = vadd.f32 %v515_v49, %v514_v17  ;;  %v475_v9 = vrot.slane %v474_v11, 1  ;;  %v5931_v45 = vld [vmem:[#allocation6 + $0x544] ss:$24 sps:$4 sm:$0xff]   ;;  %v5949_v49 = vld [vmem:[#allocation6 + $0x5d4] ss:$24 sps:$4 sm:$0xff]  }
 0x12b   :  { %2626 = vmatpush1.bf16.msra.mxu0 %v5905_v55  ;;  %2749 = vmatpush1.bf16.msra.mxu1 %v5908_v24  ;;  %799 = vst [vmem:[#allocation20 + $0x18] sm:$0xff] %v793_v21  ;;  %v7309_v41 = vpack.c.bf16 %v793_v21, %v793_v21  ;;  %v432_v58 = vadd.f32 %v431_v5, %v430_v14  ;;  %v349_v2 = vrot.slane %v348_v6, 1  ;;  %v391_v61 = vrot.slane %v390_v46, 1  ;;  %v5932_v14 = vld [vmem:[#allocation6 + $0x548] ss:$24 sps:$4 sm:$0xff]  }
 0x12c   :  { %2627 = vmatprep.subr.bf16.mxu0 %v5913_v47  ;;  %2750 = vmatprep.subr.bf16.mxu1 %v5916_v54  ;;  %v596_v39 = vadd.f32 %v7565_v53, %v7564_v59  ;;  %v557_v48 = vrot.slane %v556_v27, 2  ;;  %v7566_v43 = vunpack.c.l.bf16 %v7248_v44  ;;  %v517_v26 = vrot.slane %v516_v56, 1  ;;  %v5934_v47 = vld [vmem:[#allocation6 + $0x54c] ss:$24 sps:$4 sm:$0xff]   ;;  %v5938_v21 = vld [vmem:[#allocation6 + $0x578] ss:$24 sps:$4 sm:$0xff]  }
 0x12d   :  { %v433_v10 = vrot.slane %v432_v58, 1  ;;  %v350_v51 = vadd.f32 %v349_v2, %v348_v6  ;;  %v392_v55 = vadd.f32 %v391_v61, %v390_v46  ;;  %2641 = vmatprep.mubr.bf16.mxu0 %v7309_v41  ;;  %2764 = vmatprep.mubr.bf16.mxu1 %v7309_v41  ;;  %v476_v23 = vadd.f32 %v475_v9, %v474_v11  ;;  %v5944_v6 = vld [vmem:[#allocation6 + $0x5a8] ss:$24 sps:$4 sm:$0xff]   ;;  %v5952_v59 = vld [vmem:[#allocation6 + $0x5dc] ss:$24 sps:$4 sm:$0xff]  }
 0x12e   :  { %v597_v4 = vrot.slane %v596_v39, 4  ;;  %v558_v42 = vadd.f32 %v557_v48, %v556_v27  ;;  %v638_v8 = vadd.f32 %v326_v0, %v7566_v43  ;;  %v518_v44 = vadd.f32 %v517_v26, %v516_v56  ;;  %v5923_v0 = vld [vmem:[#allocation6 + $0x510] ss:$24 sps:$4 sm:$0xff]   ;;  %v5946_v27 = vld [vmem:[#allocation6 + $0x5ac] ss:$24 sps:$4 sm:$0xff]   ;;  %v7332_v48 = vld [vmem:[#allocation3 + $0x58] sm:$0xff] }
 0x12f   :  { %2628 = vmatpush1.bf16.msra.mxu0 %v5911_v16  ;;  %2751 = vmatpush1.bf16.msra.mxu1 %v5914_v20  ;;  %v434_v31 = vadd.f32 %v433_v10, %v432_v58  ;;  %v735_v50 = vsel %vm714_vm0, %v392_v55, %v350_v51  ;;  %v5937_v16 = vld [vmem:[#allocation6 + $0x574] ss:$24 sps:$4 sm:$0xff]   ;;  %v5935_v20 = vld [vmem:[#allocation6 + $0x570] ss:$24 sps:$4 sm:$0xff]   ;;  %v7330_v11 = vld [vmem:[#allocation3 + $0x40] sm:$0xff]  ;;  %v256_v26 = vunpack.c.l.bf16 %v7332_v48 }
 0x130   :  { %2629 = vmatprep.subr.bf16.mxu0 %v5919_v32  ;;  %2752 = vmatprep.subr.bf16.mxu1 %v5922_v34  ;;  %v598_v52 = vadd.f32 %v597_v4, %v596_v39  ;;  %v559_v33 = vrot.slane %v558_v42, 1  ;;  %v639_v24 = vrot.slane %v638_v8, 4  ;;  %v5941_v32 = vld [vmem:[#allocation6 + $0x5a0] ss:$24 sps:$4 sm:$0xff]   ;;  %v7324_v53 = vld [vmem:[#allocation3 + $0x10] sm:$0xff]  ;;  %v7328_v58 = vld [vmem:[#allocation3 + $0x28] sm:$0xff]  ;;  %v250_v43 = vunpack.c.l.bf16 %v7330_v11 }
 0x131   :  { %v736_v40 = vsel %vm716_vm1, %v434_v31, %v735_v50  ;;  %v238_v2 = vunpack.c.l.bf16 %v7324_v53  ;;  %v5947_v61 = vld [vmem:[#allocation6 + $0x5d0] ss:$24 sps:$4 sm:$0xff]   ;;  %v239_v10 = vunpack.c.h.bf16 %v7324_v53  ;;  %v244_v9 = vunpack.c.l.bf16 %v7328_v58 }
 0x132   :  { %v599_v25 = vrot.slane %v598_v52, 2  ;;  %v560_v28 = vadd.f32 %v559_v33, %v558_v42  ;;  %v640_v29 = vadd.f32 %v639_v24, %v638_v8  ;;  %v737_v30 = vsel %vm718_vm2, %v476_v23, %v736_v40  ;;  %v5950_v56 = vld [vmem:[#allocation6 + $0x5d8] ss:$24 sps:$4 sm:$0xff]   ;;  %v5955_v8 = vld [vmem:[#allocation6 + $0x604] ss:$24 sps:$4 sm:$0xff]   ;;  %v7349_v51 = vld [vmem:[#allocation3 + $0xe8] sm:$0xff] }
 0x133   :  { %2630 = vmatpush1.bf16.msra.mxu0 %v5917_v57  ;;  %2753 = vmatpush1.bf16.msra.mxu1 %v5920_v12  ;;  %v738_v60 = vsel %vm720_vm3, %v518_v44, %v737_v30  ;;  %v7335_v4 = vld [vmem:[#allocation3 + $0x70] sm:$0xff]  ;;  %v7337_v57 = vld [vmem:[#allocation3 + $0x88] sm:$0xff]  ;;  %v7339_v12 = vld [vmem:[#allocation3 + $0xa0] sm:$0xff]  ;;  %v245_v42 = vunpack.c.h.bf16 %v7328_v58  ;;  %v251_v55 = vunpack.c.h.bf16 %v7330_v11 }
 0x134   :  { %2631 = vmatprep.subr.bf16.mxu0 %v5925_v7  ;;  %2754 = vmatprep.subr.bf16.mxu1 %v5928_v63  ;;  %v600_v54 = vadd.f32 %v599_v25, %v598_v52  ;;  %v641_v35 = vrot.slane %v640_v29, 2  ;;  %v739_v18 = vsel %vm722_vm4, %v560_v28, %v738_v60  ;;  %v7345_v7 = vld [vmem:[#allocation3 + $0xb8] sm:$0xff]  ;;  %v7347_v63 = vld [vmem:[#allocation3 + $0xd0] sm:$0xff]  ;;  %v257_v52 = vunpack.c.h.bf16 %v7332_v48  ;;  %v7355_v23 = vld [vmem:[#allocation3 + $0x100] sm:$0xff] }
 0x135   :  { %v262_v31 = vunpack.c.l.bf16 %v7335_v4  ;;  %v7357_v33 = vld [vmem:[#allocation3 + $0x118] sm:$0xff]  ;;  %v7359_v24 = vld [vmem:[#allocation3 + $0x130] sm:$0xff]  ;;  %v263_v44 = vunpack.c.h.bf16 %v7335_v4  ;;  %v268_v25 = vunpack.c.l.bf16 %v7337_v57  ;;  %v269_v50 = vunpack.c.h.bf16 %v7337_v57  ;;  %v7365_v28 = vld [vmem:[#allocation3 + $0x148] sm:$0xff] }
 0x136   :  { %v601_v1 = vrot.slane %v600_v54, 1  ;;  %v642_v3 = vadd.f32 %v641_v35, %v640_v29  ;;  %v7367_v29 = vld [vmem:[#allocation3 + $0x160] sm:$0xff]  ;;  %v275_v40 = vunpack.c.h.bf16 %v7339_v12  ;;  %v7373_v30 = vld [vmem:[#allocation3 + $0x178] sm:$0xff]  ;;  %v287_v35 = vunpack.c.h.bf16 %v7347_v63  ;;  %v5973_v60 = vld [vmem:[#allocation6 + $0x694] ss:$24 sps:$4 sm:$0xff]  }
 0x137   :  { %2632 = vmatpush1.bf16.msra.mxu0 %v5923_v0  ;;  %2755 = vmatpush1.bf16.msra.mxu1 %v5926_v38  ;;  %v274_v0 = vunpack.c.l.bf16 %v7339_v12  ;;  %v5958_v38 = vld [vmem:[#allocation6 + $0x60c] ss:$24 sps:$4 sm:$0xff]   ;;  %v442_v53 = vadd.f32 %v268_v25, %v262_v31  ;;  %v5988_v58 = vld [vmem:[#allocation6 + $0x6fc] ss:$24 sps:$4 sm:$0xff]   ;;  %v7567_v11 = vunpack.c.l.bf16 %v7347_v63  ;;  %v7568_v48 = vunpack.c.l.bf16 %v7349_v51  ;;  %v5986_v63 = vld [vmem:[#allocation6 + $0x6f8] ss:$24 sps:$4 sm:$0xff]  }
 0x138   :  { %2633 = vmatprep.subr.bf16.mxu0 %v5931_v45  ;;  %2756 = vmatprep.subr.bf16.mxu1 %v5934_v47  ;;  %v602_v19 = vadd.f32 %v601_v1, %v600_v54  ;;  %v643_v37 = vrot.slane %v642_v3, 1  ;;  %v280_v45 = vunpack.c.l.bf16 %v7345_v7  ;;  %v281_v47 = vunpack.c.h.bf16 %v7345_v7 }
 0x139   :  { %v293_v1 = vunpack.c.h.bf16 %v7349_v51  ;;  %v7569_v31 = vunpack.c.l.bf16 %v7355_v23  ;;  %v7570_v25 = vunpack.c.l.bf16 %v7357_v33 }
 0x13a   :  { %v740_v17 = vsel %vm724_vm5, %v602_v19, %v739_v18  ;;  %v644_v5 = vadd.f32 %v643_v37, %v642_v3  ;;  %v305_v18 = vunpack.c.h.bf16 %v7357_v33  ;;  %v5956_v19 = vld [vmem:[#allocation6 + $0x608] ss:$24 sps:$4 sm:$0xff]  }
 0x13b   :  { %2634 = vmatpush1.bf16.msra.mxu0 %v5929_v15  ;;  %2757 = vmatpush1.bf16.msra.mxu1 %v5932_v14  ;;  %v299_v15 = vunpack.c.h.bf16 %v7355_v23  ;;  %v5991_v23 = vld [vmem:[#allocation6 + $0x724] ss:$24 sps:$4 sm:$0xff]  }
 0x13c   :  { %2635 = vmatprep.subr.bf16.mxu0 %v5937_v16  ;;  %2758 = vmatprep.subr.bf16.mxu1 %v5940_v36  ;;  %v741_v34 = vsel %vm726_vm6, %v644_v5, %v740_v17  ;;  %v311_v16 = vunpack.c.h.bf16 %v7359_v24  ;;  %v5953_v36 = vld [vmem:[#allocation6 + $0x600] ss:$24 sps:$4 sm:$0xff]   ;;  %v5961_v5 = vld [vmem:[#allocation6 + $0x634] ss:$24 sps:$4 sm:$0xff]  }
 0x13d   :  { %v792_v46 = vmul.f32 0.125, %v741_v34  ;;  %v365_v34 = vadd.f32 %v245_v42, %v239_v10  ;;  %v5962_v17 = vld [vmem:[#allocation6 + $0x638] ss:$24 sps:$4 sm:$0xff]  }
 0x13f   :  { %2636 = vmatpush1.bf16.msra.mxu0 %v5935_v20  ;;  %2759 = vmatpush1.bf16.msra.mxu1 %v5938_v21  ;;  %798 = vst [vmem:[#allocation20 + $0x10] sm:$0xff] %v792_v46  ;;  %v7326_v39 = vpack.c.bf16 %v792_v46, %v792_v46  ;;  %v317_v20 = vunpack.c.h.bf16 %v7365_v28  ;;  %v323_v21 = vunpack.c.h.bf16 %v7367_v29  ;;  %v5959_v46 = vld [vmem:[#allocation6 + $0x630] ss:$24 sps:$4 sm:$0xff]  }
 0x140   :  { %2637 = vmatprep.subr.bf16.mxu0 %v5943_v22  ;;  %2760 = vmatprep.subr.bf16.mxu1 %v5946_v27  ;;  %v5964_v22 = vld [vmem:[#allocation6 + $0x63c] ss:$24 sps:$4 sm:$0xff]  }
 0x141   :  { %v617_v37 = vadd.f32 %v317_v20, %v311_v16  ;;  %v5967_v27 = vld [vmem:[#allocation6 + $0x664] ss:$24 sps:$4 sm:$0xff]   ;;  %v5968_v20 = vld [vmem:[#allocation6 + $0x668] ss:$24 sps:$4 sm:$0xff]  }
 0x143   :  { %2638 = vmatpush1.bf16.msra.mxu0 %v5941_v32  ;;  %2761 = vmatpush1.bf16.msra.mxu1 %v5944_v6  ;;  %v329_v32 = vunpack.c.h.bf16 %v7373_v30  ;;  %v407_v6 = vadd.f32 %v257_v52, %v251_v55  ;;  %v5970_v52 = vld [vmem:[#allocation6 + $0x66c] ss:$24 sps:$4 sm:$0xff]  }
 0x144   :  { %2639 = vmatprep.subr.bf16.mxu0 %v5949_v49  ;;  %2762 = vmatprep.subr.bf16.mxu1 %v5952_v59  ;;  %v449_v49 = vadd.f32 %v269_v50, %v263_v44  ;;  %v491_v59 = vadd.f32 %v281_v47, %v275_v40  ;;  %v618_v40 = vrot.slane %v617_v37, 4 }
 0x145   :  { %v659_v3 = vadd.f32 %v329_v32, %v323_v21 }
 0x146   :  { %v450_v14 = vrot.slane %v449_v49, 4  ;;  %v492_v10 = vrot.slane %v491_v59, 4  ;;  %v619_v21 = vadd.f32 %v618_v40, %v617_v37  ;;  %v5979_v40 = vld [vmem:[#allocation6 + $0x6c4] ss:$24 sps:$4 sm:$0xff]  }
 0x147   :  { %2640 = vmatpush1.bf16.msra.mxu0 %v5947_v61  ;;  %2763 = vmatpush1.bf16.msra.mxu1 %v5950_v56  ;;  %v533_v61 = vadd.f32 %v293_v1, %v287_v35  ;;  %v575_v56 = vadd.f32 %v305_v18, %v299_v15  ;;  %v660_v47 = vrot.slane %v659_v3, 4  ;;  %v5965_v35 = vld [vmem:[#allocation6 + $0x660] ss:$24 sps:$4 sm:$0xff]  }
 0x148   :  { %2650 = vmatprep.subr.bf16.mxu0 %v5955_v8  ;;  %2773 = vmatprep.subr.bf16.mxu1 %v5958_v38  ;;  %v366_v8 = vrot.slane %v365_v34, 4  ;;  %v408_v38 = vrot.slane %v407_v6, 4  ;;  %v451_v1 = vadd.f32 %v450_v14, %v449_v49  ;;  %v493_v15 = vadd.f32 %v492_v10, %v491_v59 }
 0x149   :  { %v534_v42 = vrot.slane %v533_v61, 4  ;;  %v576_v55 = vrot.slane %v575_v56, 4  ;;  %v661_v32 = vadd.f32 %v660_v47, %v659_v3  ;;  %v620_v49 = vrot.slane %v619_v21, 2  ;;  %v5974_v3 = vld [vmem:[#allocation6 + $0x698] ss:$24 sps:$4 sm:$0xff]  }
 0x14a   :  { %2642 = vmatmul.mubr.bf16.vlgmr.msra.gmra.mrb[0].mxu0 %v7326_v39  ;;  %2765 = vmatmul.mubr.bf16.vlgmr.msra.gmra.mrb[0].mxu1 %v7326_v39  ;;  %v367_v44 = vadd.f32 %v366_v8, %v365_v34  ;;  %v409_v50 = vadd.f32 %v408_v38, %v407_v6  ;;  %v5976_v6 = vld [vmem:[#allocation6 + $0x69c] ss:$24 sps:$4 sm:$0xff]  }
 0x14b   :  { %2651 = vmatpush1.bf16.msra.mxu0 %v5953_v36  ;;  %2774 = vmatpush1.bf16.msra.mxu1 %v5956_v19  ;;  %v535_v18 = vadd.f32 %v534_v42, %v533_v61  ;;  %v577_v16 = vadd.f32 %v576_v55, %v575_v56  ;;  %v662_v59 = vrot.slane %v661_v32, 2  ;;  %v5971_v61 = vld [vmem:[#allocation6 + $0x690] ss:$24 sps:$4 sm:$0xff]   ;;  %v621_v42 = vadd.f32 %v620_v49, %v619_v21  ;;  %v5977_v21 = vld [vmem:[#allocation6 + $0x6c0] ss:$24 sps:$4 sm:$0xff]  }
 0x14c   :  { %2652 = vmatprep.subr.bf16.mxu0 %v5961_v5  ;;  %2775 = vmatprep.subr.bf16.mxu1 %v5964_v22  ;;  %v368_v36 = vrot.slane %v367_v44, 2  ;;  %v410_v19 = vrot.slane %v409_v50, 2  ;;  %v452_v5 = vrot.slane %v451_v1, 2  ;;  %v494_v22 = vrot.slane %v493_v15, 2 }
 0x14d   :  { %v536_v54 = vrot.slane %v535_v18, 2  ;;  %v578_v34 = vrot.slane %v577_v16, 2  ;;  %v663_v55 = vadd.f32 %v662_v59, %v661_v32  ;;  %v5980_v32 = vld [vmem:[#allocation6 + $0x6c8] ss:$24 sps:$4 sm:$0xff]   ;;  %v484_v49 = vadd.f32 %v280_v45, %v274_v0 }
 0x14e   :  { %v369_v8 = vadd.f32 %v368_v36, %v367_v44  ;;  %v411_v14 = vadd.f32 %v410_v19, %v409_v50  ;;  %v453_v56 = vadd.f32 %v452_v5, %v451_v1  ;;  %v495_v38 = vadd.f32 %v494_v22, %v493_v15  ;;  %v5982_v50 = vld [vmem:[#allocation6 + $0x6cc] ss:$24 sps:$4 sm:$0xff]  }
 0x14f   :  { %2653 = vmatpush1.bf16.msra.mxu0 %v5959_v46  ;;  %2776 = vmatpush1.bf16.msra.mxu1 %v5962_v17  ;;  %v537_v10 = vadd.f32 %v536_v54, %v535_v18  ;;  %v579_v37 = vadd.f32 %v578_v34, %v577_v16  ;;  %v622_v15 = vrot.slane %v621_v42, 1  ;;  %v664_v54 = vrot.slane %v663_v55, 1  ;;  %v5985_v34 = vld [vmem:[#allocation6 + $0x6f4] ss:$24 sps:$4 sm:$0xff]  }
 0x150   :  { %2654 = vmatprep.subr.bf16.mxu0 %v5967_v27  ;;  %2777 = vmatprep.subr.bf16.mxu1 %v5970_v52  ;;  %v370_v46 = vrot.slane %v369_v8, 1  ;;  %v412_v17 = vrot.slane %v411_v14, 1  ;;  %v454_v27 = vrot.slane %v453_v56, 1  ;;  %v496_v52 = vrot.slane %v495_v38, 1 }
 0x151   :  { %v538_v47 = vrot.slane %v537_v10, 1  ;;  %v580_v44 = vrot.slane %v579_v37, 1  ;;  %v568_v59 = vadd.f32 %v7570_v25, %v7569_v31  ;;  %v485_v7 = vrot.slane %v484_v49, 4  ;;  %v6006_v31 = vld [vmem:[#allocation6 + $0x78c] ss:$24 sps:$4 sm:$0xff]  }
 0x152   :  { %v371_v36 = vadd.f32 %v370_v46, %v369_v8  ;;  %v413_v1 = vadd.f32 %v412_v17, %v411_v14  ;;  %v455_v18 = vadd.f32 %v454_v27, %v453_v56  ;;  %v497_v16 = vadd.f32 %v496_v52, %v495_v38  ;;  %v5989_v52 = vld [vmem:[#allocation6 + $0x720] ss:$24 sps:$4 sm:$0xff]  }
 0x153   :  { %2655 = vmatpush1.bf16.msra.mxu0 %v5965_v35  ;;  %2778 = vmatpush1.bf16.msra.mxu1 %v5968_v20  ;;  %v539_v19 = vadd.f32 %v538_v47, %v537_v10  ;;  %v581_v5 = vadd.f32 %v580_v44, %v579_v37  ;;  %v623_v35 = vadd.f32 %v622_v15, %v621_v42  ;;  %v569_v10 = vrot.slane %v568_v59, 4  ;;  %v5994_v37 = vld [vmem:[#allocation6 + $0x72c] ss:$24 sps:$4 sm:$0xff]  }
 0x154   :  { %2656 = vmatprep.subr.bf16.mxu0 %v5973_v60  ;;  %2779 = vmatprep.subr.bf16.mxu1 %v5976_v6  ;;  %v665_v20 = vadd.f32 %v664_v54, %v663_v55  ;;  %v756_v22 = vsel %vm714_vm0, %v413_v1, %v371_v36  ;;  %v358_v60 = vadd.f32 %v244_v9, %v238_v2  ;;  %v328_v6 = vunpack.c.l.bf16 %v7373_v30  ;;  %v5992_v54 = vld [vmem:[#allocation6 + $0x728] ss:$24 sps:$4 sm:$0xff]  }
 0x155   :  { %v757_v8 = vsel %vm716_vm1, %v455_v18, %v756_v22  ;;  %v400_v14 = vadd.f32 %v256_v26, %v250_v43  ;;  %v526_v43 = vadd.f32 %v7568_v48, %v7567_v11  ;;  %v443_v26 = vrot.slane %v442_v53, 4  ;;  %v5997_v18 = vld [vmem:[#allocation6 + $0x754] ss:$24 sps:$4 sm:$0xff]   ;;  %v5998_v11 = vld [vmem:[#allocation6 + $0x758] ss:$24 sps:$4 sm:$0xff]  }
 0x156   :  { %v758_v2 = vsel %vm718_vm2, %v497_v16, %v757_v8  ;;  %v359_v9 = vrot.slane %v358_v60, 4  ;;  %v486_v46 = vadd.f32 %v485_v7, %v484_v49  ;;  %v570_v27 = vadd.f32 %v569_v10, %v568_v59 }
 0x157   :  { %2657 = vmatpush1.bf16.msra.mxu0 %v5971_v61  ;;  %2780 = vmatpush1.bf16.msra.mxu1 %v5974_v3  ;;  %v759_v4 = vsel %vm720_vm3, %v539_v19, %v758_v2  ;;  %v401_v57 = vrot.slane %v400_v14, 4  ;;  %v5983_v61 = vld [vmem:[#allocation6 + $0x6f0] ss:$24 sps:$4 sm:$0xff]   ;;  %v527_v0 = vrot.slane %v526_v43, 4  ;;  %v444_v38 = vadd.f32 %v443_v26, %v442_v53  ;;  %v6003_v26 = vld [vmem:[#allocation6 + $0x784] ss:$24 sps:$4 sm:$0xff]  }
 0x158   :  { %2658 = vmatprep.subr.bf16.mxu0 %v5979_v40  ;;  %2781 = vmatprep.subr.bf16.mxu1 %v5982_v50  ;;  %v760_v12 = vsel %vm722_vm4, %v581_v5, %v759_v4  ;;  %v360_v56 = vadd.f32 %v359_v9, %v358_v60  ;;  %v487_v44 = vrot.slane %v486_v46, 2  ;;  %v7571_v36 = vunpack.c.l.bf16 %v7359_v24  ;;  %v5995_v53 = vld [vmem:[#allocation6 + $0x750] ss:$24 sps:$4 sm:$0xff]  }
 0x159   :  { %v761_v51 = vsel %vm724_vm5, %v623_v35, %v760_v12  ;;  %v402_v45 = vadd.f32 %v401_v57, %v400_v14  ;;  %v528_v17 = vadd.f32 %v527_v0, %v526_v43  ;;  %v445_v40 = vrot.slane %v444_v38, 2  ;;  %v6001_v12 = vld [vmem:[#allocation6 + $0x780] ss:$24 sps:$4 sm:$0xff]  }
 0x15a   :  { %v762_v33 = vsel %vm726_vm6, %v665_v20, %v761_v51  ;;  %v361_v3 = vrot.slane %v360_v56, 2  ;;  %v7572_v1 = vunpack.c.l.bf16 %v7365_v28  ;;  %v488_v20 = vadd.f32 %v487_v44, %v486_v46  ;;  %v6004_v0 = vld [vmem:[#allocation6 + $0x788] ss:$24 sps:$4 sm:$0xff]  }
 0x15b   :  { %2659 = vmatpush1.bf16.msra.mxu0 %v5977_v21  ;;  %2782 = vmatpush1.bf16.msra.mxu1 %v5980_v32  ;;  %v795_v42 = vmul.f32 0.125, %v762_v33  ;;  %v403_v55 = vrot.slane %v402_v45, 2  ;;  %v529_v50 = vrot.slane %v528_v17, 2  ;;  %v446_v5 = vadd.f32 %v445_v40, %v444_v38  ;;  %v6000_v32 = vld [vmem:[#allocation6 + $0x75c] ss:$24 sps:$4 sm:$0xff]  }
 0x15c   :  { %2660 = vmatprep.subr.bf16.mxu0 %v5985_v34  ;;  %2783 = vmatprep.subr.bf16.mxu1 %v5988_v58  ;;  %v362_v47 = vadd.f32 %v361_v3, %v360_v56  ;;  %v610_v15 = vadd.f32 %v7572_v1, %v7571_v36  ;;  %v571_v21 = vrot.slane %v570_v27, 2  ;;  %v7573_v8 = vunpack.c.l.bf16 %v7367_v29  ;;  %v6012_v38 = vld [vmem:[#allocation6 + $0x7bc] ss:$24 sps:$4 sm:$0xff]   ;;  %v6010_v33 = vld [vmem:[#allocation6 + $0x7b8] ss:$24 sps:$4 sm:$0xff]  }
 0x15d   :  { %801 = vst [vmem:[#allocation20 + $0x28] sm:$0xff] %v795_v42  ;;  %v7427_v16 = vpack.c.bf16 %v795_v42, %v795_v42  ;;  %v404_v19 = vadd.f32 %v403_v55, %v402_v45  ;;  %v530_v22 = vadd.f32 %v529_v50, %v528_v17  ;;  %v447_v60 = vrot.slane %v446_v5, 1  ;;  %v6015_v42 = vld [vmem:[#allocation6 + $0x7e4] ss:$24 sps:$4 sm:$0xff]   ;;  %v6021_v50 = vld [vmem:[#allocation6 + $0x814] ss:$24 sps:$4 sm:$0xff]  }
 0x15e   :  { %v363_v35 = vrot.slane %v362_v47, 1  ;;  %v611_v24 = vrot.slane %v610_v15, 4  ;;  %v572_v34 = vadd.f32 %v571_v21, %v570_v27  ;;  %v652_v14 = vadd.f32 %v328_v6, %v7573_v8  ;;  %v6018_v55 = vld [vmem:[#allocation6 + $0x7ec] ss:$24 sps:$4 sm:$0xff]   ;;  %v6024_v36 = vld [vmem:[#allocation6 + $0x81c] ss:$24 sps:$4 sm:$0xff]  }
 0x15f   :  { %2661 = vmatpush1.bf16.msra.mxu0 %v5983_v61  ;;  %2784 = vmatpush1.bf16.msra.mxu1 %v5986_v63  ;;  %v405_v28 = vrot.slane %v404_v19, 1  ;;  %v489_v2 = vrot.slane %v488_v20, 1  ;;  %v531_v9 = vrot.slane %v530_v22, 1  ;;  %v448_v43 = vadd.f32 %v447_v60, %v446_v5  ;;  %v6009_v63 = vld [vmem:[#allocation6 + $0x7b4] ss:$24 sps:$4 sm:$0xff]  }
 0x160   :  { %2662 = vmatprep.subr.bf16.mxu0 %v5991_v23  ;;  %2785 = vmatprep.subr.bf16.mxu1 %v5994_v37  ;;  %v364_v58 = vadd.f32 %v363_v35, %v362_v47  ;;  %v612_v49 = vadd.f32 %v611_v24, %v610_v15  ;;  %v573_v4 = vrot.slane %v572_v34, 1  ;;  %v653_v57 = vrot.slane %v652_v14, 4  ;;  %v6007_v37 = vld [vmem:[#allocation6 + $0x7b0] ss:$24 sps:$4 sm:$0xff]   ;;  %v6030_v5 = vld [vmem:[#allocation6 + $0x84c] ss:$24 sps:$4 sm:$0xff]  }
 0x161   :  { %2682 = vmatprep.mubr.bf16.mxu0 %v7427_v16  ;;  %2805 = vmatprep.mubr.bf16.mxu1 %v7427_v16  ;;  %v406_v48 = vadd.f32 %v405_v28, %v404_v19  ;;  %v490_v29 = vadd.f32 %v489_v2, %v488_v20  ;;  %v532_v25 = vadd.f32 %v531_v9, %v530_v22  ;;  %v6016_v47 = vld [vmem:[#allocation6 + $0x7e8] ss:$24 sps:$4 sm:$0xff]   ;;  %v6027_v19 = vld [vmem:[#allocation6 + $0x844] ss:$24 sps:$4 sm:$0xff]   ;;  %v6033_v35 = vld [vmem:[#allocation6 + $0x874] ss:$24 sps:$4 sm:$0xff]  }
 0x162   :  { %v613_v30 = vrot.slane %v612_v49, 2  ;;  %v574_v6 = vadd.f32 %v573_v4, %v572_v34  ;;  %v654_v59 = vadd.f32 %v653_v57, %v652_v14  ;;  %v6025_v21 = vld [vmem:[#allocation6 + $0x840] ss:$24 sps:$4 sm:$0xff]   ;;  %v6036_v20 = vld [vmem:[#allocation6 + $0x87c] ss:$24 sps:$4 sm:$0xff]  }
 0x163   :  { %2663 = vmatpush1.bf16.msra.mxu0 %v5989_v52  ;;  %2786 = vmatpush1.bf16.msra.mxu1 %v5992_v54  ;;  %v749_v61 = vsel %vm714_vm0, %v406_v48, %v364_v58  ;;  %v6013_v52 = vld [vmem:[#allocation6 + $0x7e0] ss:$24 sps:$4 sm:$0xff]   ;;  %v6019_v54 = vld [vmem:[#allocation6 + $0x810] ss:$24 sps:$4 sm:$0xff]   ;;  %v6039_v28 = vld [vmem:[#allocation6 + $0x8a4] ss:$24 sps:$4 sm:$0xff]  }
 0x164   :  { %2664 = vmatprep.subr.bf16.mxu0 %v5997_v18  ;;  %2787 = vmatprep.subr.bf16.mxu1 %v6000_v32  ;;  %v614_v56 = vadd.f32 %v613_v30, %v612_v49  ;;  %v750_v7 = vsel %vm716_vm1, %v448_v43, %v749_v61  ;;  %v655_v51 = vrot.slane %v654_v59, 2  ;;  %v6022_v18 = vld [vmem:[#allocation6 + $0x818] ss:$24 sps:$4 sm:$0xff]   ;;  %v6028_v32 = vld [vmem:[#allocation6 + $0x848] ss:$24 sps:$4 sm:$0xff]  }
 0x165   :  { %v751_v45 = vsel %vm718_vm2, %v490_v29, %v750_v7  ;;  %v6031_v22 = vld [vmem:[#allocation6 + $0x870] ss:$24 sps:$4 sm:$0xff]   ;;  %v6042_v60 = vld [vmem:[#allocation6 + $0x8ac] ss:$24 sps:$4 sm:$0xff]   ;;  %v6037_v34 = vld [vmem:[#allocation6 + $0x8a0] ss:$24 sps:$4 sm:$0xff]  }
 0x166   :  { %v615_v10 = vrot.slane %v614_v56, 1  ;;  %v752_v23 = vsel %vm720_vm3, %v532_v25, %v751_v45  ;;  %v656_v3 = vadd.f32 %v655_v51, %v654_v59  ;;  %v6034_v24 = vld [vmem:[#allocation6 + $0x878] ss:$24 sps:$4 sm:$0xff]   ;;  %v6040_v8 = vld [vmem:[#allocation6 + $0x8a8] ss:$24 sps:$4 sm:$0xff]  }
 0x167   :  { %2665 = vmatpush1.bf16.msra.mxu0 %v5995_v53  ;;  %2788 = vmatpush1.bf16.msra.mxu1 %v5998_v11  ;;  %v753_v46 = vsel %vm722_vm4, %v574_v6, %v752_v23  ;;  %v6045_v14 = vld [vmem:[#allocation6 + $0x8d4] ss:$24 sps:$4 sm:$0xff]   ;;  %v6043_v58 = vld [vmem:[#allocation6 + $0x8d0] ss:$24 sps:$4 sm:$0xff]   ;;  %v6054_v48 = vld [vmem:[#allocation6 + $0x44] ss:$24 sps:$4 sm:$0xff]  }
 0x168   :  { %2666 = vmatprep.subr.bf16.mxu0 %v6003_v26  ;;  %2789 = vmatprep.subr.bf16.mxu1 %v6006_v31  ;;  %v616_v17 = vadd.f32 %v615_v10, %v614_v56  ;;  %v657_v40 = vrot.slane %v656_v3, 1  ;;  %v6048_v53 = vld [vmem:[#allocation6 + $0x8dc] ss:$24 sps:$4 sm:$0xff]   ;;  %v6046_v2 = vld [vmem:[#allocation6 + $0x8d8] ss:$24 sps:$4 sm:$0xff]  }
 0x169   :  { %v6051_v9 = vld [vmem:[#allocation6 + $0x14] ss:$24 sps:$4 sm:$0xff]   ;;  %v6049_v11 = vld [vmem:[#allocation6 + $0x10] ss:$24 sps:$4 sm:$0xff]   ;;  %v6052_v43 = vld [vmem:[#allocation6 + $0x40] ss:$24 sps:$4 sm:$0xff]  }
 0x16a   :  { %v754_v27 = vsel %vm724_vm5, %v616_v17, %v753_v46  ;;  %v658_v44 = vadd.f32 %v657_v40, %v656_v3  ;;  %v6057_v4 = vld [vmem:[#allocation6 + $0x74] ss:$24 sps:$4 sm:$0xff]   ;;  %v6055_v57 = vld [vmem:[#allocation6 + $0x70] ss:$24 sps:$4 sm:$0xff]   ;;  %v6060_v26 = vld [vmem:[#allocation6 + $0xa4] ss:$24 sps:$4 sm:$0xff]  }
 0x16b   :  { %2667 = vmatpush1.bf16.msra.mxu0 %v6001_v12  ;;  %2790 = vmatpush1.bf16.msra.mxu1 %v6004_v0  ;;  %v6058_v31 = vld [vmem:[#allocation6 + $0xa0] ss:$24 sps:$4 sm:$0xff]   ;;  %v6063_v29 = vld [vmem:[#allocation6 + $0xd4] ss:$24 sps:$4 sm:$0xff]   ;;  %v6061_v25 = vld [vmem:[#allocation6 + $0xd0] ss:$24 sps:$4 sm:$0xff]  }
 0x16c   :  { %2668 = vmatprep.subr.bf16.mxu0 %v6009_v63  ;;  %2791 = vmatprep.subr.bf16.mxu1 %v6012_v38  ;;  %v755_v1 = vsel %vm726_vm6, %v658_v44, %v754_v27  ;;  %v6066_v30 = vld [vmem:[#allocation6 + $0x104] ss:$24 sps:$4 sm:$0xff]   ;;  %v6064_v6 = vld [vmem:[#allocation6 + $0x100] ss:$24 sps:$4 sm:$0xff]   ;;  %v6069_v59 = vld [vmem:[#allocation6 + $0x134] ss:$24 sps:$4 sm:$0xff]  }
 0x16d   :  { %v794_v15 = vmul.f32 0.125, %v755_v1  ;;  %v6067_v61 = vld [vmem:[#allocation6 + $0x130] ss:$24 sps:$4 sm:$0xff]   ;;  %v6070_v12 = vld [vmem:[#allocation6 + $0x160] ss:$24 sps:$4 sm:$0xff]  }
 0x16e   :  { %v6166_v56 = vld [vmem:[#allocation9] ss:$16 sps:$4 sm:$0xff]   ;;  %v6168_v7 = vld [vmem:[#allocation9 + $0x4] ss:$16 sps:$4 sm:$0xff]  }
 0x16f   :  { %2669 = vmatpush1.bf16.msra.mxu0 %v6007_v37  ;;  %2792 = vmatpush1.bf16.msra.mxu1 %v6010_v33  ;;  %800 = vst [vmem:[#allocation20 + $0x20] sm:$0xff] %v794_v15  ;;  %v7442_v49 = vpack.c.bf16 %v794_v15, %v794_v15  ;;  %v6075_v0 = vld [vmem:[#allocation6 + $0x194] ss:$24 sps:$4 sm:$0xff]   ;;  %v6073_v63 = vld [vmem:[#allocation6 + $0x190] ss:$24 sps:$4 sm:$0xff]  }
 0x170   :  { %2670 = vmatprep.subr.bf16.mxu0 %v6015_v42  ;;  %2793 = vmatprep.subr.bf16.mxu1 %v6018_v55  ;;  %v6172_v51 = vld [vmem:[#allocation9 + $0x20] ss:$16 sps:$4 sm:$0xff]   ;;  %v6174_v45 = vld [vmem:[#allocation9 + $0x24] ss:$16 sps:$4 sm:$0xff]  }
 0x171   :  { %v6078_v38 = vld [vmem:[#allocation6 + $0x1c4] ss:$24 sps:$4 sm:$0xff]   ;;  %v6076_v10 = vld [vmem:[#allocation6 + $0x1c0] ss:$24 sps:$4 sm:$0xff]   ;;  %v6081_v33 = vld [vmem:[#allocation6 + $0x1f4] ss:$24 sps:$4 sm:$0xff]  }
 0x172   :  { %v6178_v23 = vld [vmem:[#allocation9 + $0x40] ss:$16 sps:$4 sm:$0xff]   ;;  %v6180_v37 = vld [vmem:[#allocation9 + $0x44] ss:$16 sps:$4 sm:$0xff]  }
 0x173   :  { %2671 = vmatpush1.bf16.msra.mxu0 %v6013_v52  ;;  %2794 = vmatpush1.bf16.msra.mxu1 %v6016_v47  ;;  %v6079_v3 = vld [vmem:[#allocation6 + $0x1f0] ss:$24 sps:$4 sm:$0xff]   ;;  %v6084_v42 = vld [vmem:[#allocation6 + $0x224] ss:$24 sps:$4 sm:$0xff]   ;;  %v6082_v55 = vld [vmem:[#allocation6 + $0x220] ss:$24 sps:$4 sm:$0xff]  }
 0x174   :  { %2672 = vmatprep.subr.bf16.mxu0 %v6021_v50  ;;  %2795 = vmatprep.subr.bf16.mxu1 %v6024_v36  ;;  %v6184_v46 = vld [vmem:[#allocation9 + $0x60] ss:$16 sps:$4 sm:$0xff]   ;;  %v6186_v17 = vld [vmem:[#allocation9 + $0x64] ss:$16 sps:$4 sm:$0xff]  }
 0x175   :  { %v6190_v40 = vld [vmem:[#allocation9 + $0x80] ss:$16 sps:$4 sm:$0xff]   ;;  %v6192_v27 = vld [vmem:[#allocation9 + $0x84] ss:$16 sps:$4 sm:$0xff]  }
 0x176   :  { %v6087_v52 = vld [vmem:[#allocation6 + $0x254] ss:$24 sps:$4 sm:$0xff]   ;;  %v6085_v47 = vld [vmem:[#allocation6 + $0x250] ss:$24 sps:$4 sm:$0xff]   ;;  %v6090_v36 = vld [vmem:[#allocation6 + $0x284] ss:$24 sps:$4 sm:$0xff]  }
 0x177   :  { %2673 = vmatpush1.bf16.msra.mxu0 %v6019_v54  ;;  %2796 = vmatpush1.bf16.msra.mxu1 %v6022_v18  ;;  %v6196_v44 = vld [vmem:[#allocation9 + $0xa0] ss:$16 sps:$4 sm:$0xff]   ;;  %v6198_v50 = vld [vmem:[#allocation9 + $0xa4] ss:$16 sps:$4 sm:$0xff]  }
 0x178   :  { %2674 = vmatprep.subr.bf16.mxu0 %v6027_v19  ;;  %2797 = vmatprep.subr.bf16.mxu1 %v6030_v5  ;;  %v6088_v1 = vld [vmem:[#allocation6 + $0x280] ss:$24 sps:$4 sm:$0xff]   ;;  %v6093_v18 = vld [vmem:[#allocation6 + $0x2b4] ss:$24 sps:$4 sm:$0xff]   ;;  %v6091_v19 = vld [vmem:[#allocation6 + $0x2b0] ss:$24 sps:$4 sm:$0xff]  }
 0x179   :  { %v6202_v15 = vld [vmem:[#allocation9 + $0xc0] ss:$16 sps:$4 sm:$0xff]   ;;  %v6204_v54 = vld [vmem:[#allocation9 + $0xc4] ss:$16 sps:$4 sm:$0xff]  }
 0x17a   :  { %v6208_v5 = vld [vmem:[#allocation9 + $0xe0] ss:$16 sps:$4 sm:$0xff]  }
 0x17b   :  { %2675 = vmatpush1.bf16.msra.mxu0 %v6025_v21  ;;  %2798 = vmatpush1.bf16.msra.mxu1 %v6028_v32  ;;  %v6210_v21 = vld [vmem:[#allocation9 + $0xe4] ss:$16 sps:$4 sm:$0xff]  }
 0x17c   :  { %2676 = vmatprep.subr.bf16.mxu0 %v6033_v35  ;;  %2799 = vmatprep.subr.bf16.mxu1 %v6036_v20  ;;  %v6096_v32 = vld [vmem:[#allocation6 + $0x2e4] ss:$24 sps:$4 sm:$0xff]   ;;  %v6094_v35 = vld [vmem:[#allocation6 + $0x2e0] ss:$24 sps:$4 sm:$0xff]  }
 0x17d   :  { %v6214_v20 = vld [vmem:[#allocation9 + $0x100] ss:$16 sps:$4 sm:$0xff]  }
 0x17f   :  { %2677 = vmatpush1.bf16.msra.mxu0 %v6031_v22  ;;  %2800 = vmatpush1.bf16.msra.mxu1 %v6034_v24  ;;  %v6216_v22 = vld [vmem:[#allocation9 + $0x104] ss:$16 sps:$4 sm:$0xff]  }
 0x180   :  { %2678 = vmatprep.subr.bf16.mxu0 %v6039_v28  ;;  %2801 = vmatprep.subr.bf16.mxu1 %v6042_v60  ;;  %v6099_v24 = vld [vmem:[#allocation6 + $0x314] ss:$24 sps:$4 sm:$0xff]   ;;  %v6097_v28 = vld [vmem:[#allocation6 + $0x310] ss:$24 sps:$4 sm:$0xff]  }
 0x181   :  { %v6220_v60 = vld [vmem:[#allocation9 + $0x120] ss:$16 sps:$4 sm:$0xff]  }
 0x183   :  { %2679 = vmatpush1.bf16.msra.mxu0 %v6037_v34  ;;  %2802 = vmatpush1.bf16.msra.mxu1 %v6040_v8  ;;  %v6222_v34 = vld [vmem:[#allocation9 + $0x124] ss:$16 sps:$4 sm:$0xff]  }
 0x184   :  { %2680 = vmatprep.subr.bf16.mxu0 %v6045_v14  ;;  %2803 = vmatprep.subr.bf16.mxu1 %v6048_v53  ;;  %v6102_v8 = vld [vmem:[#allocation6 + $0x344] ss:$24 sps:$4 sm:$0xff]   ;;  %v6100_v14 = vld [vmem:[#allocation6 + $0x340] ss:$24 sps:$4 sm:$0xff]  }
 0x185   :  { %v6226_v53 = vld [vmem:[#allocation9 + $0x140] ss:$16 sps:$4 sm:$0xff]  }
 0x187   :  { %2681 = vmatpush1.bf16.msra.mxu0 %v6043_v58  ;;  %2804 = vmatpush1.bf16.msra.mxu1 %v6046_v2  ;;  %v6228_v58 = vld [vmem:[#allocation9 + $0x144] ss:$16 sps:$4 sm:$0xff]  }
 0x188   :  { %2814 = vmatprep.subr.bf16.mxu0 %v6051_v9  ;;  %4123 = vmatprep.subr.bf16.mxu1 %v6168_v7  ;;  %v6105_v2 = vld [vmem:[#allocation6 + $0x374] ss:$24 sps:$4 sm:$0xff]   ;;  %v6103_v9 = vld [vmem:[#allocation6 + $0x370] ss:$24 sps:$4 sm:$0xff]  }
 0x189   :  { %v6256_v7 = vld [vmem:[#allocation9 + $0x1e0] ss:$16 sps:$4 sm:$0xff]  }
 0x18a   :  { %2683 = vmatmul.mubr.bf16.vlgmr.msra.gmra.mrb[0].mxu0 %v7442_v49  ;;  %2806 = vmatmul.mubr.bf16.vlgmr.msra.gmra.mrb[0].mxu1 %v7442_v49 }
 0x18b   :  { %2815 = vmatpush1.bf16.msra.mxu0 %v6049_v11  ;;  %2846 = vmatprep.mubr.bf16.mxu0 %v7195_v62  ;;  %v6072_v62 = vld [vmem:[#allocation6 + $0x164] ss:$24 sps:$4 sm:$0xff]  }
 0x18c   :  { %2816 = vmatprep.subr.bf16.mxu0 %v6054_v48  ;;  %4124 = vmatpush1.bf16.msra.mxu1 %v6166_v56  ;;  %v6232_v11 = vld [vmem:[#allocation9 + $0x160] ss:$16 sps:$4 sm:$0xff]   ;;  %v6234_v48 = vld [vmem:[#allocation9 + $0x164] ss:$16 sps:$4 sm:$0xff]  }
 0x18d   :  { %4125 = vmatprep.subr.bf16.mxu1 %v6174_v45  ;;  %v6120_v56 = vld [vmem:[#allocation6 + $0x464] ss:$24 sps:$4 sm:$0xff]   ;;  %v6121_v45 = vld [vmem:[#allocation6 + $0x490] ss:$24 sps:$4 sm:$0xff]  }
 0x18f   :  { %2817 = vmatpush1.bf16.msra.mxu0 %v6052_v43  ;;  %v6108_v43 = vld [vmem:[#allocation6 + $0x3a4] ss:$24 sps:$4 sm:$0xff]  }
 0x190   :  { %2818 = vmatprep.subr.bf16.mxu0 %v6057_v4  ;;  %4126 = vmatpush1.bf16.msra.mxu1 %v6172_v51  ;;  %v6238_v4 = vld [vmem:[#allocation9 + $0x180] ss:$16 sps:$4 sm:$0xff]  }
 0x191   :  { %4127 = vmatprep.subr.bf16.mxu1 %v6180_v37  ;;  %v6123_v51 = vld [vmem:[#allocation6 + $0x494] ss:$24 sps:$4 sm:$0xff]   ;;  %v6127_v37 = vld [vmem:[#allocation6 + $0x4f0] ss:$24 sps:$4 sm:$0xff]  }
 0x193   :  { %2819 = vmatpush1.bf16.msra.mxu0 %v6055_v57  ;;  %v6240_v57 = vld [vmem:[#allocation9 + $0x184] ss:$16 sps:$4 sm:$0xff]  }
 0x194   :  { %2820 = vmatprep.subr.bf16.mxu0 %v6060_v26  ;;  %4128 = vmatpush1.bf16.msra.mxu1 %v6178_v23  ;;  %v6109_v26 = vld [vmem:[#allocation6 + $0x3d0] ss:$24 sps:$4 sm:$0xff]   ;;  %v6129_v23 = vld [vmem:[#allocation6 + $0x4f4] ss:$24 sps:$4 sm:$0xff]  }
 0x195   :  { %4129 = vmatprep.subr.bf16.mxu1 %v6186_v17  ;;  %v6133_v17 = vld [vmem:[#allocation6 + $0x550] ss:$24 sps:$4 sm:$0xff]  }
 0x197   :  { %2821 = vmatpush1.bf16.msra.mxu0 %v6058_v31  ;;  %v6244_v31 = vld [vmem:[#allocation9 + $0x1a0] ss:$16 sps:$4 sm:$0xff]  }
 0x198   :  { %2822 = vmatprep.subr.bf16.mxu0 %v6063_v29  ;;  %4130 = vmatpush1.bf16.msra.mxu1 %v6184_v46  ;;  %v6246_v29 = vld [vmem:[#allocation9 + $0x1a4] ss:$16 sps:$4 sm:$0xff]  }
 0x199   :  { %4131 = vmatprep.subr.bf16.mxu1 %v6192_v27  ;;  %v6135_v46 = vld [vmem:[#allocation6 + $0x554] ss:$24 sps:$4 sm:$0xff]   ;;  %v6139_v27 = vld [vmem:[#allocation6 + $0x5b0] ss:$24 sps:$4 sm:$0xff]  }
 0x19b   :  { %2823 = vmatpush1.bf16.msra.mxu0 %v6061_v25  ;;  %v6114_v25 = vld [vmem:[#allocation6 + $0x404] ss:$24 sps:$4 sm:$0xff]  }
 0x19c   :  { %2824 = vmatprep.subr.bf16.mxu0 %v6066_v30  ;;  %4132 = vmatpush1.bf16.msra.mxu1 %v6190_v40  ;;  %v6112_v30 = vld [vmem:[#allocation6 + $0x400] ss:$24 sps:$4 sm:$0xff]   ;;  %v6141_v40 = vld [vmem:[#allocation6 + $0x5b4] ss:$24 sps:$4 sm:$0xff]  }
 0x19d   :  { %4133 = vmatprep.subr.bf16.mxu1 %v6198_v50  ;;  %v6145_v50 = vld [vmem:[#allocation6 + $0x610] ss:$24 sps:$4 sm:$0xff]  }
 0x19f   :  { %2825 = vmatpush1.bf16.msra.mxu0 %v6064_v6  ;;  %v6252_v6 = vld [vmem:[#allocation9 + $0x1c4] ss:$16 sps:$4 sm:$0xff]  }
 0x1a0   :  { %2826 = vmatprep.subr.bf16.mxu0 %v6069_v59  ;;  %4134 = vmatpush1.bf16.msra.mxu1 %v6196_v44  ;;  %v6117_v59 = vld [vmem:[#allocation6 + $0x434] ss:$24 sps:$4 sm:$0xff]  }
 0x1a1   :  { %4135 = vmatprep.subr.bf16.mxu1 %v6204_v54  ;;  %v6147_v44 = vld [vmem:[#allocation6 + $0x614] ss:$24 sps:$4 sm:$0xff]   ;;  %v6151_v54 = vld [vmem:[#allocation6 + $0x670] ss:$24 sps:$4 sm:$0xff]  }
 0x1a3   :  { %2827 = vmatpush1.bf16.msra.mxu0 %v6067_v61  ;;  %v6250_v61 = vld [vmem:[#allocation9 + $0x1c0] ss:$16 sps:$4 sm:$0xff]  }
 0x1a4   :  { %2828 = vmatprep.subr.bf16.mxu0 %v6072_v62  ;;  %4136 = vmatpush1.bf16.msra.mxu1 %v6202_v15  ;;  %v6115_v62 = vld [vmem:[#allocation6 + $0x430] ss:$24 sps:$4 sm:$0xff]   ;;  %v6153_v15 = vld [vmem:[#allocation6 + $0x674] ss:$24 sps:$4 sm:$0xff]  }
 0x1a5   :  { %4137 = vmatprep.subr.bf16.mxu1 %v6210_v21  ;;  %v6157_v21 = vld [vmem:[#allocation6 + $0x6d0] ss:$24 sps:$4 sm:$0xff]  }
 0x1a7   :  { %2829 = vmatpush1.bf16.msra.mxu0 %v6070_v12  ;;  %v6258_v12 = vld [vmem:[#allocation9 + $0x1e4] ss:$16 sps:$4 sm:$0xff]  }
 0x1a8   :  { %2830 = vmatprep.subr.bf16.mxu0 %v6075_v0  ;;  %4138 = vmatpush1.bf16.msra.mxu1 %v6208_v5  ;;  %v6118_v0 = vld [vmem:[#allocation6 + $0x460] ss:$24 sps:$4 sm:$0xff]   ;;  %v6159_v5 = vld [vmem:[#allocation6 + $0x6d4] ss:$24 sps:$4 sm:$0xff]  }
 0x1a9   :  { %4139 = vmatprep.subr.bf16.mxu1 %v6216_v22  ;;  %v6169_v22 = vld [vmem:[#allocation6 + $0x760] ss:$24 sps:$4 sm:$0xff]  }
 0x1ab   :  { %2831 = vmatpush1.bf16.msra.mxu0 %v6073_v63  ;;  %v6264_v63 = vld [vmem:[#allocation9 + $0x204] ss:$16 sps:$4 sm:$0xff]  }
 0x1ac   :  { %2832 = vmatprep.subr.bf16.mxu0 %v6078_v38  ;;  %4140 = vmatpush1.bf16.msra.mxu1 %v6214_v20  ;;  %v6126_v38 = vld [vmem:[#allocation6 + $0x4c4] ss:$24 sps:$4 sm:$0xff]  }
 0x1ad   :  { %4141 = vmatprep.subr.bf16.mxu1 %v6222_v34  ;;  %v6171_v20 = vld [vmem:[#allocation6 + $0x764] ss:$24 sps:$4 sm:$0xff]   ;;  %v6181_v34 = vld [vmem:[#allocation6 + $0x7c0] ss:$24 sps:$4 sm:$0xff]  }
 0x1af   :  { %2833 = vmatpush1.bf16.msra.mxu0 %v6076_v10  ;;  %v6124_v10 = vld [vmem:[#allocation6 + $0x4c0] ss:$24 sps:$4 sm:$0xff]  }
 0x1b0   :  { %2834 = vmatprep.subr.bf16.mxu0 %v6081_v33  ;;  %4142 = vmatpush1.bf16.msra.mxu1 %v6220_v60  ;;  %v6132_v33 = vld [vmem:[#allocation6 + $0x524] ss:$24 sps:$4 sm:$0xff]  }
 0x1b1   :  { %4143 = vmatprep.subr.bf16.mxu1 %v6228_v58  ;;  %v6183_v60 = vld [vmem:[#allocation6 + $0x7c4] ss:$24 sps:$4 sm:$0xff]   ;;  %v6193_v58 = vld [vmem:[#allocation6 + $0x820] ss:$24 sps:$4 sm:$0xff]  }
 0x1b3   :  { %2835 = vmatpush1.bf16.msra.mxu0 %v6079_v3  ;;  %v6130_v3 = vld [vmem:[#allocation6 + $0x520] ss:$24 sps:$4 sm:$0xff]  }
 0x1b4   :  { %2836 = vmatprep.subr.bf16.mxu0 %v6084_v42  ;;  %4144 = vmatpush1.bf16.msra.mxu1 %v6226_v53  ;;  %v6138_v42 = vld [vmem:[#allocation6 + $0x584] ss:$24 sps:$4 sm:$0xff]  }
 0x1b5   :  { %4145 = vmatprep.subr.bf16.mxu1 %v6234_v48  ;;  %v6195_v53 = vld [vmem:[#allocation6 + $0x824] ss:$24 sps:$4 sm:$0xff]   ;;  %v6205_v48 = vld [vmem:[#allocation6 + $0x880] ss:$24 sps:$4 sm:$0xff]  }
 0x1b7   :  { %2837 = vmatpush1.bf16.msra.mxu0 %v6082_v55  ;;  %v6136_v55 = vld [vmem:[#allocation6 + $0x580] ss:$24 sps:$4 sm:$0xff]  }
 0x1b8   :  { %2838 = vmatprep.subr.bf16.mxu0 %v6087_v52  ;;  %4146 = vmatpush1.bf16.msra.mxu1 %v6232_v11  ;;  %v6144_v52 = vld [vmem:[#allocation6 + $0x5e4] ss:$24 sps:$4 sm:$0xff]  }
 0x1b9   :  { %4147 = vmatprep.subr.bf16.mxu1 %v6240_v57  ;;  %v6207_v11 = vld [vmem:[#allocation6 + $0x884] ss:$24 sps:$4 sm:$0xff]   ;;  %v6217_v57 = vld [vmem:[#allocation6 + $0x8e0] ss:$24 sps:$4 sm:$0xff]  }
 0x1bb   :  { %2839 = vmatpush1.bf16.msra.mxu0 %v6085_v47  ;;  %v6142_v47 = vld [vmem:[#allocation6 + $0x5e0] ss:$24 sps:$4 sm:$0xff]  }
 0x1bc   :  { %2840 = vmatprep.subr.bf16.mxu0 %v6090_v36  ;;  %4148 = vmatpush1.bf16.msra.mxu1 %v6238_v4  ;;  %v6150_v36 = vld [vmem:[#allocation6 + $0x644] ss:$24 sps:$4 sm:$0xff]  }
 0x1bd   :  { %4149 = vmatprep.subr.bf16.mxu1 %v6246_v29  ;;  %v6219_v4 = vld [vmem:[#allocation6 + $0x8e4] ss:$24 sps:$4 sm:$0xff]  }
 0x1be   :  { %v6229_v29 = vld [vmem:[#allocation9 + $0x28] ss:$16 sps:$4 sm:$0xff]  }
 0x1bf   :  { %2841 = vmatpush1.bf16.msra.mxu0 %v6088_v1  ;;  %v6148_v1 = vld [vmem:[#allocation6 + $0x640] ss:$24 sps:$4 sm:$0xff]  }
 0x1c0   :  { %2842 = vmatprep.subr.bf16.mxu0 %v6093_v18  ;;  %4150 = vmatpush1.bf16.msra.mxu1 %v6244_v31  ;;  %v6156_v18 = vld [vmem:[#allocation6 + $0x6a4] ss:$24 sps:$4 sm:$0xff]  }
 0x1c1   :  { %4151 = vmatprep.subr.bf16.mxu1 %v6252_v6  ;;  %v6231_v31 = vld [vmem:[#allocation9 + $0x2c] ss:$16 sps:$4 sm:$0xff]   ;;  %v6235_v6 = vld [vmem:[#allocation9 + $0x48] ss:$16 sps:$4 sm:$0xff]  }
 0x1c3   :  { %2843 = vmatpush1.bf16.msra.mxu0 %v6091_v19  ;;  %v6154_v19 = vld [vmem:[#allocation6 + $0x6a0] ss:$24 sps:$4 sm:$0xff]  }
 0x1c4   :  { %2844 = vmatprep.subr.bf16.mxu0 %v6096_v32  ;;  %4152 = vmatpush1.bf16.msra.mxu1 %v6250_v61  ;;  %v6162_v32 = vld [vmem:[#allocation6 + $0x704] ss:$24 sps:$4 sm:$0xff]  }
 0x1c5   :  { %4153 = vmatprep.subr.bf16.mxu1 %v6258_v12  ;;  %v6249_v12 = vld [vmem:[#allocation9 + $0x8c] ss:$16 sps:$4 sm:$0xff]  }
 0x1c7   :  { %2845 = vmatpush1.bf16.msra.mxu0 %v6094_v35  ;;  %v6165_v35 = vld [vmem:[#allocation6 + $0x734] ss:$24 sps:$4 sm:$0xff]  }
 0x1c8   :  { %2855 = vmatprep.subr.bf16.mxu0 %v6099_v24  ;;  %4154 = vmatpush1.bf16.msra.mxu1 %v6256_v7  ;;  %v6177_v24 = vld [vmem:[#allocation6 + $0x794] ss:$24 sps:$4 sm:$0xff]   ;;  %v7457_v7 = vld [vmem:[#allocation8] sm:$0x3f] }
 0x1c9   :  { %4164 = vmatprep.subr.bf16.mxu1 %v6264_v63 }
 0x1ca   :  { %2847 = vmatmul.mubr.bf16.vlgmr.msra.gmra.mrb[4].mxu0 %v7206_v13  ;;  %v6106_v13 = vld [vmem:[#allocation6 + $0x3a0] ss:$24 sps:$4 sm:$0xff]  }
 0x1cb   :  { %2856 = vmatpush1.bf16.msra.mxu0 %v6097_v28  ;;  %2887 = vmatprep.mubr.bf16.mxu0 %v7309_v41  ;;  %v6111_v41 = vld [vmem:[#allocation6 + $0x3d4] ss:$24 sps:$4 sm:$0xff]   ;;  %v6175_v28 = vld [vmem:[#allocation6 + $0x790] ss:$24 sps:$4 sm:$0xff]  }
 0x1cc   :  { %2857 = vmatprep.subr.bf16.mxu0 %v6102_v8  ;;  %v6189_v8 = vld [vmem:[#allocation6 + $0x7f4] ss:$24 sps:$4 sm:$0xff]  }
 0x1cf   :  { %2858 = vmatpush1.bf16.msra.mxu0 %v6100_v14  ;;  %v6187_v14 = vld [vmem:[#allocation6 + $0x7f0] ss:$24 sps:$4 sm:$0xff]  }
 0x1d0   :  { %2859 = vmatprep.subr.bf16.mxu0 %v6105_v2  ;;  %v6201_v2 = vld [vmem:[#allocation6 + $0x854] ss:$24 sps:$4 sm:$0xff]  }
 0x1d3   :  { %2860 = vmatpush1.bf16.msra.mxu0 %v6103_v9  ;;  %v6199_v9 = vld [vmem:[#allocation6 + $0x850] ss:$24 sps:$4 sm:$0xff]  }
 0x1d4   :  { %2861 = vmatprep.subr.bf16.mxu0 %v6108_v43  ;;  %v6213_v43 = vld [vmem:[#allocation6 + $0x8b4] ss:$24 sps:$4 sm:$0xff]  }
 0x1d7   :  { %2862 = vmatpush1.bf16.msra.mxu0 %v6106_v13  ;;  %v6211_v13 = vld [vmem:[#allocation6 + $0x8b0] ss:$24 sps:$4 sm:$0xff]  }
 0x1d8   :  { %2863 = vmatprep.subr.bf16.mxu0 %v6111_v41  ;;  %v6225_v41 = vld [vmem:[#allocation9 + $0xc] ss:$16 sps:$4 sm:$0xff]  }
 0x1db   :  { %2864 = vmatpush1.bf16.msra.mxu0 %v6109_v26  ;;  %v6223_v26 = vld [vmem:[#allocation9 + $0x8] ss:$16 sps:$4 sm:$0xff]  }
 0x1dc   :  { %2865 = vmatprep.subr.bf16.mxu0 %v6114_v25  ;;  %v6237_v25 = vld [vmem:[#allocation9 + $0x4c] ss:$16 sps:$4 sm:$0xff]  }
 0x1df   :  { %2866 = vmatpush1.bf16.msra.mxu0 %v6112_v30  ;;  %v1098_v30 = vlaneseq }
 0x1e0   :  { %2867 = vmatprep.subr.bf16.mxu0 %v6117_v59  ;;  %v6243_v59 = vld [vmem:[#allocation9 + $0x6c] ss:$16 sps:$4 sm:$0xff]  }
 0x1e1   :  { %v7452_v61 = vshrl.u32 %v1098_v30, 7  ;;  %v6304_v30 = vld [vmem:[#allocation9 + $0x2e0] ss:$16 sps:$4 sm:$0xff]  }
 0x1e3   :  { %2868 = vmatpush1.bf16.msra.mxu0 %v6115_v62  ;;  %v6241_v62 = vld [vmem:[#allocation9 + $0x68] ss:$16 sps:$4 sm:$0xff]   ;;  %v1112_v63 = vsub.s32 3, %v7452_v61 }
 0x1e4   :  { %2869 = vmatprep.subr.bf16.mxu0 %v6120_v56  ;;  %v7455_v56 = vsub.s32 0, %v7452_v61 }
 0x1e7   :  { %2870 = vmatpush1.bf16.msra.mxu0 %v6118_v0  ;;  %v7460_v0 = vsub.s32 1, %v7452_v61 }
 0x1e8   :  { %2871 = vmatprep.subr.bf16.mxu0 %v6123_v51  ;;  %v6255_v51 = vld [vmem:[#allocation9 + $0xac] ss:$16 sps:$4 sm:$0xff]  }
 0x1eb   :  { %2872 = vmatpush1.bf16.msra.mxu0 %v6121_v45  ;;  %v1101_v45 = vrot.slane %v7457_v7, %v7455_v56 }
 0x1ec   :  { %2873 = vmatprep.subr.bf16.mxu0 %v6126_v38  ;;  %v1105_v38 = vrot.slane %v7457_v7, %v7460_v0 }
 0x1ef   :  { %2874 = vmatpush1.bf16.msra.mxu0 %v6124_v10  ;;  %v1113_v10 = vrot.slane %v7457_v7, %v1112_v63 }
 0x1f0   :  { %2875 = vmatprep.subr.bf16.mxu0 %v6129_v23  ;;  %v6253_v23 = vld [vmem:[#allocation9 + $0xa8] ss:$16 sps:$4 sm:$0xff]  }
 0x1f3   :  { %2876 = vmatpush1.bf16.msra.mxu0 %v6127_v37  ;;  %v6261_v37 = vld [vmem:[#allocation9 + $0xcc] ss:$16 sps:$4 sm:$0xff]  }
 0x1f4   :  { %2877 = vmatprep.subr.bf16.mxu0 %v6132_v33 }
 0x1f7   :  { %2878 = vmatpush1.bf16.msra.mxu0 %v6130_v3 }
 0x1f8   :  { %2879 = vmatprep.subr.bf16.mxu0 %v6135_v46 }
 0x1fb   :  { %2880 = vmatpush1.bf16.msra.mxu0 %v6133_v17 }
 0x1fc   :  { %2881 = vmatprep.subr.bf16.mxu0 %v6138_v42 }
 0x1ff   :  { %2882 = vmatpush1.bf16.msra.mxu0 %v6136_v55 }
 0x200   :  { %2883 = vmatprep.subr.bf16.mxu0 %v6141_v40 }
 0x203   :  { %2884 = vmatpush1.bf16.msra.mxu0 %v6139_v27 }
 0x204   :  { %2885 = vmatprep.subr.bf16.mxu0 %v6144_v52 }
 0x207   :  { %2886 = vmatpush1.bf16.msra.mxu0 %v6142_v47  ;;  %v6259_v47 = vld [vmem:[#allocation9 + $0xc8] ss:$16 sps:$4 sm:$0xff]  }
 0x208   :  { %2896 = vmatprep.subr.bf16.mxu0 %v6147_v44 }
 0x20a   :  { %2888 = vmatmul.mubr.bf16.vlgmr.msra.gmra.mrb[4].mxu0 %v7326_v39  ;;  %v6160_v39 = vld [vmem:[#allocation6 + $0x700] ss:$24 sps:$4 sm:$0xff]  }
 0x20b   :  { %2897 = vmatpush1.bf16.msra.mxu0 %v6145_v50  ;;  %2928 = vmatprep.mubr.bf16.mxu0 %v7427_v16  ;;  %v6163_v16 = vld [vmem:[#allocation6 + $0x730] ss:$24 sps:$4 sm:$0xff]  }
 0x20c   :  { %2898 = vmatprep.subr.bf16.mxu0 %v6150_v36 }
 0x20f   :  { %2899 = vmatpush1.bf16.msra.mxu0 %v6148_v1  ;;  %v6267_v1 = vld [vmem:[#allocation9 + $0xec] ss:$16 sps:$4 sm:$0xff]  }
 0x210   :  { %2900 = vmatprep.subr.bf16.mxu0 %v6153_v15 }
 0x213   :  { %2901 = vmatpush1.bf16.msra.mxu0 %v6151_v54 }
 0x214   :  { %2902 = vmatprep.subr.bf16.mxu0 %v6156_v18 }
 0x217   :  { %2903 = vmatpush1.bf16.msra.mxu0 %v6154_v19 }
 0x218   :  { %2904 = vmatprep.subr.bf16.mxu0 %v6159_v5  ;;  %v6262_v5 = vld [vmem:[#allocation9 + $0x200] ss:$16 sps:$4 sm:$0xff]  }
 0x21b   :  { %2905 = vmatpush1.bf16.msra.mxu0 %v6157_v21 }
 0x21c   :  { %2906 = vmatprep.subr.bf16.mxu0 %v6162_v32  ;;  %v6265_v32 = vld [vmem:[#allocation9 + $0xe8] ss:$16 sps:$4 sm:$0xff]  }
 0x21f   :  { %2907 = vmatpush1.bf16.msra.mxu0 %v6160_v39  ;;  %v6270_v39 = vld [vmem:[#allocation9 + $0x224] ss:$16 sps:$4 sm:$0xff]  }
 0x220   :  { %2908 = vmatprep.subr.bf16.mxu0 %v6165_v35  ;;  %v6273_v35 = vld [vmem:[#allocation9 + $0x10c] ss:$16 sps:$4 sm:$0xff]  }
 0x223   :  { %2909 = vmatpush1.bf16.msra.mxu0 %v6163_v16  ;;  %v6268_v16 = vld [vmem:[#allocation9 + $0x220] ss:$16 sps:$4 sm:$0xff]  }
 0x224   :  { %2910 = vmatprep.subr.bf16.mxu0 %v6171_v20  ;;  %v6271_v20 = vld [vmem:[#allocation9 + $0x108] ss:$16 sps:$4 sm:$0xff]  }
 0x227   :  { %2911 = vmatpush1.bf16.msra.mxu0 %v6169_v22  ;;  %v6276_v22 = vld [vmem:[#allocation9 + $0x244] ss:$16 sps:$4 sm:$0xff]  }
 0x228   :  { %2912 = vmatprep.subr.bf16.mxu0 %v6177_v24  ;;  %v6279_v24 = vld [vmem:[#allocation9 + $0x12c] ss:$16 sps:$4 sm:$0xff]  }
 0x22b   :  { %2913 = vmatpush1.bf16.msra.mxu0 %v6175_v28  ;;  %v6274_v28 = vld [vmem:[#allocation9 + $0x240] ss:$16 sps:$4 sm:$0xff]  }
 0x22c   :  { %2914 = vmatprep.subr.bf16.mxu0 %v6183_v60  ;;  %v6277_v60 = vld [vmem:[#allocation9 + $0x128] ss:$16 sps:$4 sm:$0xff]  }
 0x22f   :  { %2915 = vmatpush1.bf16.msra.mxu0 %v6181_v34  ;;  %v6282_v34 = vld [vmem:[#allocation9 + $0x264] ss:$16 sps:$4 sm:$0xff]  }
 0x230   :  { %2916 = vmatprep.subr.bf16.mxu0 %v6189_v8  ;;  %v6285_v8 = vld [vmem:[#allocation9 + $0x14c] ss:$16 sps:$4 sm:$0xff]  }
 0x233   :  { %2917 = vmatpush1.bf16.msra.mxu0 %v6187_v14  ;;  %v6280_v14 = vld [vmem:[#allocation9 + $0x260] ss:$16 sps:$4 sm:$0xff]  }
 0x234   :  { %2918 = vmatprep.subr.bf16.mxu0 %v6195_v53  ;;  %v6283_v53 = vld [vmem:[#allocation9 + $0x148] ss:$16 sps:$4 sm:$0xff]  }
 0x237   :  { %2919 = vmatpush1.bf16.msra.mxu0 %v6193_v58  ;;  %v6288_v58 = vld [vmem:[#allocation9 + $0x284] ss:$16 sps:$4 sm:$0xff]  }
 0x238   :  { %2920 = vmatprep.subr.bf16.mxu0 %v6201_v2  ;;  %v6291_v2 = vld [vmem:[#allocation9 + $0x16c] ss:$16 sps:$4 sm:$0xff]  }
 0x23b   :  { %2921 = vmatpush1.bf16.msra.mxu0 %v6199_v9  ;;  %v6286_v9 = vld [vmem:[#allocation9 + $0x280] ss:$16 sps:$4 sm:$0xff]  }
 0x23c   :  { %2922 = vmatprep.subr.bf16.mxu0 %v6207_v11  ;;  %v6289_v11 = vld [vmem:[#allocation9 + $0x168] ss:$16 sps:$4 sm:$0xff]  }
 0x23f   :  { %2923 = vmatpush1.bf16.msra.mxu0 %v6205_v48  ;;  %v6294_v48 = vld [vmem:[#allocation9 + $0x2a4] ss:$16 sps:$4 sm:$0xff]  }
 0x240   :  { %2924 = vmatprep.subr.bf16.mxu0 %v6213_v43  ;;  %v6297_v43 = vld [vmem:[#allocation9 + $0x18c] ss:$16 sps:$4 sm:$0xff]  }
 0x243   :  { %2925 = vmatpush1.bf16.msra.mxu0 %v6211_v13  ;;  %v6292_v13 = vld [vmem:[#allocation9 + $0x2a0] ss:$16 sps:$4 sm:$0xff]  }
 0x244   :  { %2926 = vmatprep.subr.bf16.mxu0 %v6219_v4  ;;  %v6295_v4 = vld [vmem:[#allocation9 + $0x188] ss:$16 sps:$4 sm:$0xff]  }
 0x247   :  { %2927 = vmatpush1.bf16.msra.mxu0 %v6217_v57  ;;  %v6300_v57 = vld [vmem:[#allocation9 + $0x2c4] ss:$16 sps:$4 sm:$0xff]  }
 0x248   :  { %4246 = vmatprep.subr.bf16.mxu0 %v6225_v41  ;;  %v6303_v41 = vld [vmem:[#allocation9 + $0x1ac] ss:$16 sps:$4 sm:$0xff]  }
 0x24a   :  { %2929 = vmatmul.mubr.bf16.vlgmr.msra.gmra.mrb[4].mxu0 %v7442_v49  ;;  %v6247_v49 = vld [vmem:[#allocation9 + $0x88] ss:$16 sps:$4 sm:$0xff]  }
 0x24b   :  { %4247 = vmatpush1.bf16.msra.mxu0 %v6223_v26  ;;  %v6298_v26 = vld [vmem:[#allocation9 + $0x2c0] ss:$16 sps:$4 sm:$0xff]  }
 0x24c   :  { %4248 = vmatprep.subr.bf16.mxu0 %v6231_v31  ;;  %v6301_v31 = vld [vmem:[#allocation9 + $0x1a8] ss:$16 sps:$4 sm:$0xff]  }
 0x24f   :  { %4249 = vmatpush1.bf16.msra.mxu0 %v6229_v29  ;;  %v6306_v29 = vld [vmem:[#allocation9 + $0x2e4] ss:$16 sps:$4 sm:$0xff]  }
 0x250   :  { %4250 = vmatprep.subr.bf16.mxu0 %v6237_v25  ;;  %v6309_v25 = vld [vmem:[#allocation9 + $0x1cc] ss:$16 sps:$4 sm:$0xff]  }
 0x253   :  { %4251 = vmatpush1.bf16.msra.mxu0 %v6235_v6  ;;  %v6307_v6 = vld [vmem:[#allocation9 + $0x1c8] ss:$16 sps:$4 sm:$0xff]  }
 0x254   :  { %4252 = vmatprep.subr.bf16.mxu0 %v6243_v59  ;;  %v6312_v59 = vld [vmem:[#allocation9 + $0x304] ss:$16 sps:$4 sm:$0xff]  }
 0x257   :  { %4253 = vmatpush1.bf16.msra.mxu0 %v6241_v62  ;;  %v6315_v62 = vld [vmem:[#allocation9 + $0x1ec] ss:$16 sps:$4 sm:$0xff]  }
 0x258   :  { %4254 = vmatprep.subr.bf16.mxu0 %v6249_v12  ;;  %v6310_v12 = vld [vmem:[#allocation9 + $0x300] ss:$16 sps:$4 sm:$0xff]  }
 0x25b   :  { %4255 = vmatpush1.bf16.msra.mxu0 %v6247_v49  ;;  %v6313_v49 = vld [vmem:[#allocation9 + $0x1e8] ss:$16 sps:$4 sm:$0xff]  }
 0x25c   :  { %4256 = vmatprep.subr.bf16.mxu0 %v6255_v51  ;;  %v6318_v51 = vld [vmem:[#allocation9 + $0x324] ss:$16 sps:$4 sm:$0xff]  }
 0x25d   :  { %v2684_v33 = vpop.f32.mrb[0].mxu0  ;;  %v7470_v3 = vpop.f32.mrb[0].mxu1 }
 0x25e   :  { %v5684_v46 = vadd.f32 %v2684_v33, %v1101_v45  ;;  %v2686_v17 = vpop.f32.mrb[1].mxu0  ;;  %v2809_v42 = vpop.f32.mrb[1].mxu1  ;;  %v6321_v45 = vld [vmem:[#allocation9 + $0x20c] ss:$16 sps:$4 sm:$0xff]   ;;  %v6322_v33 = vld [vmem:[#allocation9 + $0x340] ss:$16 sps:$4 sm:$0xff]  }
 0x25f   :  { %v5685_v55 = vadd.f32 %v2686_v17, %v1105_v38  ;;  %v5687_v40 = vadd.f32 %v2809_v42, %v1113_v10  ;;  %v2688_v27 = vpop.f32.mrb[2].mxu0  ;;  %v2811_v52 = vpop.f32.mrb[2].mxu1  ;;  %4257 = vmatpush1.bf16.msra.mxu0 %v6253_v23  ;;  %v6316_v38 = vld [vmem:[#allocation9 + $0x320] ss:$16 sps:$4 sm:$0xff]   ;;  %v6319_v10 = vld [vmem:[#allocation9 + $0x208] ss:$16 sps:$4 sm:$0xff]  }
 0x260   :  { %v2937_v44 = vmax.f32 %v5684_v46, 0.0  ;;  %v2689_v50 = vpop.f32.mrb[3].mxu0  ;;  %v2812_v36 = vpop.f32.mrb[3].mxu1  ;;  %4258 = vmatprep.subr.bf16.mxu0 %v6261_v37  ;;  %v6324_v23 = vld [vmem:[#allocation9 + $0x344] ss:$16 sps:$4 sm:$0xff]  }
 0x261   :  { %v2938_v15 = vmax.f32 %v5685_v55, 0.0  ;;  %v2940_v54 = vmax.f32 %v5687_v40, 0.0  ;;  %v6327_v37 = vld [vmem:[#allocation9 + $0x22c] ss:$16 sps:$4 sm:$0xff]   ;;  %v6325_v46 = vld [vmem:[#allocation9 + $0x228] ss:$16 sps:$4 sm:$0xff]  }
 0x262   :  { %v7474_v21 = vpack.c.bf16 %v2937_v44, %v2937_v44  ;;  %v6330_v17 = vld [vmem:[#allocation9 + $0x364] ss:$16 sps:$4 sm:$0xff]   ;;  %v6333_v42 = vld [vmem:[#allocation9 + $0x24c] ss:$16 sps:$4 sm:$0xff]   ;;  %v6328_v55 = vld [vmem:[#allocation9 + $0x360] ss:$16 sps:$4 sm:$0xff]  }
 0x263   :  { %v2944_v18 = vpack.c.bf16 %v2938_v15, %v2938_v15  ;;  %v7472_v19 = vpack.c.bf16 %v2940_v54, %v2940_v54  ;;  %4259 = vmatpush1.bf16.msra.mxu0 %v6259_v47  ;;  %v6331_v40 = vld [vmem:[#allocation9 + $0x248] ss:$16 sps:$4 sm:$0xff]   ;;  %v6336_v27 = vld [vmem:[#allocation9 + $0x384] ss:$16 sps:$4 sm:$0xff]   ;;  %v6339_v52 = vld [vmem:[#allocation9 + $0x26c] ss:$16 sps:$4 sm:$0xff]  }
 0x264   :  { %4260 = vmatprep.subr.bf16.mxu0 %v6267_v1  ;;  %v6334_v47 = vld [vmem:[#allocation9 + $0x380] ss:$16 sps:$4 sm:$0xff]   ;;  %v1108_v44 = vsub.s32 2, %v7452_v61  ;;  %v6337_v50 = vld [vmem:[#allocation9 + $0x268] ss:$16 sps:$4 sm:$0xff]  }
 0x265   :  { %4155 = vmatprep.mubr.bf16.mxu1 %v2944_v18  ;;  %4278 = vmatprep.mubr.bf16.mxu0 %v2944_v18  ;;  %v6342_v36 = vld [vmem:[#allocation9 + $0x3a4] ss:$16 sps:$4 sm:$0xff]   ;;  %v6345_v1 = vld [vmem:[#allocation9 + $0x28c] ss:$16 sps:$4 sm:$0xff]   ;;  %v6340_v15 = vld [vmem:[#allocation9 + $0x3a0] ss:$16 sps:$4 sm:$0xff]  }
 0x266   :  { %4156 = vmatmul.mubr.bf16.vlgmr.msra.gmra.mrb[4].mxu1 %v7474_v21  ;;  %v1109_v54 = vrot.slane %v7457_v7, %v1108_v44  ;;  %v6343_v18 = vld [vmem:[#allocation9 + $0x288] ss:$16 sps:$4 sm:$0xff]  }
 0x267   :  { %4165 = vmatpush1.bf16.msra.mxu1 %v6262_v5  ;;  %4196 = vmatprep.mubr.bf16.mxu1 %v7472_v19  ;;  %v6351_v5 = vld [vmem:[#allocation9 + $0x2ac] ss:$16 sps:$4 sm:$0xff]  }
 0x268   :  { %4261 = vmatpush1.bf16.msra.mxu0 %v6265_v32  ;;  %4166 = vmatprep.subr.bf16.mxu1 %v6270_v39  ;;  %v5686_v32 = vadd.f32 %v7470_v3, %v1109_v54  ;;  %v6349_v39 = vld [vmem:[#allocation9 + $0x2a8] ss:$16 sps:$4 sm:$0xff]   ;;  %v6402_v54 = vld [vmem:[#allocation9 + $0x44c] ss:$16 sps:$4 sm:$0xff]  }
 0x269   :  { %4262 = vmatprep.subr.bf16.mxu0 %v6273_v35  ;;  %v6354_v35 = vld [vmem:[#allocation9 + $0x3e4] ss:$16 sps:$4 sm:$0xff]   ;;  %v6358_v3 = vld [vmem:[#allocation9 + $0x2e8] ss:$16 sps:$4 sm:$0xff]  }
 0x26b   :  { %4167 = vmatpush1.bf16.msra.mxu1 %v6268_v16  ;;  %v6357_v16 = vld [vmem:[#allocation9 + $0x2cc] ss:$16 sps:$4 sm:$0xff]  }
 0x26c   :  { %4263 = vmatpush1.bf16.msra.mxu0 %v6271_v20  ;;  %4168 = vmatprep.subr.bf16.mxu1 %v6276_v22  ;;  %v6352_v20 = vld [vmem:[#allocation9 + $0x3e0] ss:$16 sps:$4 sm:$0xff]   ;;  %v2939_v22 = vmax.f32 %v5686_v32, 0.0 }
 0x26d   :  { %4264 = vmatprep.subr.bf16.mxu0 %v6279_v24  ;;  %v6355_v24 = vld [vmem:[#allocation9 + $0x2c8] ss:$16 sps:$4 sm:$0xff]   ;;  %v6457_v32 = vld [vmem:[#allocation9 + $0x580] ss:$16 sps:$4 sm:$0xff]  }
 0x26f   :  { %4169 = vmatpush1.bf16.msra.mxu1 %v6274_v28  ;;  %v6387_v28 = vld [vmem:[#allocation9 + $0x404] ss:$16 sps:$4 sm:$0xff]  }
 0x270   :  { %4265 = vmatpush1.bf16.msra.mxu0 %v6277_v60  ;;  %4170 = vmatprep.subr.bf16.mxu1 %v6282_v34  ;;  %v6360_v60 = vld [vmem:[#allocation9 + $0x2ec] ss:$16 sps:$4 sm:$0xff]   ;;  %v6385_v34 = vld [vmem:[#allocation9 + $0x400] ss:$16 sps:$4 sm:$0xff]  }
 0x271   :  { %4266 = vmatprep.subr.bf16.mxu0 %v6285_v8  ;;  %v7485_v8 = vpack.c.bf16 %v2939_v22, %v2939_v22  ;;  %v6412_v22 = vld [vmem:[#allocation9 + $0x488] ss:$16 sps:$4 sm:$0xff]  }
 0x273   :  { %4171 = vmatpush1.bf16.msra.mxu1 %v6280_v14  ;;  %v6393_v14 = vld [vmem:[#allocation9 + $0x424] ss:$16 sps:$4 sm:$0xff]  }
 0x274   :  { %4267 = vmatpush1.bf16.msra.mxu0 %v6283_v53  ;;  %4172 = vmatprep.subr.bf16.mxu1 %v6288_v58  ;;  %v6363_v53 = vld [vmem:[#allocation9 + $0x30c] ss:$16 sps:$4 sm:$0xff]   ;;  %v6391_v58 = vld [vmem:[#allocation9 + $0x420] ss:$16 sps:$4 sm:$0xff]  }
 0x275   :  { %4268 = vmatprep.subr.bf16.mxu0 %v6291_v2  ;;  %v6361_v2 = vld [vmem:[#allocation9 + $0x308] ss:$16 sps:$4 sm:$0xff]  }
 0x277   :  { %4173 = vmatpush1.bf16.msra.mxu1 %v6286_v9  ;;  %v6399_v9 = vld [vmem:[#allocation9 + $0x444] ss:$16 sps:$4 sm:$0xff]  }
 0x278   :  { %4269 = vmatpush1.bf16.msra.mxu0 %v6289_v11  ;;  %4174 = vmatprep.subr.bf16.mxu1 %v6294_v48  ;;  %v6366_v11 = vld [vmem:[#allocation9 + $0x32c] ss:$16 sps:$4 sm:$0xff]   ;;  %v6397_v48 = vld [vmem:[#allocation9 + $0x440] ss:$16 sps:$4 sm:$0xff]  }
 0x279   :  { %4270 = vmatprep.subr.bf16.mxu0 %v6297_v43  ;;  %v6364_v43 = vld [vmem:[#allocation9 + $0x328] ss:$16 sps:$4 sm:$0xff]  }
 0x27b   :  { %4175 = vmatpush1.bf16.msra.mxu1 %v6292_v13  ;;  %v6405_v13 = vld [vmem:[#allocation9 + $0x464] ss:$16 sps:$4 sm:$0xff]  }
 0x27c   :  { %4271 = vmatpush1.bf16.msra.mxu0 %v6295_v4  ;;  %4176 = vmatprep.subr.bf16.mxu1 %v6300_v57  ;;  %v6369_v4 = vld [vmem:[#allocation9 + $0x34c] ss:$16 sps:$4 sm:$0xff]   ;;  %v6403_v57 = vld [vmem:[#allocation9 + $0x460] ss:$16 sps:$4 sm:$0xff]  }
 0x27d   :  { %4272 = vmatprep.subr.bf16.mxu0 %v6303_v41  ;;  %v6367_v41 = vld [vmem:[#allocation9 + $0x348] ss:$16 sps:$4 sm:$0xff]  }
 0x27f   :  { %4177 = vmatpush1.bf16.msra.mxu1 %v6298_v26  ;;  %v6411_v26 = vld [vmem:[#allocation9 + $0x484] ss:$16 sps:$4 sm:$0xff]  }
 0x280   :  { %4273 = vmatpush1.bf16.msra.mxu0 %v6301_v31  ;;  %4178 = vmatprep.subr.bf16.mxu1 %v6306_v29  ;;  %v6372_v31 = vld [vmem:[#allocation9 + $0x36c] ss:$16 sps:$4 sm:$0xff]   ;;  %v6409_v29 = vld [vmem:[#allocation9 + $0x480] ss:$16 sps:$4 sm:$0xff]  }
 0x281   :  { %4274 = vmatprep.subr.bf16.mxu0 %v6309_v25  ;;  %v6370_v25 = vld [vmem:[#allocation9 + $0x368] ss:$16 sps:$4 sm:$0xff]  }
 0x283   :  { %4179 = vmatpush1.bf16.msra.mxu1 %v6304_v30  ;;  %v6417_v30 = vld [vmem:[#allocation9 + $0x4a4] ss:$16 sps:$4 sm:$0xff]  }
 0x284   :  { %4275 = vmatpush1.bf16.msra.mxu0 %v6307_v6  ;;  %4180 = vmatprep.subr.bf16.mxu1 %v6312_v59  ;;  %v6375_v6 = vld [vmem:[#allocation9 + $0x38c] ss:$16 sps:$4 sm:$0xff]   ;;  %v6415_v59 = vld [vmem:[#allocation9 + $0x4a0] ss:$16 sps:$4 sm:$0xff]  }
 0x285   :  { %4276 = vmatprep.subr.bf16.mxu0 %v6315_v62  ;;  %v6373_v62 = vld [vmem:[#allocation9 + $0x388] ss:$16 sps:$4 sm:$0xff]  }
 0x287   :  { %4181 = vmatpush1.bf16.msra.mxu1 %v6310_v12  ;;  %v6423_v12 = vld [vmem:[#allocation9 + $0x4c4] ss:$16 sps:$4 sm:$0xff]  }
 0x288   :  { %4277 = vmatpush1.bf16.msra.mxu0 %v6313_v49  ;;  %4182 = vmatprep.subr.bf16.mxu1 %v6318_v51  ;;  %v6378_v49 = vld [vmem:[#allocation9 + $0x3ac] ss:$16 sps:$4 sm:$0xff]   ;;  %v6421_v51 = vld [vmem:[#allocation9 + $0x4c0] ss:$16 sps:$4 sm:$0xff]  }
 0x289   :  { %4287 = vmatprep.subr.bf16.mxu0 %v6321_v45  ;;  %v6376_v45 = vld [vmem:[#allocation9 + $0x3a8] ss:$16 sps:$4 sm:$0xff]  }
 0x28b   :  { %4183 = vmatpush1.bf16.msra.mxu1 %v6316_v38  ;;  %4279 = vmatmul.mubr.bf16.vlgmr.msra.gmra.mrb[8].mxu0 %v7474_v21  ;;  %v6346_v21 = vld [vmem:[#allocation9 + $0x3c0] ss:$16 sps:$4 sm:$0xff]   ;;  %v6429_v38 = vld [vmem:[#allocation9 + $0x4e4] ss:$16 sps:$4 sm:$0xff]  }
 0x28c   :  { %4288 = vmatpush1.bf16.msra.mxu0 %v6319_v10  ;;  %4319 = vmatprep.mubr.bf16.mxu0 %v7472_v19  ;;  %v6348_v19 = vld [vmem:[#allocation9 + $0x3c4] ss:$16 sps:$4 sm:$0xff]   ;;  %v6381_v10 = vld [vmem:[#allocation9 + $0x3cc] ss:$16 sps:$4 sm:$0xff]  }
 0x28d   :  { %4184 = vmatprep.subr.bf16.mxu1 %v6324_v23  ;;  %4289 = vmatprep.subr.bf16.mxu0 %v6327_v37  ;;  %v6427_v23 = vld [vmem:[#allocation9 + $0x4e0] ss:$16 sps:$4 sm:$0xff]   ;;  %v6379_v37 = vld [vmem:[#allocation9 + $0x3c8] ss:$16 sps:$4 sm:$0xff]  }
 0x28f   :  { %4185 = vmatpush1.bf16.msra.mxu1 %v6322_v33  ;;  %v6435_v33 = vld [vmem:[#allocation9 + $0x504] ss:$16 sps:$4 sm:$0xff]  }
 0x290   :  { %4290 = vmatpush1.bf16.msra.mxu0 %v6325_v46  ;;  %4186 = vmatprep.subr.bf16.mxu1 %v6330_v17  ;;  %v6384_v46 = vld [vmem:[#allocation9 + $0x3ec] ss:$16 sps:$4 sm:$0xff]   ;;  %v6433_v17 = vld [vmem:[#allocation9 + $0x500] ss:$16 sps:$4 sm:$0xff]  }
 0x291   :  { %4291 = vmatprep.subr.bf16.mxu0 %v6333_v42  ;;  %v6382_v42 = vld [vmem:[#allocation9 + $0x3e8] ss:$16 sps:$4 sm:$0xff]  }
 0x293   :  { %4187 = vmatpush1.bf16.msra.mxu1 %v6328_v55  ;;  %v6441_v55 = vld [vmem:[#allocation9 + $0x524] ss:$16 sps:$4 sm:$0xff]  }
 0x294   :  { %4292 = vmatpush1.bf16.msra.mxu0 %v6331_v40  ;;  %4188 = vmatprep.subr.bf16.mxu1 %v6336_v27  ;;  %v6390_v40 = vld [vmem:[#allocation9 + $0x40c] ss:$16 sps:$4 sm:$0xff]   ;;  %v6439_v27 = vld [vmem:[#allocation9 + $0x520] ss:$16 sps:$4 sm:$0xff]  }
 0x295   :  { %4293 = vmatprep.subr.bf16.mxu0 %v6339_v52  ;;  %v6388_v52 = vld [vmem:[#allocation9 + $0x408] ss:$16 sps:$4 sm:$0xff]  }
 0x297   :  { %4189 = vmatpush1.bf16.msra.mxu1 %v6334_v47  ;;  %v6447_v47 = vld [vmem:[#allocation9 + $0x544] ss:$16 sps:$4 sm:$0xff]  }
 0x298   :  { %4294 = vmatpush1.bf16.msra.mxu0 %v6337_v50  ;;  %4190 = vmatprep.subr.bf16.mxu1 %v6342_v36  ;;  %v6396_v50 = vld [vmem:[#allocation9 + $0x42c] ss:$16 sps:$4 sm:$0xff]   ;;  %v6445_v36 = vld [vmem:[#allocation9 + $0x540] ss:$16 sps:$4 sm:$0xff]  }
 0x299   :  { %4295 = vmatprep.subr.bf16.mxu0 %v6345_v1  ;;  %v6394_v1 = vld [vmem:[#allocation9 + $0x428] ss:$16 sps:$4 sm:$0xff]  }
 0x29b   :  { %4191 = vmatpush1.bf16.msra.mxu1 %v6340_v15  ;;  %v6453_v15 = vld [vmem:[#allocation9 + $0x564] ss:$16 sps:$4 sm:$0xff]  }
 0x29c   :  { %4296 = vmatpush1.bf16.msra.mxu0 %v6343_v18  ;;  %4192 = vmatprep.subr.bf16.mxu1 %v6348_v19  ;;  %v6451_v18 = vld [vmem:[#allocation9 + $0x560] ss:$16 sps:$4 sm:$0xff]   ;;  %v6400_v19 = vld [vmem:[#allocation9 + $0x448] ss:$16 sps:$4 sm:$0xff]  }
 0x29d   :  { %4297 = vmatprep.subr.bf16.mxu0 %v6351_v5  ;;  %v6459_v5 = vld [vmem:[#allocation9 + $0x584] ss:$16 sps:$4 sm:$0xff]  }
 0x29f   :  { %4193 = vmatpush1.bf16.msra.mxu1 %v6346_v21  ;;  %v6408_v21 = vld [vmem:[#allocation9 + $0x46c] ss:$16 sps:$4 sm:$0xff]  }
 0x2a0   :  { %4298 = vmatpush1.bf16.msra.mxu0 %v6349_v39  ;;  %4194 = vmatprep.subr.bf16.mxu1 %v6354_v35  ;;  %v6406_v39 = vld [vmem:[#allocation9 + $0x468] ss:$16 sps:$4 sm:$0xff]   ;;  %v6465_v35 = vld [vmem:[#allocation9 + $0x5a4] ss:$16 sps:$4 sm:$0xff]  }
 0x2a1   :  { %4299 = vmatprep.subr.bf16.mxu0 %v6357_v16  ;;  %v6414_v16 = vld [vmem:[#allocation9 + $0x48c] ss:$16 sps:$4 sm:$0xff]  }
 0x2a3   :  { %4195 = vmatpush1.bf16.msra.mxu1 %v6352_v20  ;;  %v6463_v20 = vld [vmem:[#allocation9 + $0x5a0] ss:$16 sps:$4 sm:$0xff]  }
 0x2a4   :  { %4300 = vmatpush1.bf16.msra.mxu0 %v6355_v24  ;;  %4205 = vmatprep.subr.bf16.mxu1 %v6387_v28  ;;  %v6471_v24 = vld [vmem:[#allocation9 + $0x5c4] ss:$16 sps:$4 sm:$0xff]   ;;  %v6420_v28 = vld [vmem:[#allocation9 + $0x4ac] ss:$16 sps:$4 sm:$0xff]  }
 0x2a5   :  { %4301 = vmatprep.subr.bf16.mxu0 %v6360_v60  ;;  %v6469_v60 = vld [vmem:[#allocation9 + $0x5c0] ss:$16 sps:$4 sm:$0xff]  }
 0x2a6   :  { %4197 = vmatmul.mubr.bf16.vlgmr.msra.gmra.mrb[4].mxu1 %v7485_v8 }
 0x2a7   :  { %4206 = vmatpush1.bf16.msra.mxu1 %v6385_v34  ;;  %v6418_v34 = vld [vmem:[#allocation9 + $0x4a8] ss:$16 sps:$4 sm:$0xff]  }
 0x2a8   :  { %4302 = vmatpush1.bf16.msra.mxu0 %v6358_v3  ;;  %4207 = vmatprep.subr.bf16.mxu1 %v6393_v14  ;;  %v6426_v3 = vld [vmem:[#allocation9 + $0x4cc] ss:$16 sps:$4 sm:$0xff]   ;;  %v6475_v14 = vld [vmem:[#allocation9 + $0x5e0] ss:$16 sps:$4 sm:$0xff]  }
 0x2a9   :  { %4303 = vmatprep.subr.bf16.mxu0 %v6363_v53  ;;  %v6424_v53 = vld [vmem:[#allocation9 + $0x4c8] ss:$16 sps:$4 sm:$0xff]  }
 0x2ab   :  { %4208 = vmatpush1.bf16.msra.mxu1 %v6391_v58  ;;  %v6483_v58 = vld [vmem:[#allocation12 + $0x4] ss:$8 sps:$4 sm:$0xff]  }
 0x2ac   :  { %4304 = vmatpush1.bf16.msra.mxu0 %v6361_v2  ;;  %4209 = vmatprep.subr.bf16.mxu1 %v6399_v9  ;;  %v6432_v2 = vld [vmem:[#allocation9 + $0x4ec] ss:$16 sps:$4 sm:$0xff]   ;;  %v6430_v9 = vld [vmem:[#allocation9 + $0x4e8] ss:$16 sps:$4 sm:$0xff]  }
 0x2ad   :  { %4305 = vmatprep.subr.bf16.mxu0 %v6366_v11  ;;  %v6438_v11 = vld [vmem:[#allocation9 + $0x50c] ss:$16 sps:$4 sm:$0xff]  }
 0x2af   :  { %4210 = vmatpush1.bf16.msra.mxu1 %v6397_v48  ;;  %v6436_v48 = vld [vmem:[#allocation9 + $0x508] ss:$16 sps:$4 sm:$0xff]  }
 0x2b0   :  { %4306 = vmatpush1.bf16.msra.mxu0 %v6364_v43  ;;  %4211 = vmatprep.subr.bf16.mxu1 %v6405_v13  ;;  %v6444_v43 = vld [vmem:[#allocation9 + $0x52c] ss:$16 sps:$4 sm:$0xff]   ;;  %v6442_v13 = vld [vmem:[#allocation9 + $0x528] ss:$16 sps:$4 sm:$0xff]  }
 0x2b1   :  { %4307 = vmatprep.subr.bf16.mxu0 %v6369_v4  ;;  %v6450_v4 = vld [vmem:[#allocation9 + $0x54c] ss:$16 sps:$4 sm:$0xff]  }
 0x2b3   :  { %4212 = vmatpush1.bf16.msra.mxu1 %v6403_v57  ;;  %v6448_v57 = vld [vmem:[#allocation9 + $0x548] ss:$16 sps:$4 sm:$0xff]  }
 0x2b4   :  { %4308 = vmatpush1.bf16.msra.mxu0 %v6367_v41  ;;  %4213 = vmatprep.subr.bf16.mxu1 %v6411_v26  ;;  %v6456_v41 = vld [vmem:[#allocation9 + $0x56c] ss:$16 sps:$4 sm:$0xff]   ;;  %v6454_v26 = vld [vmem:[#allocation9 + $0x568] ss:$16 sps:$4 sm:$0xff]  }
 0x2b5   :  { %4309 = vmatprep.subr.bf16.mxu0 %v6372_v31  ;;  %v6462_v31 = vld [vmem:[#allocation9 + $0x58c] ss:$16 sps:$4 sm:$0xff]  }
 0x2b7   :  { %4214 = vmatpush1.bf16.msra.mxu1 %v6409_v29  ;;  %v6460_v29 = vld [vmem:[#allocation9 + $0x588] ss:$16 sps:$4 sm:$0xff]  }
 0x2b8   :  { %4310 = vmatpush1.bf16.msra.mxu0 %v6370_v25  ;;  %4215 = vmatprep.subr.bf16.mxu1 %v6417_v30  ;;  %v6468_v25 = vld [vmem:[#allocation9 + $0x5ac] ss:$16 sps:$4 sm:$0xff]   ;;  %v6466_v30 = vld [vmem:[#allocation9 + $0x5a8] ss:$16 sps:$4 sm:$0xff]  }
 0x2b9   :  { %4311 = vmatprep.subr.bf16.mxu0 %v6375_v6  ;;  %v6474_v6 = vld [vmem:[#allocation9 + $0x5cc] ss:$16 sps:$4 sm:$0xff]  }
 0x2bb   :  { %4216 = vmatpush1.bf16.msra.mxu1 %v6415_v59  ;;  %v6472_v59 = vld [vmem:[#allocation9 + $0x5c8] ss:$16 sps:$4 sm:$0xff]  }
 0x2bc   :  { %4312 = vmatpush1.bf16.msra.mxu0 %v6373_v62  ;;  %4217 = vmatprep.subr.bf16.mxu1 %v6423_v12  ;;  %v6480_v62 = vld [vmem:[#allocation9 + $0x5ec] ss:$16 sps:$4 sm:$0xff]   ;;  %v6478_v12 = vld [vmem:[#allocation9 + $0x5e8] ss:$16 sps:$4 sm:$0xff]  }
 0x2bd   :  { %4313 = vmatprep.subr.bf16.mxu0 %v6378_v49  ;;  %v1116_v49 = vsub.s32 4, %v7452_v61 }
 0x2bf   :  { %4218 = vmatpush1.bf16.msra.mxu1 %v6421_v51  ;;  %v1120_v51 = vsub.s32 5, %v7452_v61  ;;  %v6579_v61 = vld [vmem:[#allocation15 + $0x48] sm:$0xff]  }
 0x2c0   :  { %4314 = vmatpush1.bf16.msra.mxu0 %v6376_v45  ;;  %4219 = vmatprep.subr.bf16.mxu1 %v6429_v38  ;;  %v1117_v45 = vrot.slane %v7457_v7, %v1116_v49 }
 0x2c1   :  { %4315 = vmatprep.subr.bf16.mxu0 %v6381_v10  ;;  %v1121_v38 = vrot.slane %v7457_v7, %v1120_v51  ;;  %v6489_v7 = vld [vmem:[#allocation12 + $0x24] ss:$8 sps:$4 sm:$0xff]  }
 0x2c3   :  { %4220 = vmatpush1.bf16.msra.mxu1 %v6427_v23 }
 0x2c4   :  { %4316 = vmatpush1.bf16.msra.mxu0 %v6379_v37  ;;  %4221 = vmatprep.subr.bf16.mxu1 %v6435_v33 }
 0x2c5   :  { %4317 = vmatprep.subr.bf16.mxu0 %v6384_v46 }
 0x2c7   :  { %4222 = vmatpush1.bf16.msra.mxu1 %v6433_v17 }
 0x2c8   :  { %4318 = vmatpush1.bf16.msra.mxu0 %v6382_v42  ;;  %4223 = vmatprep.subr.bf16.mxu1 %v6441_v55 }
 0x2c9   :  { %4328 = vmatprep.subr.bf16.mxu0 %v6390_v40 }
 0x2cb   :  { %4320 = vmatmul.mubr.bf16.vlgmr.msra.gmra.mrb[8].mxu0 %v7485_v8  ;;  %4224 = vmatpush1.bf16.msra.mxu1 %v6439_v27  ;;  %v6477_v8 = vld [vmem:[#allocation9 + $0x5e4] ss:$16 sps:$4 sm:$0xff]  }
 0x2cc   :  { %4329 = vmatpush1.bf16.msra.mxu0 %v6388_v52  ;;  %4225 = vmatprep.subr.bf16.mxu1 %v6447_v47  ;;  %v6481_v27 = vld [vmem:[#allocation12] ss:$8 sps:$4 sm:$0xff]   ;;  %v6486_v47 = vld [vmem:[#allocation12 + $0x14] ss:$8 sps:$4 sm:$0xff]  }
 0x2cd   :  { %4330 = vmatprep.subr.bf16.mxu0 %v6396_v50  ;;  %v6484_v50 = vld [vmem:[#allocation12 + $0x10] ss:$8 sps:$4 sm:$0xff]  }
 0x2cf   :  { %4226 = vmatpush1.bf16.msra.mxu1 %v6445_v36  ;;  %v6487_v36 = vld [vmem:[#allocation12 + $0x20] ss:$8 sps:$4 sm:$0xff]  }
 0x2d0   :  { %4331 = vmatpush1.bf16.msra.mxu0 %v6394_v1  ;;  %4227 = vmatprep.subr.bf16.mxu1 %v6453_v15  ;;  %v6492_v1 = vld [vmem:[#allocation12 + $0x34] ss:$8 sps:$4 sm:$0xff]   ;;  %v6490_v15 = vld [vmem:[#allocation12 + $0x30] ss:$8 sps:$4 sm:$0xff]  }
 0x2d1   :  { %4332 = vmatprep.subr.bf16.mxu0 %v6402_v54  ;;  %v6495_v54 = vld [vmem:[#allocation12 + $0x44] ss:$8 sps:$4 sm:$0xff]  }
 0x2d3   :  { %4228 = vmatpush1.bf16.msra.mxu1 %v6451_v18  ;;  %v6493_v18 = vld [vmem:[#allocation12 + $0x40] ss:$8 sps:$4 sm:$0xff]  }
 0x2d4   :  { %4333 = vmatpush1.bf16.msra.mxu0 %v6400_v19  ;;  %4229 = vmatprep.subr.bf16.mxu1 %v6459_v5  ;;  %v6498_v19 = vld [vmem:[#allocation12 + $0x54] ss:$8 sps:$4 sm:$0xff]   ;;  %v6496_v5 = vld [vmem:[#allocation12 + $0x50] ss:$8 sps:$4 sm:$0xff]  }
 0x2d5   :  { %4334 = vmatprep.subr.bf16.mxu0 %v6408_v21  ;;  %v6501_v21 = vld [vmem:[#allocation12 + $0x64] ss:$8 sps:$4 sm:$0xff]  }
 0x2d7   :  { %4230 = vmatpush1.bf16.msra.mxu1 %v6457_v32  ;;  %v6499_v32 = vld [vmem:[#allocation12 + $0x60] ss:$8 sps:$4 sm:$0xff]  }
 0x2d8   :  { %4335 = vmatpush1.bf16.msra.mxu0 %v6406_v39  ;;  %4231 = vmatprep.subr.bf16.mxu1 %v6465_v35  ;;  %v6504_v39 = vld [vmem:[#allocation12 + $0x74] ss:$8 sps:$4 sm:$0xff]   ;;  %v6502_v35 = vld [vmem:[#allocation12 + $0x70] ss:$8 sps:$4 sm:$0xff]  }
 0x2d9   :  { %4336 = vmatprep.subr.bf16.mxu0 %v6414_v16  ;;  %v6507_v16 = vld [vmem:[#allocation12 + $0x84] ss:$8 sps:$4 sm:$0xff]  }
 0x2db   :  { %4232 = vmatpush1.bf16.msra.mxu1 %v6463_v20  ;;  %v6505_v20 = vld [vmem:[#allocation12 + $0x80] ss:$8 sps:$4 sm:$0xff]  }
 0x2dc   :  { %4337 = vmatpush1.bf16.msra.mxu0 %v6412_v22  ;;  %4233 = vmatprep.subr.bf16.mxu1 %v6471_v24  ;;  %v6510_v22 = vld [vmem:[#allocation12 + $0x94] ss:$8 sps:$4 sm:$0xff]   ;;  %v6508_v24 = vld [vmem:[#allocation12 + $0x90] ss:$8 sps:$4 sm:$0xff]  }
 0x2dd   :  { %4338 = vmatprep.subr.bf16.mxu0 %v6420_v28  ;;  %v6513_v28 = vld [vmem:[#allocation12 + $0xa4] ss:$8 sps:$4 sm:$0xff]  }
 0x2df   :  { %4234 = vmatpush1.bf16.msra.mxu1 %v6469_v60  ;;  %v6511_v60 = vld [vmem:[#allocation12 + $0xa0] ss:$8 sps:$4 sm:$0xff]  }
 0x2e0   :  { %4339 = vmatpush1.bf16.msra.mxu0 %v6418_v34  ;;  %4235 = vmatprep.subr.bf16.mxu1 %v6477_v8  ;;  %v6516_v34 = vld [vmem:[#allocation12 + $0xb4] ss:$8 sps:$4 sm:$0xff]   ;;  %v6514_v8 = vld [vmem:[#allocation12 + $0xb0] ss:$8 sps:$4 sm:$0xff]  }
 0x2e1   :  { %4340 = vmatprep.subr.bf16.mxu0 %v6426_v3  ;;  %v6519_v3 = vld [vmem:[#allocation12 + $0xc4] ss:$8 sps:$4 sm:$0xff]  }
 0x2e3   :  { %4236 = vmatpush1.bf16.msra.mxu1 %v6475_v14  ;;  %v6517_v14 = vld [vmem:[#allocation12 + $0xc0] ss:$8 sps:$4 sm:$0xff]  }
 0x2e4   :  { %4341 = vmatpush1.bf16.msra.mxu0 %v6424_v53  ;;  %4773 = vmatprep.subr.bf16.mxu1 %v6483_v58  ;;  %v6522_v53 = vld [vmem:[#allocation12 + $0xd4] ss:$8 sps:$4 sm:$0xff]   ;;  %v6520_v58 = vld [vmem:[#allocation12 + $0xd0] ss:$8 sps:$4 sm:$0xff]  }
 0x2e5   :  { %4342 = vmatprep.subr.bf16.mxu0 %v6432_v2  ;;  %v6525_v2 = vld [vmem:[#allocation12 + $0xe4] ss:$8 sps:$4 sm:$0xff]  }
 0x2e8   :  { %4343 = vmatpush1.bf16.msra.mxu0 %v6430_v9  ;;  %v6523_v9 = vld [vmem:[#allocation12 + $0xe0] ss:$8 sps:$4 sm:$0xff]  }
 0x2e9   :  { %4344 = vmatprep.subr.bf16.mxu0 %v6438_v11  ;;  %v6528_v11 = vld [vmem:[#allocation12 + $0xf4] ss:$8 sps:$4 sm:$0xff]  }
 0x2ec   :  { %4345 = vmatpush1.bf16.msra.mxu0 %v6436_v48  ;;  %v6526_v48 = vld [vmem:[#allocation12 + $0xf0] ss:$8 sps:$4 sm:$0xff]  }
 0x2ed   :  { %4346 = vmatprep.subr.bf16.mxu0 %v6444_v43  ;;  %v6531_v43 = vld [vmem:[#allocation12 + $0x104] ss:$8 sps:$4 sm:$0xff]  }
 0x2f0   :  { %4347 = vmatpush1.bf16.msra.mxu0 %v6442_v13  ;;  %v7493_v13 = vld [vmem:[#allocation11] sm:$0xf] }
 0x2f1   :  { %4348 = vmatprep.subr.bf16.mxu0 %v6450_v4  ;;  %v3146_v4 = vrot.slane %v7493_v13, %v7455_v56 }
 0x2f4   :  { %4349 = vmatpush1.bf16.msra.mxu0 %v6448_v57  ;;  %v3150_v57 = vrot.slane %v7493_v13, %v7460_v0 }
 0x2f5   :  { %4350 = vmatprep.subr.bf16.mxu0 %v6456_v41  ;;  %v3158_v41 = vrot.slane %v7493_v13, %v1112_v63 }
 0x2f8   :  { %4351 = vmatpush1.bf16.msra.mxu0 %v6454_v26 }
 0x2f9   :  { %4352 = vmatprep.subr.bf16.mxu0 %v6462_v31 }
 0x2fc   :  { %4353 = vmatpush1.bf16.msra.mxu0 %v6460_v29 }
 0x2fd   :  { %4354 = vmatprep.subr.bf16.mxu0 %v6468_v25 }
 0x300   :  { %4355 = vmatpush1.bf16.msra.mxu0 %v6466_v30 }
 0x301   :  { %4356 = vmatprep.subr.bf16.mxu0 %v6474_v6 }
 0x304   :  { %4357 = vmatpush1.bf16.msra.mxu0 %v6472_v59 }
 0x305   :  { %4358 = vmatprep.subr.bf16.mxu0 %v6480_v62 }
 0x308   :  { %4359 = vmatpush1.bf16.msra.mxu0 %v6478_v12 }
 0x31d   :  { %v2930_v10 = vpop.f32.mrb[4].mxu0 }
 0x31e   :  { %v5688_v23 = vadd.f32 %v2930_v10, %v1117_v45  ;;  %v2932_v37 = vpop.f32.mrb[5].mxu0 }
 0x31f   :  { %v5689_v33 = vadd.f32 %v2932_v37, %v1121_v38  ;;  %v2934_v46 = vpop.f32.mrb[6].mxu0  ;;  %v6529_v37 = vld [vmem:[#allocation12 + $0x100] ss:$8 sps:$4 sm:$0xff]  }
 0x320   :  { %v2941_v17 = vmax.f32 %v5688_v23, 0.0  ;;  %v2935_v42 = vpop.f32.mrb[7].mxu0  ;;  %v6534_v46 = vld [vmem:[#allocation12 + $0x114] ss:$8 sps:$4 sm:$0xff]  }
 0x321   :  { %v2942_v55 = vmax.f32 %v5689_v33, 0.0  ;;  %v6537_v42 = vld [vmem:[#allocation12 + $0x124] ss:$8 sps:$4 sm:$0xff]  }
 0x322   :  { %v2947_v52 = vpack.c.bf16 %v2941_v17, %v2941_v17  ;;  %v6532_v17 = vld [vmem:[#allocation12 + $0x110] ss:$8 sps:$4 sm:$0xff]  }
 0x323   :  { %v2948_v40 = vpack.c.bf16 %v2942_v55, %v2942_v55  ;;  %v6535_v55 = vld [vmem:[#allocation12 + $0x120] ss:$8 sps:$4 sm:$0xff]  }
 0x325   :  { %4237 = vmatprep.mubr.bf16.mxu1 %v2948_v40  ;;  %4360 = vmatprep.mubr.bf16.mxu0 %v2948_v40  ;;  %v6540_v40 = vld [vmem:[#allocation12 + $0x134] ss:$8 sps:$4 sm:$0xff]  }
 0x326   :  { %4238 = vmatmul.mubr.bf16.vlgmr.msra.gmra.mrb[4].mxu1 %v2947_v52  ;;  %4361 = vmatmul.mubr.bf16.vlgmr.msra.gmra.mrb[8].mxu0 %v2947_v52  ;;  %v6543_v52 = vld [vmem:[#allocation12 + $0x144] ss:$8 sps:$4 sm:$0xff]  }
 0x327   :  { %4774 = vmatpush1.bf16.msra.mxu1 %v6481_v27  ;;  %v6538_v27 = vld [vmem:[#allocation12 + $0x130] ss:$8 sps:$4 sm:$0xff]  }
 0x328   :  { %4775 = vmatprep.subr.bf16.mxu1 %v6486_v47  ;;  %v6541_v47 = vld [vmem:[#allocation12 + $0x140] ss:$8 sps:$4 sm:$0xff]  }
 0x32b   :  { %4776 = vmatpush1.bf16.msra.mxu1 %v6484_v50  ;;  %v6546_v50 = vld [vmem:[#allocation12 + $0x154] ss:$8 sps:$4 sm:$0xff]  }
 0x32c   :  { %4777 = vmatprep.subr.bf16.mxu1 %v6489_v7  ;;  %v6544_v7 = vld [vmem:[#allocation12 + $0x150] ss:$8 sps:$4 sm:$0xff]  }
 0x32f   :  { %4778 = vmatpush1.bf16.msra.mxu1 %v6487_v36  ;;  %v6549_v36 = vld [vmem:[#allocation12 + $0x164] ss:$8 sps:$4 sm:$0xff]  }
 0x330   :  { %4779 = vmatprep.subr.bf16.mxu1 %v6492_v1  ;;  %v6547_v1 = vld [vmem:[#allocation12 + $0x160] ss:$8 sps:$4 sm:$0xff]  }
 0x333   :  { %4780 = vmatpush1.bf16.msra.mxu1 %v6490_v15  ;;  %v6552_v15 = vld [vmem:[#allocation12 + $0x174] ss:$8 sps:$4 sm:$0xff]  }
 0x334   :  { %4781 = vmatprep.subr.bf16.mxu1 %v6495_v54  ;;  %v6550_v54 = vld [vmem:[#allocation12 + $0x170] ss:$8 sps:$4 sm:$0xff]  }
 0x337   :  { %4782 = vmatpush1.bf16.msra.mxu1 %v6493_v18  ;;  %v6555_v18 = vld [vmem:[#allocation12 + $0x184] ss:$8 sps:$4 sm:$0xff]  }
 0x338   :  { %4783 = vmatprep.subr.bf16.mxu1 %v6498_v19  ;;  %v6553_v19 = vld [vmem:[#allocation12 + $0x180] ss:$8 sps:$4 sm:$0xff]  }
 0x33b   :  { %4784 = vmatpush1.bf16.msra.mxu1 %v6496_v5  ;;  %v6558_v5 = vld [vmem:[#allocation12 + $0x194] ss:$8 sps:$4 sm:$0xff]  }
 0x33c   :  { %4785 = vmatprep.subr.bf16.mxu1 %v6501_v21  ;;  %v6556_v21 = vld [vmem:[#allocation12 + $0x190] ss:$8 sps:$4 sm:$0xff]  }
 0x33f   :  { %4786 = vmatpush1.bf16.msra.mxu1 %v6499_v32  ;;  %v6561_v32 = vld [vmem:[#allocation12 + $0x1a4] ss:$8 sps:$4 sm:$0xff]  }
 0x340   :  { %4787 = vmatprep.subr.bf16.mxu1 %v6504_v39  ;;  %v6559_v39 = vld [vmem:[#allocation12 + $0x1a0] ss:$8 sps:$4 sm:$0xff]  }
 0x343   :  { %4788 = vmatpush1.bf16.msra.mxu1 %v6502_v35  ;;  %v6564_v35 = vld [vmem:[#allocation12 + $0x1b4] ss:$8 sps:$4 sm:$0xff]  }
 0x344   :  { %4789 = vmatprep.subr.bf16.mxu1 %v6507_v16  ;;  %v6562_v16 = vld [vmem:[#allocation12 + $0x1b0] ss:$8 sps:$4 sm:$0xff]  }
 0x347   :  { %4790 = vmatpush1.bf16.msra.mxu1 %v6505_v20  ;;  %v6567_v20 = vld [vmem:[#allocation12 + $0x1c4] ss:$8 sps:$4 sm:$0xff]  }
 0x348   :  { %4791 = vmatprep.subr.bf16.mxu1 %v6510_v22  ;;  %v6565_v22 = vld [vmem:[#allocation12 + $0x1c0] ss:$8 sps:$4 sm:$0xff]  }
 0x34b   :  { %4792 = vmatpush1.bf16.msra.mxu1 %v6508_v24  ;;  %v6570_v24 = vld [vmem:[#allocation12 + $0x1d4] ss:$8 sps:$4 sm:$0xff]  }
 0x34c   :  { %4793 = vmatprep.subr.bf16.mxu1 %v6513_v28  ;;  %v6568_v28 = vld [vmem:[#allocation12 + $0x1d0] ss:$8 sps:$4 sm:$0xff]  }
 0x34f   :  { %4794 = vmatpush1.bf16.msra.mxu1 %v6511_v60  ;;  %v3154_v60 = vrot.slane %v7493_v13, %v1108_v44  ;;  %v6580_v44 = vld [vmem:[#allocation15 + $0x8] sm:$0xff]   ;;  %v6583_v13 = vld [vmem:[#allocation15 + $0x58] sm:$0xff]  }
 0x350   :  { %4795 = vmatprep.subr.bf16.mxu1 %v6516_v34  ;;  %v6573_v34 = vld [vmem:[#allocation12 + $0x1e4] ss:$8 sps:$4 sm:$0xff]  }
 0x353   :  { %4796 = vmatpush1.bf16.msra.mxu1 %v6514_v8  ;;  %v6571_v8 = vld [vmem:[#allocation12 + $0x1e0] ss:$8 sps:$4 sm:$0xff]  }
 0x354   :  { %4797 = vmatprep.subr.bf16.mxu1 %v6519_v3 }
 0x357   :  { %4798 = vmatpush1.bf16.msra.mxu1 %v6517_v14  ;;  %v6576_v14 = vld [vmem:[#allocation12 + $0x1f4] ss:$8 sps:$4 sm:$0xff]  }
 0x358   :  { %4799 = vmatprep.subr.bf16.mxu1 %v6522_v53  ;;  %v6574_v53 = vld [vmem:[#allocation12 + $0x1f0] ss:$8 sps:$4 sm:$0xff]  }
 0x35b   :  { %4800 = vmatpush1.bf16.msra.mxu1 %v6520_v58 }
 0x35c   :  { %4801 = vmatprep.subr.bf16.mxu1 %v6525_v2  ;;  %v6577_v2 = vld [vmem:[#allocation15 + $0x40] sm:$0xff]  }
 0x35f   :  { %4802 = vmatpush1.bf16.msra.mxu1 %v6523_v9  ;;  %v6578_v9 = vld [vmem:[#allocation15] sm:$0xff]  }
 0x360   :  { %4803 = vmatprep.subr.bf16.mxu1 %v6528_v11 }
 0x363   :  { %4804 = vmatpush1.bf16.msra.mxu1 %v6526_v48  ;;  %v6581_v48 = vld [vmem:[#allocation15 + $0x50] sm:$0xff]  }
 0x364   :  { %4814 = vmatprep.subr.bf16.mxu1 %v6531_v43  ;;  %v6582_v43 = vld [vmem:[#allocation15 + $0x10] sm:$0xff]  }
 0x3f9   :  { %v4239_v26 = vpop.f32.mrb[4].mxu1  ;;  %v7502_v31 = vpop.f32.mrb[8].mxu0 }
 0x3fa   :  { %v5690_v29 = vadd.f32 %v4239_v26, %v3146_v4  ;;  %v4241_v25 = vpop.f32.mrb[5].mxu1  ;;  %v4364_v30 = vpop.f32.mrb[9].mxu0  ;;  %v5692_v3 = vadd.f32 %v7502_v31, %v3154_v60  ;;  %v6584_v4 = vld [vmem:[#allocation15 + $0x18] sm:$0xff]   ;;  %v6587_v26 = vld [vmem:[#allocation15 + $0x68] sm:$0xff]  }
 0x3fb   :  { %v5691_v6 = vadd.f32 %v4241_v25, %v3150_v57  ;;  %v5693_v59 = vadd.f32 %v4364_v30, %v3158_v41  ;;  %v4243_v62 = vpop.f32.mrb[6].mxu1  ;;  %v4366_v12 = vpop.f32.mrb[10].mxu0  ;;  %v6585_v57 = vld [vmem:[#allocation15 + $0x60] sm:$0xff]   ;;  %v6588_v31 = vld [vmem:[#allocation15 + $0x28] sm:$0xff]   ;;  %v6590_v25 = vld [vmem:[#allocation15 + $0x30] sm:$0xff]  }
 0x3fc   :  { %v4369_v49 = vmax.f32 %v5690_v29, 0.0  ;;  %v4244_v51 = vpop.f32.mrb[7].mxu1  ;;  %v4367_v45 = vpop.f32.mrb[11].mxu0  ;;  %v4371_v58 = vmax.f32 %v5692_v3, 0.0  ;;  %v6586_v41 = vld [vmem:[#allocation15 + $0x20] sm:$0xff]   ;;  %v6589_v29 = vld [vmem:[#allocation15 + $0x70] sm:$0xff]  }
 0x3fd   :  { %v4370_v38 = vmax.f32 %v5691_v6, 0.0  ;;  %v4372_v10 = vmax.f32 %v5693_v59, 0.0  ;;  %v6591_v30 = vld [vmem:[#allocation15 + $0x78] sm:$0xff]   ;;  %v5039_v59 = vld [vmem:[#allocation18] sm:$0xff] }
 0x3fe   :  { %v4373_v33 = vpack.c.bf16 %v4369_v49, %v4369_v49  ;;  %v4375_v11 = vpack.c.bf16 %v4371_v58, %v4371_v58  ;;  %v6592_v6 = vld [vmem:[#allocation15 + $0x38] sm:$0xff]   ;;  %5041 = vrot.lane.b32.xlu0 %v5039_v59, %s6907_s5 }
 0x3ff   :  { %v4374_v23 = vpack.c.bf16 %v4370_v38, %v4370_v38  ;;  %v4376_v63 = vpack.c.bf16 %v4372_v10, %v4372_v10  ;;  %v4441_v62 = vld [vmem:[#allocation14] sm:$0x3] }
 0x400   :  { %v4446_v12 = vrot.slane %v4441_v62, %v7455_v56  ;;  %v4450_v49 = vrot.slane %v4441_v62, %v7460_v0 }
 0x401   :  { %4805 = vmatprep.mubr.bf16.mxu1 %v4374_v23 }
 0x402   :  { %4806 = vmatmul.mubr.bf16.vlgmr.msra.gmra.mrb[8].mxu1 %v4373_v33 }
 0x403   :  { %4815 = vmatpush1.bf16.msra.mxu1 %v6529_v37  ;;  %4846 = vmatprep.mubr.bf16.mxu1 %v4376_v63 }
 0x404   :  { %4816 = vmatprep.subr.bf16.mxu1 %v6534_v46 }
 0x407   :  { %4817 = vmatpush1.bf16.msra.mxu1 %v6532_v17 }
 0x408   :  { %4818 = vmatprep.subr.bf16.mxu1 %v6537_v42 }
 0x40b   :  { %4819 = vmatpush1.bf16.msra.mxu1 %v6535_v55  ;;  %v5645_v55 = vld [vmem:[#allocation17] ss:$0 sm:$0xff] }
 0x40c   :  { %4820 = vmatprep.subr.bf16.mxu1 %v6540_v40 }
 0x40f   :  { %4821 = vmatpush1.bf16.msra.mxu1 %v6538_v27 }
 0x410   :  { %4822 = vmatprep.subr.bf16.mxu1 %v6543_v52 }
 0x413   :  { %4823 = vmatpush1.bf16.msra.mxu1 %v6541_v47 }
 0x414   :  { %4824 = vmatprep.subr.bf16.mxu1 %v6546_v50 }
 0x417   :  { %4825 = vmatpush1.bf16.msra.mxu1 %v6544_v7 }
 0x418   :  { %4826 = vmatprep.subr.bf16.mxu1 %v6549_v36 }
 0x41b   :  { %4827 = vmatpush1.bf16.msra.mxu1 %v6547_v1 }
 0x41c   :  { %4828 = vmatprep.subr.bf16.mxu1 %v6552_v15 }
 0x41f   :  { %4829 = vmatpush1.bf16.msra.mxu1 %v6550_v54 }
 0x420   :  { %4830 = vmatprep.subr.bf16.mxu1 %v6555_v18 }
 0x423   :  { %4831 = vmatpush1.bf16.msra.mxu1 %v6553_v19 }
 0x424   :  { %4832 = vmatprep.subr.bf16.mxu1 %v6558_v5 }
 0x427   :  { %4833 = vmatpush1.bf16.msra.mxu1 %v6556_v21 }
 0x428   :  { %4834 = vmatprep.subr.bf16.mxu1 %v6561_v32 }
 0x42b   :  { %4835 = vmatpush1.bf16.msra.mxu1 %v6559_v39 }
 0x42c   :  { %4836 = vmatprep.subr.bf16.mxu1 %v6564_v35 }
 0x42f   :  { %4837 = vmatpush1.bf16.msra.mxu1 %v6562_v16 }
 0x430   :  { %4838 = vmatprep.subr.bf16.mxu1 %v6567_v20 }
 0x433   :  { %4839 = vmatpush1.bf16.msra.mxu1 %v6565_v22 }
 0x434   :  { %4840 = vmatprep.subr.bf16.mxu1 %v6570_v24 }
 0x437   :  { %4841 = vmatpush1.bf16.msra.mxu1 %v6568_v28 }
 0x438   :  { %4842 = vmatprep.subr.bf16.mxu1 %v6573_v34 }
 0x43b   :  { %4843 = vmatpush1.bf16.msra.mxu1 %v6571_v8 }
 0x43c   :  { %4844 = vmatprep.subr.bf16.mxu1 %v6576_v14 }
 0x43f   :  { %4845 = vmatpush1.bf16.msra.mxu1 %v6574_v53 }
 0x440   :  { %5662 = vmatprep.subr.bf16.mxu1 %v6577_v2 }
 0x442   :  { %4847 = vmatmul.mubr.bf16.vlgmr.msra.gmra.mrb[8].mxu1 %v4375_v11 }
 0x443   :  { %5663 = vmatpush3.bf16.msra.mxu1 %v6578_v9 }
 0x444   :  { %5664 = vmatprep.subr.bf16.mxu1 %v6579_v61 }
 0x447   :  { %5665 = vmatpush3.bf16.msra.mxu1 %v6580_v44 }
 0x448   :  { %5666 = vmatprep.subr.bf16.mxu1 %v6581_v48 }
 0x44b   :  { %5667 = vmatpush3.bf16.msra.mxu1 %v6582_v43 }
 0x44c   :  { %5668 = vmatprep.subr.bf16.mxu1 %v6583_v13 }
 0x44f   :  { %5669 = vmatpush3.bf16.msra.mxu1 %v6584_v4 }
 0x450   :  { %5670 = vmatprep.subr.bf16.mxu1 %v6585_v57 }
 0x453   :  { %5671 = vmatpush3.bf16.msra.mxu1 %v6586_v41 }
 0x454   :  { %5672 = vmatprep.subr.bf16.mxu1 %v6587_v26 }
 0x457   :  { %5673 = vmatpush3.bf16.msra.mxu1 %v6588_v31 }
 0x458   :  { %5674 = vmatprep.subr.bf16.mxu1 %v6589_v29 }
 0x45b   :  { %5675 = vmatpush3.bf16.msra.mxu1 %v6590_v25 }
 0x45c   :  { %5676 = vmatprep.subr.bf16.mxu1 %v6591_v30 }
 0x45f   :  { %5677 = vmatpush3.bf16.msra.mxu1 %v6592_v6 }
 0x515   :  { %v4848_v51 = vpop.f32.mrb[8].mxu1 }
 0x516   :  { %v5694_v45 = vadd.f32 %v4848_v51, %v4446_v12  ;;  %v4850_v38 = vpop.f32.mrb[9].mxu1 }
 0x517   :  { %v5695_v10 = vadd.f32 %v4850_v38, %v4450_v49  ;;  %v4852_v23 = vpop.f32.mrb[10].mxu1 }
 0x518   :  { %v4855_v37 = vmax.f32 %v5694_v45, 0.0  ;;  %v4853_v33 = vpop.f32.mrb[11].mxu1 }
 0x519   :  { %v4856_v46 = vmax.f32 %v5695_v10, 0.0 }
 0x51a   :  { %4857 = vst [vmem:[#allocation21] sm:$0xff] %v4855_v37  ;;  %v4859_v17 = vpack.c.bf16 %v4855_v37, %v4855_v37 }
 0x51b   :  { %4858 = vst [vmem:[#allocation21 + $0x8] sm:$0xff] %v4856_v46  ;;  %v4860_v63 = vpack.c.bf16 %v4856_v46, %v4856_v46 }
 0x51d   :  { %5028 = vmatprep.mubr.bf16.mxu1 %v4860_v63 }
 0x51e   :  { %5029 = vmatmul.mubr.bf16.vlgmr.msra.gmra.mrb[12].mxu1 %v4859_v17 }
 0x5f1   :  { %v5678_v42 = vpop.f32.mrb[12].mxu1 }
 0x5f2   :  { %v5679_v40 = vpop.f32.mrb[13].mxu1 }
 0x5f3   :  { %v5680_v56 = vadd.f32 %v5679_v40, %v5678_v42  ;;  %v5681_v27 = vpop.f32.mrb[14].mxu1 }
 0x5f4   :  { %v5682_v0 = vpop.f32.mrb[15].mxu1 }
 0x5f5   :  { %v5031_v52 = vadd.f32 %v5680_v56, %v5645_v55 }
 0x5f7   :  { %v5036_v47 = vmul.f32 0.5, %v5031_v52  ;;  %5052 = vst [vmem:[#allocation23] sm:$0xff] %v5031_v52 }
 0x5f9   :  { %v5037_v50 = vmul.f32 1.442695, %v5036_v47 }
 0x5fb   :  { %6593 = vpow2.f32 %v5037_v50 }
 0x5fc   :  { %6826 = shalt.err (!%p6823_p0)
}
 0x5fd   :  { %s6827_s17 = scalar_lea.hbm %s7559_s11, 256 }
 0x5fe   :  { %p6828_p1 = scmp.ne.s32.totalorder %s7559_s11, %s6827_s17  ;;  %p6831_p2 = scmp.lt.u32.totalorder %s6827_s17, %s7559_s11 }
 0x600   :  { %p6833_p3 = pnand %p6831_p2, %p6828_p1 }
 0x602   :  { %6836 = shalt.err (!%p6833_p3)
}
 0x603   :  { %5073 = dma.vmem_to_hbm [thread:$0]  %s5071_s15, 256, %s7559_s11, [#allocation22]  }
 0x604   :  { %s6837_s29 = scalar_lea.vmem %s5061_s3, 768  ;;  %p6842_p5 = scmp.lt.s32.totalorder %s5061_s3, %s5061_s3 }
 0x605   :  { %p6838_p4 = scmp.ne.s32.totalorder %s5061_s3, %s6837_s29  ;;  %p6843_p6 = scmp.lt.s32.totalorder %s6837_s29, %s6837_s29 }
 0x607   :  { %p6844_p7 = por %p6843_p6, %p6842_p5 }
 0x609   :  { %p6845_p8 = pnand %p6844_p7, %p6838_p4 }
 0x60b   :  { %6848 = shalt.err (!%p6845_p8)
}
 0x60c   :  { %s6849_s21 = scalar_lea.hbm %s7558_s10, 768 }
 0x60d   :  { %p6850_p9 = scmp.ne.s32.totalorder %s7558_s10, %s6849_s21  ;;  %p6853_p10 = scmp.lt.u32.totalorder %s6849_s21, %s7558_s10 }
 0x60f   :  { %p6855_p11 = pnand %p6853_p10, %p6850_p9 }
 0x611   :  { %6858 = shalt.err (!%p6855_p11)
}
 0x612   :  { %5063 = dma.vmem_to_hbm [thread:$0]  %s5061_s3, 768, %s7558_s10, [#allocation5]   ;;  %v5042_v7 = vpop.permute.xlu0 %5041  ;;  %v6594_v36 = vpop.eup %6593  ;;  %vm5050_vm7 = vcmask 523264  }
 0x613   :  { %v5044_v1 = vmul.f32 %v6594_v36, %v5042_v7  ;;  %s6917_s28 = smov [#allocation23]  }
 0x614   :  { %s5080_s0 = sshll.u32 %s6917_s28, 4  ;;  %s5081_s0 = int_to_ptr.vmem [resolvable:$true] %s5080_s0 }
 0x615   :  { %5046 = vrot.lane.b32.xlu0 %v5044_v1, %s6907_s5  ;;  %s6859_s8 = scalar_lea.vmem %s5081_s0, 256  ;;  %p6864_p13 = scmp.lt.s32.totalorder %s5081_s0, %s5081_s0 }
 0x616   :  { %p6860_p12 = scmp.ne.s32.totalorder %s5081_s0, %s6859_s8  ;;  %p6865_p0 = scmp.lt.s32.totalorder %s6859_s8, %s6859_s8 }
 0x618   :  { %p6866_p1 = por %p6865_p0, %p6864_p13 }
 0x61a   :  { %p6867_p2 = pnand %p6866_p1, %p6860_p12 }
 0x687   :  { %v5047_v15 = vpop.permute.xlu0 %5046 }
 0x688   :  { %v5049_v54 = vadd.f32 %v5047_v15, %v5031_v52 }
 0x68a   :  { %v5051_v18 = vsel %vm5050_vm7, %v5049_v54, 0.0 }
 0x68b   :  { %5053 = vst [vmem:[#allocation23 + $0x8] sm:$0xff] %v5051_v18 }
 0x68c   :  { %6870 = shalt.err (!%p6867_p2)
}
 0x68d   :  { %s6871_s9 = scalar_lea.hbm %s7560_s12, 256 }
 0x68e   :  { %p6872_p3 = scmp.ne.s32.totalorder %s7560_s12, %s6871_s9  ;;  %p6875_p4 = scmp.lt.u32.totalorder %s6871_s9, %s7560_s12 }
 0x690   :  { %p6877_p5 = pnand %p6875_p4, %p6872_p3 }
 0x692   :  { %6880 = shalt.err (!%p6877_p5)
}
 0x693   :  { %5083 = dma.vmem_to_hbm [thread:$0]  %s5081_s0, 256, %s7560_s12, [#allocation22]  }
 0x694   :  { %6893 = dma.done.wait [#allocation5], 768  }
 0x695   :  { %6894 = vsyncadd [#allocation5], 4294966528 }
 0x696   :  { %6895 = dma.done.wait [#allocation22], 512  }
 0x697   :  { %6896 = vsyncadd [#allocation22], 4294966784 }
 0x698   :  { %5093 = vsyncpa [#allocation4], 1 }
 0x699   :  { %5094 = vsyncpa [#allocation7], 1 }
 0x69a   :  { %5095 = vsyncpa [#allocation10], 1 }
 0x69b   :  { %5096 = vsyncpa [#allocation13], 1 }
 0x69c   :  { %5097 = vsyncpa [#allocation16], 1 }
 0x69d   :  { %5098 = vsyncpa [#allocation19], 1 }
 0x69e   :  { %5099 = vsyncpa [#allocation5], 1 }
 0x69f   :  { %5100 = vsyncpa [#allocation22], 1 }

</bundles_post_ra>
